<compile_context>
chip_gen: v5e
topology: v5e:2x2
jax: 0.10.0
libtpu: 0.0.40
codegen_flags: <defaults>
</compile_context>

<pallas_src>
import jax
import jax.numpy as jnp
from jax import lax
from jax.experimental import pallas as pl
from jax.experimental.pallas import tpu as pltpu


def cnn_fused_kernel(l_ref, a_ref, bconv_ref, w_ref, bfc_ref, o_ref):
    """Fused conv3x3 + bias + ReLU + maxpool2x2 + FC for a block of B samples.

    l_ref:    (13, B, 128) bf16   l[pi, b, r*28 + j'] = x[b, 2*pi + r, j'],
                                  r = 0..3 conv-row offsets; cols 112..127 zero.
    a_ref:    (2, 128, 512) bf16  banded conv weights for pool-row offsets 0/1:
                                  cols [pj*16 + c]       -> conv col 2*pj
                                  cols [256 + pj*16 + c] -> conv col 2*pj + 1
                                  (pj=0..12, c=0..15; cols 208..255 / 464..511
                                   and rows 112..127 are zero).
    bconv_ref:(1, 256) f32        conv bias tiled over the 13 pooled-col slots.
    w_ref:    (13, 256, 128) bf16 FC weight re-blocked per pooled row pi
                                  (rows 208..255 and cols 10..127 zero).
    bfc_ref:  (1, 128) f32        FC bias (cols 10..127 zero).
    o_ref:    (B, 128) f32        logits (cols 0..9 valid).
    """
    B = o_ref.shape[0]
    a_even = a_ref[0]                                      # (128, 512) bf16
    a_odd = a_ref[1]
    bconv = jnp.broadcast_to(bconv_ref[...], (B, 256))     # hoisted out of loop
    acc = jnp.zeros((B, 128), jnp.float32)
    for pi in range(13):                                   # pooled rows, unrolled
        l_pi = l_ref[pi]                                   # (B, 128) bf16
        # Conv rows 2*pi and 2*pi+1 for all 26 conv columns / 16 channels.
        z0 = jnp.dot(l_pi, a_even, preferred_element_type=jnp.float32)
        z1 = jnp.dot(l_pi, a_odd, preferred_element_type=jnp.float32)
        p = jnp.maximum(z0, z1)                            # pool over row offset
        q = jnp.maximum(p[:, :256], p[:, 256:])            # pool over col offset
        # Per-channel bias is shared across each 2x2 pool window and ReLU is
        # monotone, so bias+ReLU after the max equals PyTorch's order.  (If the
        # bias or activation ever changes, this commutation must be revisited.)
        q = jnp.maximum(q + bconv, 0.0)
        acc = acc + jnp.dot(q.astype(jnp.bfloat16), w_ref[pi],
                            preferred_element_type=jnp.float32)
    o_ref[...] = (acc + bfc_ref[...]).astype(o_ref.dtype)


def _build_conv_mats(conv_w, conv_b):
    """Toeplitz-banded conv weights: A_a[r*28+j', col(j,c)] = W[c, di, j'-j]."""
    W = conv_w[:, 0].astype(jnp.float32)                      # (16, 3, 3)
    mats = []
    for di in range(3):
        a = jnp.zeros((28, 26, 16), jnp.float32)
        for dj in range(3):
            band = jnp.eye(28, 26, k=-dj, dtype=jnp.float32)  # band[j+dj, j] = 1
            a = a + band[:, :, None] * W[:, di, dj][None, None, :]
        mats.append(a)                                        # A_di[j', j, c]
    zeros = jnp.zeros((28, 26, 16), jnp.float32)
    a_even = jnp.concatenate(mats + [zeros], axis=0)          # conv row 2*pi   (r=0..2)
    a_odd = jnp.concatenate([zeros] + mats, axis=0)           # conv row 2*pi+1 (r=1..3)

    def relayout(a):                                          # (112, 26, 16) -> (128, 512)
        a = a.reshape(112, 13, 2, 16)
        even_cols = a[:, :, 0, :].reshape(112, 208)           # conv col 2*pj
        odd_cols = a[:, :, 1, :].reshape(112, 208)            # conv col 2*pj + 1
        out = jnp.zeros((128, 512), jnp.float32)
        out = out.at[:112, 0:208].set(even_cols)
        out = out.at[:112, 256:464].set(odd_cols)
        return out

    a_stack = jnp.stack([relayout(a_even), relayout(a_odd)], 0).astype(jnp.bfloat16)
    bconv = jnp.zeros((1, 256), jnp.float32)
    bconv = bconv.at[0, :208].set(jnp.tile(conv_b.astype(jnp.float32), 13))
    return a_stack, bconv


def _build_fc_mats(fc_w, fc_b):
    """FC weight re-blocked: W_pi[pj*16 + c, o] = fc_w[o, c*169 + pi*13 + pj]."""
    w = fc_w.astype(jnp.float32).reshape(10, 16, 13, 13)      # [o, c, pi, pj]
    w = w.transpose(2, 3, 1, 0).reshape(13, 208, 10)          # [pi, pj*16+c, o]
    w_pad = jnp.zeros((13, 256, 128), jnp.float32)
    w_pad = w_pad.at[:, :208, :10].set(w)
    bfc = jnp.zeros((1, 128), jnp.float32)
    bfc = bfc.at[0, :10].set(fc_b.astype(jnp.float32))
    return w_pad.astype(jnp.bfloat16), bfc


def cnn_forward(x, conv_w, conv_b, fc_w, fc_b, *, samples_per_step=128):
    """x: (N, 1, 28, 28).  conv_w: (16,1,3,3), conv_b: (16,),
    fc_w: (10, 2704) (PyTorch layout), fc_b: (10,).  Returns (N, 10) f32."""
    N = x.shape[0]
    assert x.shape[1:] == (1, 28, 28)

    def ceil_to(v, m):
        return ((v + m - 1) // m) * m

    # Samples per grid step: multiple of 8 (sublane-aligned batch blocks); keep
    # >=2 and an even number of grid steps when the batch allows so the
    # "parallel" grid axis load-balances both v7x TensorCores.
    B = ceil_to(min(samples_per_step, max(8, ceil_to(-(-N // 2), 8))), 8)
    n_steps = -(-N // B)
    if n_steps > 1 and n_steps % 2:
        n_steps += 1
    n_pad = n_steps * B

    x2 = x.astype(jnp.float32)[:, 0]                          # (N, 28, 28)
    if n_pad != N:
        x2 = jnp.pad(x2, ((0, n_pad - N), (0, 0), (0, 0)))

    # Pooled-row-major gathered input: l[pi, n, r*28 + j'] = x[n, 2*pi + r, j'].
    # TODO(synk): this duplicates input rows ~2.3x; could be built in-kernel
    # from raw (B, 28, 28) blocks if this ever becomes the dominant HBM term.
    rows = [x2[:, r:r + 26:2, :] for r in range(4)]           # 4 x (n_pad, 13, 28)
    l = jnp.concatenate(rows, axis=-1)                        # (n_pad, 13, 112)
    l = jnp.pad(l, ((0, 0), (0, 0), (0, 16)))                 # K: 112 -> 128
    l = jnp.transpose(l.astype(jnp.bfloat16), (1, 0, 2))      # (13, n_pad, 128)

    a_stack, bconv = _build_conv_mats(conv_w, conv_b)
    w_fc, bfc = _build_fc_mats(fc_w, fc_b)

    out = pl.pallas_call(
        cnn_fused_kernel,
        out_shape=jax.ShapeDtypeStruct((n_pad, 128), jnp.float32),
        grid_spec=pltpu.PrefetchScalarGridSpec(
            num_scalar_prefetch=0,
            grid=(n_steps,),
            in_specs=[
                pl.BlockSpec((13, B, 128), lambda i: (0, i, 0)),
                pl.BlockSpec((2, 128, 512), lambda i: (0, 0, 0)),
                pl.BlockSpec((1, 256), lambda i: (0, 0)),
                pl.BlockSpec((13, 256, 128), lambda i: (0, 0, 0)),
                pl.BlockSpec((1, 128), lambda i: (0, 0)),
            ],
            out_specs=pl.BlockSpec((B, 128), lambda i: (i, 0)),
        ),
        compiler_params=pltpu.CompilerParams(
            dimension_semantics=("parallel",)),
    )(l, a_stack, bconv, w_fc, bfc)
    return out[:N, :10]


def reference_forward(x, conv_w, conv_b, fc_w, fc_b):
    """Independent pure-JAX reference mirroring the PyTorch module."""
    y = lax.conv_general_dilated(
        x, conv_w, window_strides=(1, 1), padding="VALID",
        dimension_numbers=("NCHW", "OIHW", "NCHW"))
    y = y + conv_b.reshape(1, 16, 1, 1)
    y = jnp.maximum(y, 0.0)
    y = lax.reduce_window(y, -jnp.inf, lax.max,
                          window_dimensions=(1, 1, 2, 2),
                          window_strides=(1, 1, 2, 2), padding="VALID")
    y = y.reshape(x.shape[0], 16 * 13 * 13)
    return y @ fc_w.T + fc_b


if __name__ == "__main__":
    key = jax.random.PRNGKey(0)
    k_x, k_cw, k_cb, k_fw, k_fb = jax.random.split(key, 5)

    N = 2
    x = jax.random.normal(k_x, (N, 1, 28, 28), dtype=jnp.float32)

    # Deterministic synthetic parameters (shapes from the module __init__).
    conv_w = 0.1 * jax.random.normal(k_cw, (16, 1, 3, 3), dtype=jnp.float32)
    conv_b = 0.1 * jax.random.normal(k_cb, (16,), dtype=jnp.float32)
    fc_w = 0.02 * jax.random.normal(k_fw, (10, 16 * 13 * 13), dtype=jnp.float32)
    fc_b = 0.02 * jax.random.normal(k_fb, (10,), dtype=jnp.float32)

    out = jax.block_until_ready(
        jax.jit(cnn_forward)(x, conv_w, conv_b, fc_w, fc_b))
    ref = jax.block_until_ready(reference_forward(x, conv_w, conv_b, fc_w, fc_b))

    assert out.shape == (N, 10)
    assert jnp.allclose(out, ref, atol=1e-2, rtol=1e-2), "mismatch vs reference"

    print("KERNEL_OK")
</pallas_src>

<mosaic_0001>
module attributes {stable_mosaic.version = 11 : i64} {
  func.func @cnn_fused_kernel(%arg0: i32, %arg1: memref<13x8x128xbf16, #tpu.memory_space<vmem>>, %arg2: memref<2x128x512xbf16, #tpu.memory_space<vmem>>, %arg3: memref<1x256xf32, #tpu.memory_space<vmem>>, %arg4: memref<13x256x128xbf16, #tpu.memory_space<vmem>>, %arg5: memref<1x128xf32, #tpu.memory_space<vmem>>, %arg6: memref<8x128xf32, #tpu.memory_space<vmem>>) attributes {dimension_semantics = [#tpu.dimension_semantics<parallel>], iteration_bounds = array<i64: 1>, scalar_prefetch = 0 : i64, scratch_operands = 0 : i64, tpu.core_type = #tpu.core_type<tc>, window_params = [{transform_indices = @transform_0, window_bounds = array<i64: 13, 8, 128>}, {pipeline_mode = #tpu.pipeline_mode<synchronous>, transform_indices = @transform_1, window_bounds = array<i64: 2, 128, 512>}, {pipeline_mode = #tpu.pipeline_mode<synchronous>, transform_indices = @transform_2, window_bounds = array<i64: 1, 256>}, {pipeline_mode = #tpu.pipeline_mode<synchronous>, transform_indices = @transform_3, window_bounds = array<i64: 13, 256, 128>}, {pipeline_mode = #tpu.pipeline_mode<synchronous>, transform_indices = @transform_4, window_bounds = array<i64: 1, 128>}, {transform_indices = @transform_5, window_bounds = array<i64: 8, 128>}]} {
    %c0 = arith.constant 0 : index
    %c0_0 = arith.constant 0 : index
    %c0_1 = arith.constant 0 : index
    %0 = vector.load %arg2[%c0, %c0_0, %c0_1] : memref<2x128x512xbf16, #tpu.memory_space<vmem>>, vector<1x128x512xbf16>
    %1 = vector.shape_cast %0 : vector<1x128x512xbf16> to vector<128x512xbf16>
    %c1 = arith.constant 1 : index
    %c0_2 = arith.constant 0 : index
    %c0_3 = arith.constant 0 : index
    %2 = vector.load %arg2[%c1, %c0_2, %c0_3] : memref<2x128x512xbf16, #tpu.memory_space<vmem>>, vector<1x128x512xbf16>
    %3 = vector.shape_cast %2 : vector<1x128x512xbf16> to vector<128x512xbf16>
    %c0_4 = arith.constant 0 : index
    %c0_5 = arith.constant 0 : index
    %4 = vector.load %arg3[%c0_4, %c0_5] : memref<1x256xf32, #tpu.memory_space<vmem>>, vector<1x256xf32>
    %5 = vector.shape_cast %4 : vector<1x256xf32> to vector<1x256xf32>
    %6 = vector.broadcast %5 : vector<1x256xf32> to vector<8x256xf32>
    %cst = arith.constant 0.000000e+00 : f32
    %7 = vector.broadcast %cst : f32 to vector<8x128xf32>
    %c0_6 = arith.constant 0 : index
    %c0_7 = arith.constant 0 : index
    %c0_8 = arith.constant 0 : index
    %8 = vector.load %arg1[%c0_6, %c0_7, %c0_8] : memref<13x8x128xbf16, #tpu.memory_space<vmem>>, vector<1x8x128xbf16>
    %9 = vector.shape_cast %8 : vector<1x8x128xbf16> to vector<8x128xbf16>
    %cst_9 = arith.constant dense<0.000000e+00> : vector<8x512xf32>
    %10 = tpu.matmul %9, %1, %cst_9 {dimension_numbers = #tpu.dot_dimension_numbers<[1], [0], [0], [1], [0, 0, 1, 1], [], []>} : vector<8x128xbf16>, vector<128x512xbf16>, vector<8x512xf32> -> vector<8x512xf32>
    %cst_10 = arith.constant dense<0.000000e+00> : vector<8x512xf32>
    %11 = tpu.matmul %9, %3, %cst_10 {dimension_numbers = #tpu.dot_dimension_numbers<[1], [0], [0], [1], [0, 0, 1, 1], [], []>} : vector<8x128xbf16>, vector<128x512xbf16>, vector<8x512xf32> -> vector<8x512xf32>
    %12 = arith.maximumf %10, %11 : vector<8x512xf32>
    %13 = vector.extract_strided_slice %12 {offsets = [0, 0], sizes = [8, 256], strides = [1, 1]} : vector<8x512xf32> to vector<8x256xf32>
    %14 = vector.extract_strided_slice %12 {offsets = [0, 256], sizes = [8, 256], strides = [1, 1]} : vector<8x512xf32> to vector<8x256xf32>
    %15 = arith.maximumf %13, %14 : vector<8x256xf32>
    %16 = arith.addf %15, %6 : vector<8x256xf32>
    %cst_11 = arith.constant 0.000000e+00 : f32
    %17 = vector.broadcast %cst_11 : f32 to vector<8x256xf32>
    %18 = arith.maximumf %16, %17 : vector<8x256xf32>
    %19 = arith.truncf %18 : vector<8x256xf32> to vector<8x256xbf16>
    %c0_12 = arith.constant 0 : index
    %c0_13 = arith.constant 0 : index
    %c0_14 = arith.constant 0 : index
    %20 = vector.load %arg4[%c0_12, %c0_13, %c0_14] : memref<13x256x128xbf16, #tpu.memory_space<vmem>>, vector<1x256x128xbf16>
    %21 = vector.shape_cast %20 : vector<1x256x128xbf16> to vector<256x128xbf16>
    %cst_15 = arith.constant dense<0.000000e+00> : vector<8x128xf32>
    %22 = tpu.matmul %19, %21, %cst_15 {dimension_numbers = #tpu.dot_dimension_numbers<[1], [0], [0], [1], [0, 0, 1, 1], [], []>} : vector<8x256xbf16>, vector<256x128xbf16>, vector<8x128xf32> -> vector<8x128xf32>
    %23 = arith.addf %7, %22 : vector<8x128xf32>
    %c1_16 = arith.constant 1 : index
    %c0_17 = arith.constant 0 : index
    %c0_18 = arith.constant 0 : index
    %24 = vector.load %arg1[%c1_16, %c0_17, %c0_18] : memref<13x8x128xbf16, #tpu.memory_space<vmem>>, vector<1x8x128xbf16>
    %25 = vector.shape_cast %24 : vector<1x8x128xbf16> to vector<8x128xbf16>
    %cst_19 = arith.constant dense<0.000000e+00> : vector<8x512xf32>
    %26 = tpu.matmul %25, %1, %cst_19 {dimension_numbers = #tpu.dot_dimension_numbers<[1], [0], [0], [1], [0, 0, 1, 1], [], []>} : vector<8x128xbf16>, vector<128x512xbf16>, vector<8x512xf32> -> vector<8x512xf32>
    %cst_20 = arith.constant dense<0.000000e+00> : vector<8x512xf32>
    %27 = tpu.matmul %25, %3, %cst_20 {dimension_numbers = #tpu.dot_dimension_numbers<[1], [0], [0], [1], [0, 0, 1, 1], [], []>} : vector<8x128xbf16>, vector<128x512xbf16>, vector<8x512xf32> -> vector<8x512xf32>
    %28 = arith.maximumf %26, %27 : vector<8x512xf32>
    %29 = vector.extract_strided_slice %28 {offsets = [0, 0], sizes = [8, 256], strides = [1, 1]} : vector<8x512xf32> to vector<8x256xf32>
    %30 = vector.extract_strided_slice %28 {offsets = [0, 256], sizes = [8, 256], strides = [1, 1]} : vector<8x512xf32> to vector<8x256xf32>
    %31 = arith.maximumf %29, %30 : vector<8x256xf32>
    %32 = arith.addf %31, %6 : vector<8x256xf32>
    %cst_21 = arith.constant 0.000000e+00 : f32
    %33 = vector.broadcast %cst_21 : f32 to vector<8x256xf32>
    %34 = arith.maximumf %32, %33 : vector<8x256xf32>
    %35 = arith.truncf %34 : vector<8x256xf32> to vector<8x256xbf16>
    %c1_22 = arith.constant 1 : index
    %c0_23 = arith.constant 0 : index
    %c0_24 = arith.constant 0 : index
    %36 = vector.load %arg4[%c1_22, %c0_23, %c0_24] : memref<13x256x128xbf16, #tpu.memory_space<vmem>>, vector<1x256x128xbf16>
    %37 = vector.shape_cast %36 : vector<1x256x128xbf16> to vector<256x128xbf16>
    %cst_25 = arith.constant dense<0.000000e+00> : vector<8x128xf32>
    %38 = tpu.matmul %35, %37, %cst_25 {dimension_numbers = #tpu.dot_dimension_numbers<[1], [0], [0], [1], [0, 0, 1, 1], [], []>} : vector<8x256xbf16>, vector<256x128xbf16>, vector<8x128xf32> -> vector<8x128xf32>
    %39 = arith.addf %23, %38 : vector<8x128xf32>
    %c2 = arith.constant 2 : index
    %c0_26 = arith.constant 0 : index
    %c0_27 = arith.constant 0 : index
    %40 = vector.load %arg1[%c2, %c0_26, %c0_27] : memref<13x8x128xbf16, #tpu.memory_space<vmem>>, vector<1x8x128xbf16>
    %41 = vector.shape_cast %40 : vector<1x8x128xbf16> to vector<8x128xbf16>
    %cst_28 = arith.constant dense<0.000000e+00> : vector<8x512xf32>
    %42 = tpu.matmul %41, %1, %cst_28 {dimension_numbers = #tpu.dot_dimension_numbers<[1], [0], [0], [1], [0, 0, 1, 1], [], []>} : vector<8x128xbf16>, vector<128x512xbf16>, vector<8x512xf32> -> vector<8x512xf32>
    %cst_29 = arith.constant dense<0.000000e+00> : vector<8x512xf32>
    %43 = tpu.matmul %41, %3, %cst_29 {dimension_numbers = #tpu.dot_dimension_numbers<[1], [0], [0], [1], [0, 0, 1, 1], [], []>} : vector<8x128xbf16>, vector<128x512xbf16>, vector<8x512xf32> -> vector<8x512xf32>
    %44 = arith.maximumf %42, %43 : vector<8x512xf32>
    %45 = vector.extract_strided_slice %44 {offsets = [0, 0], sizes = [8, 256], strides = [1, 1]} : vector<8x512xf32> to vector<8x256xf32>
    %46 = vector.extract_strided_slice %44 {offsets = [0, 256], sizes = [8, 256], strides = [1, 1]} : vector<8x512xf32> to vector<8x256xf32>
    %47 = arith.maximumf %45, %46 : vector<8x256xf32>
    %48 = arith.addf %47, %6 : vector<8x256xf32>
    %cst_30 = arith.constant 0.000000e+00 : f32
    %49 = vector.broadcast %cst_30 : f32 to vector<8x256xf32>
    %50 = arith.maximumf %48, %49 : vector<8x256xf32>
    %51 = arith.truncf %50 : vector<8x256xf32> to vector<8x256xbf16>
    %c2_31 = arith.constant 2 : index
    %c0_32 = arith.constant 0 : index
    %c0_33 = arith.constant 0 : index
    %52 = vector.load %arg4[%c2_31, %c0_32, %c0_33] : memref<13x256x128xbf16, #tpu.memory_space<vmem>>, vector<1x256x128xbf16>
    %53 = vector.shape_cast %52 : vector<1x256x128xbf16> to vector<256x128xbf16>
    %cst_34 = arith.constant dense<0.000000e+00> : vector<8x128xf32>
    %54 = tpu.matmul %51, %53, %cst_34 {dimension_numbers = #tpu.dot_dimension_numbers<[1], [0], [0], [1], [0, 0, 1, 1], [], []>} : vector<8x256xbf16>, vector<256x128xbf16>, vector<8x128xf32> -> vector<8x128xf32>
    %55 = arith.addf %39, %54 : vector<8x128xf32>
    %c3 = arith.constant 3 : index
    %c0_35 = arith.constant 0 : index
    %c0_36 = arith.constant 0 : index
    %56 = vector.load %arg1[%c3, %c0_35, %c0_36] : memref<13x8x128xbf16, #tpu.memory_space<vmem>>, vector<1x8x128xbf16>
    %57 = vector.shape_cast %56 : vector<1x8x128xbf16> to vector<8x128xbf16>
    %cst_37 = arith.constant dense<0.000000e+00> : vector<8x512xf32>
    %58 = tpu.matmul %57, %1, %cst_37 {dimension_numbers = #tpu.dot_dimension_numbers<[1], [0], [0], [1], [0, 0, 1, 1], [], []>} : vector<8x128xbf16>, vector<128x512xbf16>, vector<8x512xf32> -> vector<8x512xf32>
    %cst_38 = arith.constant dense<0.000000e+00> : vector<8x512xf32>
    %59 = tpu.matmul %57, %3, %cst_38 {dimension_numbers = #tpu.dot_dimension_numbers<[1], [0], [0], [1], [0, 0, 1, 1], [], []>} : vector<8x128xbf16>, vector<128x512xbf16>, vector<8x512xf32> -> vector<8x512xf32>
    %60 = arith.maximumf %58, %59 : vector<8x512xf32>
    %61 = vector.extract_strided_slice %60 {offsets = [0, 0], sizes = [8, 256], strides = [1, 1]} : vector<8x512xf32> to vector<8x256xf32>
    %62 = vector.extract_strided_slice %60 {offsets = [0, 256], sizes = [8, 256], strides = [1, 1]} : vector<8x512xf32> to vector<8x256xf32>
    %63 = arith.maximumf %61, %62 : vector<8x256xf32>
    %64 = arith.addf %63, %6 : vector<8x256xf32>
    %cst_39 = arith.constant 0.000000e+00 : f32
    %65 = vector.broadcast %cst_39 : f32 to vector<8x256xf32>
    %66 = arith.maximumf %64, %65 : vector<8x256xf32>
    %67 = arith.truncf %66 : vector<8x256xf32> to vector<8x256xbf16>
    %c3_40 = arith.constant 3 : index
    %c0_41 = arith.constant 0 : index
    %c0_42 = arith.constant 0 : index
    %68 = vector.load %arg4[%c3_40, %c0_41, %c0_42] : memref<13x256x128xbf16, #tpu.memory_space<vmem>>, vector<1x256x128xbf16>
    %69 = vector.shape_cast %68 : vector<1x256x128xbf16> to vector<256x128xbf16>
    %cst_43 = arith.constant dense<0.000000e+00> : vector<8x128xf32>
    %70 = tpu.matmul %67, %69, %cst_43 {dimension_numbers = #tpu.dot_dimension_numbers<[1], [0], [0], [1], [0, 0, 1, 1], [], []>} : vector<8x256xbf16>, vector<256x128xbf16>, vector<8x128xf32> -> vector<8x128xf32>
    %71 = arith.addf %55, %70 : vector<8x128xf32>
    %c4 = arith.constant 4 : index
    %c0_44 = arith.constant 0 : index
    %c0_45 = arith.constant 0 : index
    %72 = vector.load %arg1[%c4, %c0_44, %c0_45] : memref<13x8x128xbf16, #tpu.memory_space<vmem>>, vector<1x8x128xbf16>
    %73 = vector.shape_cast %72 : vector<1x8x128xbf16> to vector<8x128xbf16>
    %cst_46 = arith.constant dense<0.000000e+00> : vector<8x512xf32>
    %74 = tpu.matmul %73, %1, %cst_46 {dimension_numbers = #tpu.dot_dimension_numbers<[1], [0], [0], [1], [0, 0, 1, 1], [], []>} : vector<8x128xbf16>, vector<128x512xbf16>, vector<8x512xf32> -> vector<8x512xf32>
    %cst_47 = arith.constant dense<0.000000e+00> : vector<8x512xf32>
    %75 = tpu.matmul %73, %3, %cst_47 {dimension_numbers = #tpu.dot_dimension_numbers<[1], [0], [0], [1], [0, 0, 1, 1], [], []>} : vector<8x128xbf16>, vector<128x512xbf16>, vector<8x512xf32> -> vector<8x512xf32>
    %76 = arith.maximumf %74, %75 : vector<8x512xf32>
    %77 = vector.extract_strided_slice %76 {offsets = [0, 0], sizes = [8, 256], strides = [1, 1]} : vector<8x512xf32> to vector<8x256xf32>
    %78 = vector.extract_strided_slice %76 {offsets = [0, 256], sizes = [8, 256], strides = [1, 1]} : vector<8x512xf32> to vector<8x256xf32>
    %79 = arith.maximumf %77, %78 : vector<8x256xf32>
    %80 = arith.addf %79, %6 : vector<8x256xf32>
    %cst_48 = arith.constant 0.000000e+00 : f32
    %81 = vector.broadcast %cst_48 : f32 to vector<8x256xf32>
    %82 = arith.maximumf %80, %81 : vector<8x256xf32>
    %83 = arith.truncf %82 : vector<8x256xf32> to vector<8x256xbf16>
    %c4_49 = arith.constant 4 : index
    %c0_50 = arith.constant 0 : index
    %c0_51 = arith.constant 0 : index
    %84 = vector.load %arg4[%c4_49, %c0_50, %c0_51] : memref<13x256x128xbf16, #tpu.memory_space<vmem>>, vector<1x256x128xbf16>
    %85 = vector.shape_cast %84 : vector<1x256x128xbf16> to vector<256x128xbf16>
    %cst_52 = arith.constant dense<0.000000e+00> : vector<8x128xf32>
    %86 = tpu.matmul %83, %85, %cst_52 {dimension_numbers = #tpu.dot_dimension_numbers<[1], [0], [0], [1], [0, 0, 1, 1], [], []>} : vector<8x256xbf16>, vector<256x128xbf16>, vector<8x128xf32> -> vector<8x128xf32>
    %87 = arith.addf %71, %86 : vector<8x128xf32>
    %c5 = arith.constant 5 : index
    %c0_53 = arith.constant 0 : index
    %c0_54 = arith.constant 0 : index
    %88 = vector.load %arg1[%c5, %c0_53, %c0_54] : memref<13x8x128xbf16, #tpu.memory_space<vmem>>, vector<1x8x128xbf16>
    %89 = vector.shape_cast %88 : vector<1x8x128xbf16> to vector<8x128xbf16>
    %cst_55 = arith.constant dense<0.000000e+00> : vector<8x512xf32>
    %90 = tpu.matmul %89, %1, %cst_55 {dimension_numbers = #tpu.dot_dimension_numbers<[1], [0], [0], [1], [0, 0, 1, 1], [], []>} : vector<8x128xbf16>, vector<128x512xbf16>, vector<8x512xf32> -> vector<8x512xf32>
    %cst_56 = arith.constant dense<0.000000e+00> : vector<8x512xf32>
    %91 = tpu.matmul %89, %3, %cst_56 {dimension_numbers = #tpu.dot_dimension_numbers<[1], [0], [0], [1], [0, 0, 1, 1], [], []>} : vector<8x128xbf16>, vector<128x512xbf16>, vector<8x512xf32> -> vector<8x512xf32>
    %92 = arith.maximumf %90, %91 : vector<8x512xf32>
    %93 = vector.extract_strided_slice %92 {offsets = [0, 0], sizes = [8, 256], strides = [1, 1]} : vector<8x512xf32> to vector<8x256xf32>
    %94 = vector.extract_strided_slice %92 {offsets = [0, 256], sizes = [8, 256], strides = [1, 1]} : vector<8x512xf32> to vector<8x256xf32>
    %95 = arith.maximumf %93, %94 : vector<8x256xf32>
    %96 = arith.addf %95, %6 : vector<8x256xf32>
    %cst_57 = arith.constant 0.000000e+00 : f32
    %97 = vector.broadcast %cst_57 : f32 to vector<8x256xf32>
    %98 = arith.maximumf %96, %97 : vector<8x256xf32>
    %99 = arith.truncf %98 : vector<8x256xf32> to vector<8x256xbf16>
    %c5_58 = arith.constant 5 : index
    %c0_59 = arith.constant 0 : index
    %c0_60 = arith.constant 0 : index
    %100 = vector.load %arg4[%c5_58, %c0_59, %c0_60] : memref<13x256x128xbf16, #tpu.memory_space<vmem>>, vector<1x256x128xbf16>
    %101 = vector.shape_cast %100 : vector<1x256x128xbf16> to vector<256x128xbf16>
    %cst_61 = arith.constant dense<0.000000e+00> : vector<8x128xf32>
    %102 = tpu.matmul %99, %101, %cst_61 {dimension_numbers = #tpu.dot_dimension_numbers<[1], [0], [0], [1], [0, 0, 1, 1], [], []>} : vector<8x256xbf16>, vector<256x128xbf16>, vector<8x128xf32> -> vector<8x128xf32>
    %103 = arith.addf %87, %102 : vector<8x128xf32>
    %c6 = arith.constant 6 : index
    %c0_62 = arith.constant 0 : index
    %c0_63 = arith.constant 0 : index
    %104 = vector.load %arg1[%c6, %c0_62, %c0_63] : memref<13x8x128xbf16, #tpu.memory_space<vmem>>, vector<1x8x128xbf16>
    %105 = vector.shape_cast %104 : vector<1x8x128xbf16> to vector<8x128xbf16>
    %cst_64 = arith.constant dense<0.000000e+00> : vector<8x512xf32>
    %106 = tpu.matmul %105, %1, %cst_64 {dimension_numbers = #tpu.dot_dimension_numbers<[1], [0], [0], [1], [0, 0, 1, 1], [], []>} : vector<8x128xbf16>, vector<128x512xbf16>, vector<8x512xf32> -> vector<8x512xf32>
    %cst_65 = arith.constant dense<0.000000e+00> : vector<8x512xf32>
    %107 = tpu.matmul %105, %3, %cst_65 {dimension_numbers = #tpu.dot_dimension_numbers<[1], [0], [0], [1], [0, 0, 1, 1], [], []>} : vector<8x128xbf16>, vector<128x512xbf16>, vector<8x512xf32> -> vector<8x512xf32>
    %108 = arith.maximumf %106, %107 : vector<8x512xf32>
    %109 = vector.extract_strided_slice %108 {offsets = [0, 0], sizes = [8, 256], strides = [1, 1]} : vector<8x512xf32> to vector<8x256xf32>
    %110 = vector.extract_strided_slice %108 {offsets = [0, 256], sizes = [8, 256], strides = [1, 1]} : vector<8x512xf32> to vector<8x256xf32>
    %111 = arith.maximumf %109, %110 : vector<8x256xf32>
    %112 = arith.addf %111, %6 : vector<8x256xf32>
    %cst_66 = arith.constant 0.000000e+00 : f32
    %113 = vector.broadcast %cst_66 : f32 to vector<8x256xf32>
    %114 = arith.maximumf %112, %113 : vector<8x256xf32>
    %115 = arith.truncf %114 : vector<8x256xf32> to vector<8x256xbf16>
    %c6_67 = arith.constant 6 : index
    %c0_68 = arith.constant 0 : index
    %c0_69 = arith.constant 0 : index
    %116 = vector.load %arg4[%c6_67, %c0_68, %c0_69] : memref<13x256x128xbf16, #tpu.memory_space<vmem>>, vector<1x256x128xbf16>
    %117 = vector.shape_cast %116 : vector<1x256x128xbf16> to vector<256x128xbf16>
    %cst_70 = arith.constant dense<0.000000e+00> : vector<8x128xf32>
    %118 = tpu.matmul %115, %117, %cst_70 {dimension_numbers = #tpu.dot_dimension_numbers<[1], [0], [0], [1], [0, 0, 1, 1], [], []>} : vector<8x256xbf16>, vector<256x128xbf16>, vector<8x128xf32> -> vector<8x128xf32>
    %119 = arith.addf %103, %118 : vector<8x128xf32>
    %c7 = arith.constant 7 : index
    %c0_71 = arith.constant 0 : index
    %c0_72 = arith.constant 0 : index
    %120 = vector.load %arg1[%c7, %c0_71, %c0_72] : memref<13x8x128xbf16, #tpu.memory_space<vmem>>, vector<1x8x128xbf16>
    %121 = vector.shape_cast %120 : vector<1x8x128xbf16> to vector<8x128xbf16>
    %cst_73 = arith.constant dense<0.000000e+00> : vector<8x512xf32>
    %122 = tpu.matmul %121, %1, %cst_73 {dimension_numbers = #tpu.dot_dimension_numbers<[1], [0], [0], [1], [0, 0, 1, 1], [], []>} : vector<8x128xbf16>, vector<128x512xbf16>, vector<8x512xf32> -> vector<8x512xf32>
    %cst_74 = arith.constant dense<0.000000e+00> : vector<8x512xf32>
    %123 = tpu.matmul %121, %3, %cst_74 {dimension_numbers = #tpu.dot_dimension_numbers<[1], [0], [0], [1], [0, 0, 1, 1], [], []>} : vector<8x128xbf16>, vector<128x512xbf16>, vector<8x512xf32> -> vector<8x512xf32>
    %124 = arith.maximumf %122, %123 : vector<8x512xf32>
    %125 = vector.extract_strided_slice %124 {offsets = [0, 0], sizes = [8, 256], strides = [1, 1]} : vector<8x512xf32> to vector<8x256xf32>
    %126 = vector.extract_strided_slice %124 {offsets = [0, 256], sizes = [8, 256], strides = [1, 1]} : vector<8x512xf32> to vector<8x256xf32>
    %127 = arith.maximumf %125, %126 : vector<8x256xf32>
    %128 = arith.addf %127, %6 : vector<8x256xf32>
    %cst_75 = arith.constant 0.000000e+00 : f32
    %129 = vector.broadcast %cst_75 : f32 to vector<8x256xf32>
    %130 = arith.maximumf %128, %129 : vector<8x256xf32>
    %131 = arith.truncf %130 : vector<8x256xf32> to vector<8x256xbf16>
    %c7_76 = arith.constant 7 : index
    %c0_77 = arith.constant 0 : index
    %c0_78 = arith.constant 0 : index
    %132 = vector.load %arg4[%c7_76, %c0_77, %c0_78] : memref<13x256x128xbf16, #tpu.memory_space<vmem>>, vector<1x256x128xbf16>
    %133 = vector.shape_cast %132 : vector<1x256x128xbf16> to vector<256x128xbf16>
    %cst_79 = arith.constant dense<0.000000e+00> : vector<8x128xf32>
    %134 = tpu.matmul %131, %133, %cst_79 {dimension_numbers = #tpu.dot_dimension_numbers<[1], [0], [0], [1], [0, 0, 1, 1], [], []>} : vector<8x256xbf16>, vector<256x128xbf16>, vector<8x128xf32> -> vector<8x128xf32>
    %135 = arith.addf %119, %134 : vector<8x128xf32>
    %c8 = arith.constant 8 : index
    %c0_80 = arith.constant 0 : index
    %c0_81 = arith.constant 0 : index
    %136 = vector.load %arg1[%c8, %c0_80, %c0_81] : memref<13x8x128xbf16, #tpu.memory_space<vmem>>, vector<1x8x128xbf16>
    %137 = vector.shape_cast %136 : vector<1x8x128xbf16> to vector<8x128xbf16>
    %cst_82 = arith.constant dense<0.000000e+00> : vector<8x512xf32>
    %138 = tpu.matmul %137, %1, %cst_82 {dimension_numbers = #tpu.dot_dimension_numbers<[1], [0], [0], [1], [0, 0, 1, 1], [], []>} : vector<8x128xbf16>, vector<128x512xbf16>, vector<8x512xf32> -> vector<8x512xf32>
    %cst_83 = arith.constant dense<0.000000e+00> : vector<8x512xf32>
    %139 = tpu.matmul %137, %3, %cst_83 {dimension_numbers = #tpu.dot_dimension_numbers<[1], [0], [0], [1], [0, 0, 1, 1], [], []>} : vector<8x128xbf16>, vector<128x512xbf16>, vector<8x512xf32> -> vector<8x512xf32>
    %140 = arith.maximumf %138, %139 : vector<8x512xf32>
    %141 = vector.extract_strided_slice %140 {offsets = [0, 0], sizes = [8, 256], strides = [1, 1]} : vector<8x512xf32> to vector<8x256xf32>
    %142 = vector.extract_strided_slice %140 {offsets = [0, 256], sizes = [8, 256], strides = [1, 1]} : vector<8x512xf32> to vector<8x256xf32>
    %143 = arith.maximumf %141, %142 : vector<8x256xf32>
    %144 = arith.addf %143, %6 : vector<8x256xf32>
    %cst_84 = arith.constant 0.000000e+00 : f32
    %145 = vector.broadcast %cst_84 : f32 to vector<8x256xf32>
    %146 = arith.maximumf %144, %145 : vector<8x256xf32>
    %147 = arith.truncf %146 : vector<8x256xf32> to vector<8x256xbf16>
    %c8_85 = arith.constant 8 : index
    %c0_86 = arith.constant 0 : index
    %c0_87 = arith.constant 0 : index
    %148 = vector.load %arg4[%c8_85, %c0_86, %c0_87] : memref<13x256x128xbf16, #tpu.memory_space<vmem>>, vector<1x256x128xbf16>
    %149 = vector.shape_cast %148 : vector<1x256x128xbf16> to vector<256x128xbf16>
    %cst_88 = arith.constant dense<0.000000e+00> : vector<8x128xf32>
    %150 = tpu.matmul %147, %149, %cst_88 {dimension_numbers = #tpu.dot_dimension_numbers<[1], [0], [0], [1], [0, 0, 1, 1], [], []>} : vector<8x256xbf16>, vector<256x128xbf16>, vector<8x128xf32> -> vector<8x128xf32>
    %151 = arith.addf %135, %150 : vector<8x128xf32>
    %c9 = arith.constant 9 : index
    %c0_89 = arith.constant 0 : index
    %c0_90 = arith.constant 0 : index
    %152 = vector.load %arg1[%c9, %c0_89, %c0_90] : memref<13x8x128xbf16, #tpu.memory_space<vmem>>, vector<1x8x128xbf16>
    %153 = vector.shape_cast %152 : vector<1x8x128xbf16> to vector<8x128xbf16>
    %cst_91 = arith.constant dense<0.000000e+00> : vector<8x512xf32>
    %154 = tpu.matmul %153, %1, %cst_91 {dimension_numbers = #tpu.dot_dimension_numbers<[1], [0], [0], [1], [0, 0, 1, 1], [], []>} : vector<8x128xbf16>, vector<128x512xbf16>, vector<8x512xf32> -> vector<8x512xf32>
    %cst_92 = arith.constant dense<0.000000e+00> : vector<8x512xf32>
    %155 = tpu.matmul %153, %3, %cst_92 {dimension_numbers = #tpu.dot_dimension_numbers<[1], [0], [0], [1], [0, 0, 1, 1], [], []>} : vector<8x128xbf16>, vector<128x512xbf16>, vector<8x512xf32> -> vector<8x512xf32>
    %156 = arith.maximumf %154, %155 : vector<8x512xf32>
    %157 = vector.extract_strided_slice %156 {offsets = [0, 0], sizes = [8, 256], strides = [1, 1]} : vector<8x512xf32> to vector<8x256xf32>
    %158 = vector.extract_strided_slice %156 {offsets = [0, 256], sizes = [8, 256], strides = [1, 1]} : vector<8x512xf32> to vector<8x256xf32>
    %159 = arith.maximumf %157, %158 : vector<8x256xf32>
    %160 = arith.addf %159, %6 : vector<8x256xf32>
    %cst_93 = arith.constant 0.000000e+00 : f32
    %161 = vector.broadcast %cst_93 : f32 to vector<8x256xf32>
    %162 = arith.maximumf %160, %161 : vector<8x256xf32>
    %163 = arith.truncf %162 : vector<8x256xf32> to vector<8x256xbf16>
    %c9_94 = arith.constant 9 : index
    %c0_95 = arith.constant 0 : index
    %c0_96 = arith.constant 0 : index
    %164 = vector.load %arg4[%c9_94, %c0_95, %c0_96] : memref<13x256x128xbf16, #tpu.memory_space<vmem>>, vector<1x256x128xbf16>
    %165 = vector.shape_cast %164 : vector<1x256x128xbf16> to vector<256x128xbf16>
    %cst_97 = arith.constant dense<0.000000e+00> : vector<8x128xf32>
    %166 = tpu.matmul %163, %165, %cst_97 {dimension_numbers = #tpu.dot_dimension_numbers<[1], [0], [0], [1], [0, 0, 1, 1], [], []>} : vector<8x256xbf16>, vector<256x128xbf16>, vector<8x128xf32> -> vector<8x128xf32>
    %167 = arith.addf %151, %166 : vector<8x128xf32>
    %c10 = arith.constant 10 : index
    %c0_98 = arith.constant 0 : index
    %c0_99 = arith.constant 0 : index
    %168 = vector.load %arg1[%c10, %c0_98, %c0_99] : memref<13x8x128xbf16, #tpu.memory_space<vmem>>, vector<1x8x128xbf16>
    %169 = vector.shape_cast %168 : vector<1x8x128xbf16> to vector<8x128xbf16>
    %cst_100 = arith.constant dense<0.000000e+00> : vector<8x512xf32>
    %170 = tpu.matmul %169, %1, %cst_100 {dimension_numbers = #tpu.dot_dimension_numbers<[1], [0], [0], [1], [0, 0, 1, 1], [], []>} : vector<8x128xbf16>, vector<128x512xbf16>, vector<8x512xf32> -> vector<8x512xf32>
    %cst_101 = arith.constant dense<0.000000e+00> : vector<8x512xf32>
    %171 = tpu.matmul %169, %3, %cst_101 {dimension_numbers = #tpu.dot_dimension_numbers<[1], [0], [0], [1], [0, 0, 1, 1], [], []>} : vector<8x128xbf16>, vector<128x512xbf16>, vector<8x512xf32> -> vector<8x512xf32>
    %172 = arith.maximumf %170, %171 : vector<8x512xf32>
    %173 = vector.extract_strided_slice %172 {offsets = [0, 0], sizes = [8, 256], strides = [1, 1]} : vector<8x512xf32> to vector<8x256xf32>
    %174 = vector.extract_strided_slice %172 {offsets = [0, 256], sizes = [8, 256], strides = [1, 1]} : vector<8x512xf32> to vector<8x256xf32>
    %175 = arith.maximumf %173, %174 : vector<8x256xf32>
    %176 = arith.addf %175, %6 : vector<8x256xf32>
    %cst_102 = arith.constant 0.000000e+00 : f32
    %177 = vector.broadcast %cst_102 : f32 to vector<8x256xf32>
    %178 = arith.maximumf %176, %177 : vector<8x256xf32>
    %179 = arith.truncf %178 : vector<8x256xf32> to vector<8x256xbf16>
    %c10_103 = arith.constant 10 : index
    %c0_104 = arith.constant 0 : index
    %c0_105 = arith.constant 0 : index
    %180 = vector.load %arg4[%c10_103, %c0_104, %c0_105] : memref<13x256x128xbf16, #tpu.memory_space<vmem>>, vector<1x256x128xbf16>
    %181 = vector.shape_cast %180 : vector<1x256x128xbf16> to vector<256x128xbf16>
    %cst_106 = arith.constant dense<0.000000e+00> : vector<8x128xf32>
    %182 = tpu.matmul %179, %181, %cst_106 {dimension_numbers = #tpu.dot_dimension_numbers<[1], [0], [0], [1], [0, 0, 1, 1], [], []>} : vector<8x256xbf16>, vector<256x128xbf16>, vector<8x128xf32> -> vector<8x128xf32>
    %183 = arith.addf %167, %182 : vector<8x128xf32>
    %c11 = arith.constant 11 : index
    %c0_107 = arith.constant 0 : index
    %c0_108 = arith.constant 0 : index
    %184 = vector.load %arg1[%c11, %c0_107, %c0_108] : memref<13x8x128xbf16, #tpu.memory_space<vmem>>, vector<1x8x128xbf16>
    %185 = vector.shape_cast %184 : vector<1x8x128xbf16> to vector<8x128xbf16>
    %cst_109 = arith.constant dense<0.000000e+00> : vector<8x512xf32>
    %186 = tpu.matmul %185, %1, %cst_109 {dimension_numbers = #tpu.dot_dimension_numbers<[1], [0], [0], [1], [0, 0, 1, 1], [], []>} : vector<8x128xbf16>, vector<128x512xbf16>, vector<8x512xf32> -> vector<8x512xf32>
    %cst_110 = arith.constant dense<0.000000e+00> : vector<8x512xf32>
    %187 = tpu.matmul %185, %3, %cst_110 {dimension_numbers = #tpu.dot_dimension_numbers<[1], [0], [0], [1], [0, 0, 1, 1], [], []>} : vector<8x128xbf16>, vector<128x512xbf16>, vector<8x512xf32> -> vector<8x512xf32>
    %188 = arith.maximumf %186, %187 : vector<8x512xf32>
    %189 = vector.extract_strided_slice %188 {offsets = [0, 0], sizes = [8, 256], strides = [1, 1]} : vector<8x512xf32> to vector<8x256xf32>
    %190 = vector.extract_strided_slice %188 {offsets = [0, 256], sizes = [8, 256], strides = [1, 1]} : vector<8x512xf32> to vector<8x256xf32>
    %191 = arith.maximumf %189, %190 : vector<8x256xf32>
    %192 = arith.addf %191, %6 : vector<8x256xf32>
    %cst_111 = arith.constant 0.000000e+00 : f32
    %193 = vector.broadcast %cst_111 : f32 to vector<8x256xf32>
    %194 = arith.maximumf %192, %193 : vector<8x256xf32>
    %195 = arith.truncf %194 : vector<8x256xf32> to vector<8x256xbf16>
    %c11_112 = arith.constant 11 : index
    %c0_113 = arith.constant 0 : index
    %c0_114 = arith.constant 0 : index
    %196 = vector.load %arg4[%c11_112, %c0_113, %c0_114] : memref<13x256x128xbf16, #tpu.memory_space<vmem>>, vector<1x256x128xbf16>
    %197 = vector.shape_cast %196 : vector<1x256x128xbf16> to vector<256x128xbf16>
    %cst_115 = arith.constant dense<0.000000e+00> : vector<8x128xf32>
    %198 = tpu.matmul %195, %197, %cst_115 {dimension_numbers = #tpu.dot_dimension_numbers<[1], [0], [0], [1], [0, 0, 1, 1], [], []>} : vector<8x256xbf16>, vector<256x128xbf16>, vector<8x128xf32> -> vector<8x128xf32>
    %199 = arith.addf %183, %198 : vector<8x128xf32>
    %c12 = arith.constant 12 : index
    %c0_116 = arith.constant 0 : index
    %c0_117 = arith.constant 0 : index
    %200 = vector.load %arg1[%c12, %c0_116, %c0_117] : memref<13x8x128xbf16, #tpu.memory_space<vmem>>, vector<1x8x128xbf16>
    %201 = vector.shape_cast %200 : vector<1x8x128xbf16> to vector<8x128xbf16>
    %cst_118 = arith.constant dense<0.000000e+00> : vector<8x512xf32>
    %202 = tpu.matmul %201, %1, %cst_118 {dimension_numbers = #tpu.dot_dimension_numbers<[1], [0], [0], [1], [0, 0, 1, 1], [], []>} : vector<8x128xbf16>, vector<128x512xbf16>, vector<8x512xf32> -> vector<8x512xf32>
    %cst_119 = arith.constant dense<0.000000e+00> : vector<8x512xf32>
    %203 = tpu.matmul %201, %3, %cst_119 {dimension_numbers = #tpu.dot_dimension_numbers<[1], [0], [0], [1], [0, 0, 1, 1], [], []>} : vector<8x128xbf16>, vector<128x512xbf16>, vector<8x512xf32> -> vector<8x512xf32>
    %204 = arith.maximumf %202, %203 : vector<8x512xf32>
    %205 = vector.extract_strided_slice %204 {offsets = [0, 0], sizes = [8, 256], strides = [1, 1]} : vector<8x512xf32> to vector<8x256xf32>
    %206 = vector.extract_strided_slice %204 {offsets = [0, 256], sizes = [8, 256], strides = [1, 1]} : vector<8x512xf32> to vector<8x256xf32>
    %207 = arith.maximumf %205, %206 : vector<8x256xf32>
    %208 = arith.addf %207, %6 : vector<8x256xf32>
    %cst_120 = arith.constant 0.000000e+00 : f32
    %209 = vector.broadcast %cst_120 : f32 to vector<8x256xf32>
    %210 = arith.maximumf %208, %209 : vector<8x256xf32>
    %211 = arith.truncf %210 : vector<8x256xf32> to vector<8x256xbf16>
    %c12_121 = arith.constant 12 : index
    %c0_122 = arith.constant 0 : index
    %c0_123 = arith.constant 0 : index
    %212 = vector.load %arg4[%c12_121, %c0_122, %c0_123] : memref<13x256x128xbf16, #tpu.memory_space<vmem>>, vector<1x256x128xbf16>
    %213 = vector.shape_cast %212 : vector<1x256x128xbf16> to vector<256x128xbf16>
    %cst_124 = arith.constant dense<0.000000e+00> : vector<8x128xf32>
    %214 = tpu.matmul %211, %213, %cst_124 {dimension_numbers = #tpu.dot_dimension_numbers<[1], [0], [0], [1], [0, 0, 1, 1], [], []>} : vector<8x256xbf16>, vector<256x128xbf16>, vector<8x128xf32> -> vector<8x128xf32>
    %215 = arith.addf %199, %214 : vector<8x128xf32>
    %c0_125 = arith.constant 0 : index
    %c0_126 = arith.constant 0 : index
    %216 = vector.load %arg5[%c0_125, %c0_126] : memref<1x128xf32, #tpu.memory_space<vmem>>, vector<1x128xf32>
    %217 = vector.broadcast %216 : vector<1x128xf32> to vector<8x128xf32>
    %218 = arith.addf %215, %217 : vector<8x128xf32>
    %c0_127 = arith.constant 0 : index
    %c0_128 = arith.constant 0 : index
    %219 = vector.load %arg6[%c0_127, %c0_128] : memref<8x128xf32, #tpu.memory_space<vmem>>, vector<8x128xf32>
    tpu.vector_store %arg6[%c0_127, %c0_128], %218 {strides = array<i32>} : memref<8x128xf32, #tpu.memory_space<vmem>>, vector<8x128xf32>,
    return
  }
  func.func @transform_0(%arg0: i32) -> (i32, i32, i32) {
    %c0_i32 = arith.constant 0 : i32
    %c0_i32_0 = arith.constant 0 : i32
    %c0_i32_1 = arith.constant 0 : i32
    return %c0_i32, %arg0, %c0_i32_0 : i32, i32, i32
  }
  func.func @transform_1(%arg0: i32) -> (i32, i32, i32) {
    %c0_i32 = arith.constant 0 : i32
    %c0_i32_0 = arith.constant 0 : i32
    %c0_i32_1 = arith.constant 0 : i32
    %c0_i32_2 = arith.constant 0 : i32
    return %c0_i32, %c0_i32_0, %c0_i32_1 : i32, i32, i32
  }
  func.func @transform_2(%arg0: i32) -> (i32, i32) {
    %c0_i32 = arith.constant 0 : i32
    %c0_i32_0 = arith.constant 0 : i32
    %c0_i32_1 = arith.constant 0 : i32
    return %c0_i32, %c0_i32_0 : i32, i32
  }
  func.func @transform_3(%arg0: i32) -> (i32, i32, i32) {
    %c0_i32 = arith.constant 0 : i32
    %c0_i32_0 = arith.constant 0 : i32
    %c0_i32_1 = arith.constant 0 : i32
    %c0_i32_2 = arith.constant 0 : i32
    return %c0_i32, %c0_i32_0, %c0_i32_1 : i32, i32, i32
  }
  func.func @transform_4(%arg0: i32) -> (i32, i32) {
    %c0_i32 = arith.constant 0 : i32
    %c0_i32_0 = arith.constant 0 : i32
    %c0_i32_1 = arith.constant 0 : i32
    return %c0_i32, %c0_i32_0 : i32, i32
  }
  func.func @transform_5(%arg0: i32) -> (i32, i32) {
    %c0_i32 = arith.constant 0 : i32
    %c0_i32_0 = arith.constant 0 : i32
    return %arg0, %c0_i32 : i32, i32
  }
}

</mosaic_0001>

<bundles_post_ra>
// kernel: cnn_forward.1
= control target key start
LH: loop header
LB: loop body
LE: loop exit
PB: predicated region body
PF: predicated region fallthrough
CT: control target
= control target key end

     0   :  { %s7962_s1 = inlined_call_operand.vmem [shape: bf16[2,128,512], index: 1, kind: input, shape index: {}]   ;;  %s7963_s0 = inlined_call_operand.vmem [shape: bf16[13,8,128], index: 0, kind: input, shape index: {}]   ;;  %s7964_s3 = inlined_call_operand.vmem [shape: bf16[13,256,128], index: 3, kind: input, shape index: {}]   ;;  %s7965_s2 = inlined_call_operand.vmem [shape: f32[1,256], index: 2, kind: input, shape index: {}]   ;;  %s7966_s4 = inlined_call_operand.vmem [shape: f32[1,128], index: 4, kind: input, shape index: {}]   ;;  %s7967_s5 = inlined_call_operand.vmem [shape: f32[8,128], index: 5, kind: output, shape index: {}]  }
   0x1   :  { %v4125_v0 = vld [vmem:[%s7962_s1 + $0xe0] sm:$0xf]  ;;  %v5525_v1 = vld [vmem:[%s7962_s1 + $0xec] sm:$0xf0]  ;;  %v5523_v2 = vld [vmem:[%s7962_s1 + $0xe4] sm:$0xf] }
   0x2   :  { %v5807_v3 = vor.u32 %v5525_v1, %v4125_v0  ;;  %v4127_v4 = vld [vmem:[%s7962_s1 + $0xf0] sm:$0xf0]  ;;  %v4133_v5 = vld [vmem:[%s7962_s1 + $0xe8] sm:$0xf]  ;;  %v5526_v6 = vld [vmem:[%s7962_s1 + $0xf4] sm:$0xf0] }
   0x3   :  { %v5818_v7 = vor.u32 %v5523_v2, %v4127_v4  ;;  %v5820_v8 = vor.u32 %v5526_v6, %v4133_v5  ;;  %v5524_v9 = vld [vmem:[%s7962_s1 + $0xec] sm:$0xf]  ;;  %v4135_v10 = vld [vmem:[%s7962_s1 + $0xf8] sm:$0xf0]  ;;  %v4109_v11 = vld [vmem:[%s7962_s1 + $0xc0] sm:$0xf] }
   0x4   :  { %252 = vmatpush.bf16.msra.mxu0 %v5807_v3  ;;  %v5832_v12 = vor.u32 %v5524_v9, %v4135_v10  ;;  %v5521_v13 = vld [vmem:[%s7962_s1 + $0xcc] sm:$0xf0]  ;;  %v5519_v14 = vld [vmem:[%s7962_s1 + $0xc4] sm:$0xf]  ;;  %v4111_v15 = vld [vmem:[%s7962_s1 + $0xd0] sm:$0xf0] }
   0x5   :  { %8059 = vst [vmem:[#allocation2_spill] sm:$0xff] %v5820_v8  ;;  %265 = vmatpush.bf16.msra.mxu1 %v5818_v7  ;;  %278 = vmatpush.bf16.msra.mxu2 %v5820_v8  ;;  %v5845_v16 = vor.u32 %v5521_v13, %v4109_v11  ;;  %v5847_v17 = vor.u32 %v5519_v14, %v4111_v15  ;;  %v4117_v18 = vld [vmem:[%s7962_s1 + $0xc8] sm:$0xf]  ;;  %v5522_v19 = vld [vmem:[%s7962_s1 + $0xd4] sm:$0xf0] }
   0x6   :  { %8060 = vst [vmem:[#allocation3_spill] sm:$0xff] %v5832_v12  ;;  %v5520_v20 = vld [vmem:[%s7962_s1 + $0xcc] sm:$0xf]  ;;  %291 = vmatpush.bf16.msra.mxu3 %v5832_v12  ;;  %v5859_v21 = vor.u32 %v5522_v19, %v4117_v18  ;;  %v4119_v22 = vld [vmem:[%s7962_s1 + $0xd8] sm:$0xf0] }
   0x7   :  { %v4093_v23 = vld [vmem:[%s7962_s1 + $0xa0] sm:$0xf]  ;;  %v5517_v24 = vld [vmem:[%s7962_s1 + $0xac] sm:$0xf0]  ;;  %v5870_v25 = vor.u32 %v5520_v20, %v4119_v22  ;;  %v5515_v26 = vld [vmem:[%s7962_s1 + $0xa4] sm:$0xf] }
   0x8   :  { %8061 = vst [vmem:[#allocation4_spill] sm:$0xff] %v5859_v21  ;;  %v4095_v27 = vld [vmem:[%s7962_s1 + $0xb0] sm:$0xf0]  ;;  %v4101_v28 = vld [vmem:[%s7962_s1 + $0xa8] sm:$0xf]  ;;  %253 = vmatpush.bf16.msra.mxu0 %v5845_v16  ;;  %v5882_v29 = vor.u32 %v5517_v24, %v4093_v23 }
   0x9   :  { %8062 = vst [vmem:[#allocation5_spill] sm:$0xff] %v5870_v25  ;;  %v5518_v30 = vld [vmem:[%s7962_s1 + $0xb4] sm:$0xf0]  ;;  %v5516_v31 = vld [vmem:[%s7962_s1 + $0xac] sm:$0xf]  ;;  %266 = vmatpush.bf16.msra.mxu1 %v5847_v17  ;;  %279 = vmatpush.bf16.msra.mxu2 %v5859_v21  ;;  %v5895_v33 = vor.u32 %v5515_v26, %v4095_v27 }
   0xa   :  { %v4103_v32 = vld [vmem:[%s7962_s1 + $0xb8] sm:$0xf0]  ;;  %v5897_v34 = vor.u32 %v5518_v30, %v4101_v28  ;;  %v4077_v35 = vld [vmem:[%s7962_s1 + $0x80] sm:$0xf]  ;;  %v5513_v36 = vld [vmem:[%s7962_s1 + $0x8c] sm:$0xf0]  ;;  %292 = vmatpush.bf16.msra.mxu3 %v5870_v25 }
   0xb   :  { %v5511_v37 = vld [vmem:[%s7962_s1 + $0x84] sm:$0xf]  ;;  %v5909_v38 = vor.u32 %v5516_v31, %v4103_v32  ;;  %v4079_v39 = vld [vmem:[%s7962_s1 + $0x90] sm:$0xf0]  ;;  %v4085_v40 = vld [vmem:[%s7962_s1 + $0x88] sm:$0xf]  ;;  %v5927_v44 = vor.u32 %v5513_v36, %v4077_v35 }
   0xc   :  { %8063 = vst [vmem:[#allocation6_spill] sm:$0xff] %v5897_v34  ;;  %v5514_v41 = vld [vmem:[%s7962_s1 + $0x94] sm:$0xf0]  ;;  %v5512_v42 = vld [vmem:[%s7962_s1 + $0x8c] sm:$0xf]  ;;  %254 = vmatpush.bf16.msra.mxu0 %v5882_v29  ;;  %v5931_v45 = vor.u32 %v5511_v37, %v4079_v39 }
   0xd   :  { %8064 = vst [vmem:[#allocation7_spill] sm:$0xff] %v5909_v38  ;;  %v4087_v43 = vld [vmem:[%s7962_s1 + $0x98] sm:$0xf0]  ;;  %267 = vmatpush.bf16.msra.mxu1 %v5895_v33  ;;  %280 = vmatpush.bf16.msra.mxu2 %v5897_v34  ;;  %v5933_v46 = vor.u32 %v5514_v41, %v4085_v40  ;;  %v4061_v47 = vld [vmem:[%s7962_s1 + $0x60] sm:$0xf] }
   0xe   :  { %8065 = vst [vmem:[#allocation8_spill] sm:$0xff] %v5927_v44  ;;  %v5509_v48 = vld [vmem:[%s7962_s1 + $0x6c] sm:$0xf0]  ;;  %v5507_v49 = vld [vmem:[%s7962_s1 + $0x64] sm:$0xf]  ;;  %293 = vmatpush.bf16.msra.mxu3 %v5909_v38  ;;  %v5945_v50 = vor.u32 %v5512_v42, %v4087_v43 }
   0xf   :  { %8066 = vst [vmem:[#allocation9_spill] sm:$0xff] %v5931_v45  ;;  %v4063_v51 = vld [vmem:[%s7962_s1 + $0x70] sm:$0xf0]  ;;  %v4069_v52 = vld [vmem:[%s7962_s1 + $0x68] sm:$0xf]  ;;  %v5963_v56 = vor.u32 %v5509_v48, %v4061_v47 }
  0x10   :  { %8067 = vst [vmem:[#allocation10_spill] sm:$0xff] %v5933_v46  ;;  %v5510_v53 = vld [vmem:[%s7962_s1 + $0x74] sm:$0xf0]  ;;  %v5508_v54 = vld [vmem:[%s7962_s1 + $0x6c] sm:$0xf]  ;;  %255 = vmatpush.bf16.msra.mxu0 %v5927_v44  ;;  %v5967_v57 = vor.u32 %v5507_v49, %v4063_v51 }
  0x11   :  { %8068 = vst [vmem:[#allocation11_spill] sm:$0xff] %v5945_v50  ;;  %v4071_v55 = vld [vmem:[%s7962_s1 + $0x78] sm:$0xf0]  ;;  %268 = vmatpush.bf16.msra.mxu1 %v5931_v45  ;;  %281 = vmatpush.bf16.msra.mxu2 %v5933_v46  ;;  %v5969_v58 = vor.u32 %v5510_v53, %v4069_v52  ;;  %v4045_v59 = vld [vmem:[%s7962_s1 + $0x40] sm:$0xf] }
  0x12   :  { %8069 = vst [vmem:[#allocation12_spill] sm:$0xff] %v5963_v56  ;;  %v5505_v60 = vld [vmem:[%s7962_s1 + $0x4c] sm:$0xf0]  ;;  %v5503_v61 = vld [vmem:[%s7962_s1 + $0x44] sm:$0xf]  ;;  %294 = vmatpush.bf16.msra.mxu3 %v5945_v50  ;;  %v5981_v62 = vor.u32 %v5508_v54, %v4071_v55 }
  0x13   :  { %8070 = vst [vmem:[#allocation13_spill] sm:$0xff] %v5969_v58  ;;  %v4047_v63 = vld [vmem:[%s7962_s1 + $0x50] sm:$0xf0]  ;;  %v4053_v0 = vld [vmem:[%s7962_s1 + $0x48] sm:$0xf]  ;;  %v5999_v5 = vor.u32 %v5505_v60, %v4045_v59 }
  0x14   :  { %8071 = vst [vmem:[#allocation14_spill] sm:$0xff] %v5981_v62  ;;  %v5506_v1 = vld [vmem:[%s7962_s1 + $0x54] sm:$0xf0]  ;;  %v5504_v2 = vld [vmem:[%s7962_s1 + $0x4c] sm:$0xf]  ;;  %256 = vmatpush.bf16.msra.mxu0 %v5963_v56  ;;  %v6003_v6 = vor.u32 %v5503_v61, %v4047_v63 }
  0x15   :  { %v4055_v4 = vld [vmem:[%s7962_s1 + $0x58] sm:$0xf0]  ;;  %269 = vmatpush.bf16.msra.mxu1 %v5967_v57  ;;  %282 = vmatpush.bf16.msra.mxu2 %v5969_v58  ;;  %v6005_v9 = vor.u32 %v5506_v1, %v4053_v0  ;;  %v4029_v10 = vld [vmem:[%s7962_s1 + $0x20] sm:$0xf]  ;;  %v5501_v11 = vld [vmem:[%s7962_s1 + $0x2c] sm:$0xf0] }
  0x16   :  { %v5499_v13 = vld [vmem:[%s7962_s1 + $0x24] sm:$0xf]  ;;  %295 = vmatpush.bf16.msra.mxu3 %v5981_v62  ;;  %v6017_v14 = vor.u32 %v5504_v2, %v4055_v4  ;;  %v4031_v15 = vld [vmem:[%s7962_s1 + $0x30] sm:$0xf0]  ;;  %v4037_v18 = vld [vmem:[%s7962_s1 + $0x28] sm:$0xf]  ;;  %v6035_v23 = vor.u32 %v5501_v11, %v4029_v10 }
  0x17   :  { %8072 = vst [vmem:[#allocation15_spill] sm:$0xff] %v6005_v9  ;;  %v5502_v19 = vld [vmem:[%s7962_s1 + $0x34] sm:$0xf0]  ;;  %v5500_v20 = vld [vmem:[%s7962_s1 + $0x2c] sm:$0xf]  ;;  %v6045_v27 = vor.u32 %v5499_v13, %v4031_v15 }
  0x18   :  { %8073 = vst [vmem:[#allocation16_spill] sm:$0xff] %v6017_v14  ;;  %v4039_v22 = vld [vmem:[%s7962_s1 + $0x38] sm:$0xf0]  ;;  %257 = vmatpush.bf16.msra.mxu0 %v5999_v5  ;;  %v4013_v24 = vld [vmem:[%s7962_s1] sm:$0xf]  ;;  %v6047_v28 = vor.u32 %v5502_v19, %v4037_v18 }
  0x19   :  { %v5497_v26 = vld [vmem:[%s7962_s1 + $0xc] sm:$0xf0]  ;;  %270 = vmatpush.bf16.msra.mxu1 %v6003_v6  ;;  %283 = vmatpush.bf16.msra.mxu2 %v6005_v9  ;;  %v5495_v30 = vld [vmem:[%s7962_s1 + $0x4] sm:$0xf]  ;;  %v4015_v31 = vld [vmem:[%s7962_s1 + $0x10] sm:$0xf0]  ;;  %v6059_v35 = vor.u32 %v5500_v20, %v4039_v22 }
  0x1a   :  { %8074 = vst [vmem:[#allocation17_spill] sm:$0xff] %v6047_v28  ;;  %v4021_v32 = vld [vmem:[%s7962_s1 + $0x8] sm:$0xf]  ;;  %296 = vmatpush.bf16.msra.mxu3 %v6017_v14  ;;  %v5498_v36 = vld [vmem:[%s7962_s1 + $0x14] sm:$0xf0]  ;;  %v6080_v43 = vor.u32 %v5497_v26, %v4013_v24  ;;  %v6093_v51 = vor.u32 %v5495_v30, %v4015_v31 }
  0x1b   :  { %8075 = vst [vmem:[#allocation18_spill] sm:$0xff] %v6059_v35  ;;  %v5496_v37 = vld [vmem:[%s7962_s1 + $0xc] sm:$0xf]  ;;  %v4023_v39 = vld [vmem:[%s7962_s1 + $0x18] sm:$0xf0]  ;;  %v6095_v52 = vor.u32 %v5498_v36, %v4021_v32 }
  0x1c   :  { %v4253_v40 = vld [vmem:[%s7962_s1 + $0x1e0] sm:$0xf]  ;;  %v5557_v41 = vld [vmem:[%s7962_s1 + $0x1ec] sm:$0xf0]  ;;  %v5555_v42 = vld [vmem:[%s7962_s1 + $0x1e4] sm:$0xf]  ;;  %258 = vmatpush.bf16.msra.mxu0 %v6035_v23  ;;  %v6104_v55 = vor.u32 %v5496_v37, %v4023_v39 }
  0x1d   :  { %v4255_v47 = vld [vmem:[%s7962_s1 + $0x1f0] sm:$0xf0]  ;;  %v4261_v48 = vld [vmem:[%s7962_s1 + $0x1e8] sm:$0xf]  ;;  %v5558_v49 = vld [vmem:[%s7962_s1 + $0x1f4] sm:$0xf0]  ;;  %271 = vmatpush.bf16.msra.mxu1 %v6045_v27  ;;  %284 = vmatpush.bf16.msra.mxu2 %v6047_v28  ;;  %v6106_v59 = vor.u32 %v5557_v41, %v4253_v40 }
  0x1e   :  { %8076 = vst [vmem:[#allocation19_spill] sm:$0xff] %v6095_v52  ;;  %v5556_v53 = vld [vmem:[%s7962_s1 + $0x1ec] sm:$0xf]  ;;  %v4263_v54 = vld [vmem:[%s7962_s1 + $0x1f8] sm:$0xf0]  ;;  %297 = vmatpush.bf16.msra.mxu3 %v6059_v35  ;;  %v6108_v60 = vor.u32 %v5555_v42, %v4255_v47  ;;  %v6110_v61 = vor.u32 %v5558_v49, %v4261_v48 }
  0x1f   :  { %8077 = vst [vmem:[#allocation20_spill] sm:$0xff] %v6104_v55  ;;  %v4237_v63 = vld [vmem:[%s7962_s1 + $0x1c0] sm:$0xf]  ;;  %v5553_v0 = vld [vmem:[%s7962_s1 + $0x1cc] sm:$0xf0]  ;;  %v6122_v2 = vor.u32 %v5556_v53, %v4263_v54 }
  0x20   :  { %v5551_v1 = vld [vmem:[%s7962_s1 + $0x1c4] sm:$0xf]  ;;  %259 = vmatpush.bf16.msra.mxu0 %v6080_v43  ;;  %v4239_v4 = vld [vmem:[%s7962_s1 + $0x1d0] sm:$0xf0]  ;;  %v4245_v10 = vld [vmem:[%s7962_s1 + $0x1c8] sm:$0xf]  ;;  %v6148_v19 = vor.u32 %v5553_v0, %v4237_v63 }
  0x21   :  { %v5554_v11 = vld [vmem:[%s7962_s1 + $0x1d4] sm:$0xf0]  ;;  %272 = vmatpush.bf16.msra.mxu1 %v6093_v51  ;;  %285 = vmatpush.bf16.msra.mxu2 %v6095_v52  ;;  %v5552_v13 = vld [vmem:[%s7962_s1 + $0x1cc] sm:$0xf]  ;;  %v4247_v15 = vld [vmem:[%s7962_s1 + $0x1d8] sm:$0xf0]  ;;  %v6152_v20 = vor.u32 %v5551_v1, %v4239_v4 }
  0x22   :  { %v6144_v18 = vld [vmem:[%s7963_s0] sm:$0xf]  ;;  %298 = vmatpush.bf16.msra.mxu3 %v6104_v55  ;;  %v6154_v22 = vor.u32 %v5554_v11, %v4245_v10  ;;  %v5549_v26 = vld [vmem:[%s7962_s1 + $0x1ac] sm:$0xf0]  ;;  %v5547_v30 = vld [vmem:[%s7962_s1 + $0x1a4] sm:$0xf]  ;;  %v6166_v31 = vor.u32 %v5552_v13, %v4247_v15 }
  0x23   :  { %v4221_v24 = vld [vmem:[%s7962_s1 + $0x1a0] sm:$0xf]  ;;  %v4223_v32 = vld [vmem:[%s7962_s1 + $0x1b0] sm:$0xf0]  ;;  %v4229_v36 = vld [vmem:[%s7962_s1 + $0x1a8] sm:$0xf]  ;;  %260 = vmatmul.bf16.vlgmr.msra.gmra.mxu0 %v6144_v18 }
  0x24   :  { %464 = vmatpush.bf16.msrb.mxu0 %v6106_v59  ;;  %v5550_v37 = vld [vmem:[%s7962_s1 + $0x1b4] sm:$0xf0]  ;;  %286 = vmatmul.bf16.vlgmr.msra.gmra.mxu2 %v6144_v18  ;;  %v5548_v39 = vld [vmem:[%s7962_s1 + $0x1ac] sm:$0xf]  ;;  %v4231_v40 = vld [vmem:[%s7962_s1 + $0x1b8] sm:$0xf0]  ;;  %v6187_v41 = vor.u32 %v5549_v26, %v4221_v24  ;;  %v6192_v42 = vor.u32 %v5547_v30, %v4223_v32 }
  0x25   :  { %477 = vmatpush.bf16.msrb.mxu1 %v6108_v60  ;;  %490 = vmatpush.bf16.msrb.mxu2 %v6110_v61  ;;  %v6194_v47 = vor.u32 %v5550_v37, %v4229_v36  ;;  %v4205_v48 = vld [vmem:[%s7962_s1 + $0x180] sm:$0xf]  ;;  %v5545_v49 = vld [vmem:[%s7962_s1 + $0x18c] sm:$0xf0]  ;;  %v5543_v53 = vld [vmem:[%s7962_s1 + $0x184] sm:$0xf]  ;;  %v6206_v54 = vor.u32 %v5548_v39, %v4231_v40 }
  0x26   :  { %503 = vmatpush.bf16.msrb.mxu3 %v6122_v2  ;;  %8078 = vst [vmem:[#allocation21_spill] sm:$0xff] %v6187_v41  ;;  %273 = vmatmul.bf16.vlgmr.msra.gmra.mxu1 %v6144_v18  ;;  %v4207_v63 = vld [vmem:[%s7962_s1 + $0x190] sm:$0xf0]  ;;  %v4213_v0 = vld [vmem:[%s7962_s1 + $0x188] sm:$0xf]  ;;  %v6224_v11 = vor.u32 %v5545_v49, %v4205_v48 }
  0x27   :  { %299 = vmatmul.bf16.vlgmr.msra.gmra.mxu3 %v6144_v18  ;;  %8079 = vst [vmem:[#allocation22_spill] sm:$0xff] %v6192_v42  ;;  %v5546_v1 = vld [vmem:[%s7962_s1 + $0x194] sm:$0xf0]  ;;  %v5544_v4 = vld [vmem:[%s7962_s1 + $0x18c] sm:$0xf]  ;;  %v6228_v13 = vor.u32 %v5543_v53, %v4207_v63 }
  0x28   :  { %465 = vmatpush.bf16.msrb.mxu0 %v6148_v19  ;;  %v4215_v10 = vld [vmem:[%s7962_s1 + $0x198] sm:$0xf0]  ;;  %8080 = vst [vmem:[#allocation23_spill] sm:$0xff] %v6224_v11  ;;  %v6230_v15 = vor.u32 %v5546_v1, %v4213_v0  ;;  %v4189_v24 = vld [vmem:[%s7962_s1 + $0x160] sm:$0xf] }
  0x29   :  { %478 = vmatpush.bf16.msrb.mxu1 %v6152_v20  ;;  %491 = vmatpush.bf16.msrb.mxu2 %v6154_v22  ;;  %8081 = vst [vmem:[#allocation24_spill] sm:$0xff] %v6228_v13  ;;  %v5541_v26 = vld [vmem:[%s7962_s1 + $0x16c] sm:$0xf0]  ;;  %v5539_v30 = vld [vmem:[%s7962_s1 + $0x164] sm:$0xf]  ;;  %v6242_v32 = vor.u32 %v5544_v4, %v4215_v10 }
  0x2a   :  { %504 = vmatpush.bf16.msrb.mxu3 %v6166_v31  ;;  %8082 = vst [vmem:[#allocation25_spill] sm:$0xff] %v6230_v15  ;;  %v4191_v36 = vld [vmem:[%s7962_s1 + $0x170] sm:$0xf0]  ;;  %v4197_v37 = vld [vmem:[%s7962_s1 + $0x168] sm:$0xf]  ;;  %v6260_v49 = vor.u32 %v5541_v26, %v4189_v24 }
  0x2b   :  { %8083 = vst [vmem:[#allocation26_spill] sm:$0xff] %v6242_v32  ;;  %v5542_v39 = vld [vmem:[%s7962_s1 + $0x174] sm:$0xf0]  ;;  %v5540_v40 = vld [vmem:[%s7962_s1 + $0x16c] sm:$0xf]  ;;  %v6264_v53 = vor.u32 %v5539_v30, %v4191_v36 }
  0x2c   :  { %466 = vmatpush.bf16.msrb.mxu0 %v6187_v41  ;;  %v4199_v48 = vld [vmem:[%s7962_s1 + $0x178] sm:$0xf0]  ;;  %8084 = vst [vmem:[#allocation27_spill] sm:$0xff] %v6260_v49  ;;  %v6266_v63 = vor.u32 %v5542_v39, %v4197_v37  ;;  %v4173_v0 = vld [vmem:[%s7962_s1 + $0x140] sm:$0xf] }
  0x2d   :  { %479 = vmatpush.bf16.msrb.mxu1 %v6192_v42  ;;  %492 = vmatpush.bf16.msrb.mxu2 %v6194_v47  ;;  %8085 = vst [vmem:[#allocation28_spill] sm:$0xff] %v6264_v53  ;;  %v5537_v1 = vld [vmem:[%s7962_s1 + $0x14c] sm:$0xf0]  ;;  %v5535_v4 = vld [vmem:[%s7962_s1 + $0x144] sm:$0xf]  ;;  %v6278_v10 = vor.u32 %v5540_v40, %v4199_v48 }
  0x2e   :  { %505 = vmatpush.bf16.msrb.mxu3 %v6206_v54  ;;  %8086 = vst [vmem:[#allocation29_spill] sm:$0xff] %v6266_v63  ;;  %v4175_v24 = vld [vmem:[%s7962_s1 + $0x150] sm:$0xf0]  ;;  %v4181_v26 = vld [vmem:[%s7962_s1 + $0x148] sm:$0xf]  ;;  %v6296_v39 = vor.u32 %v5537_v1, %v4173_v0 }
  0x2f   :  { %8087 = vst [vmem:[#allocation30_spill] sm:$0xff] %v6278_v10  ;;  %v5538_v30 = vld [vmem:[%s7962_s1 + $0x154] sm:$0xf0]  ;;  %v5536_v36 = vld [vmem:[%s7962_s1 + $0x14c] sm:$0xf]  ;;  %v6300_v40 = vor.u32 %v5535_v4, %v4175_v24 }
  0x30   :  { %467 = vmatpush.bf16.msrb.mxu0 %v6224_v11  ;;  %v4183_v37 = vld [vmem:[%s7962_s1 + $0x158] sm:$0xf0]  ;;  %8088 = vst [vmem:[#allocation31_spill] sm:$0xff] %v6296_v39  ;;  %v6302_v48 = vor.u32 %v5538_v30, %v4181_v26  ;;  %v5531_v0 = vld [vmem:[%s7962_s1 + $0x124] sm:$0xf] }
  0x31   :  { %480 = vmatpush.bf16.msrb.mxu1 %v6228_v13  ;;  %493 = vmatpush.bf16.msrb.mxu2 %v6230_v15  ;;  %8089 = vst [vmem:[#allocation32_spill] sm:$0xff] %v6300_v40  ;;  %v5533_v15 = vld [vmem:[%s7962_s1 + $0x12c] sm:$0xf0]  ;;  %v6314_v1 = vor.u32 %v5536_v36, %v4183_v37  ;;  %v4159_v4 = vld [vmem:[%s7962_s1 + $0x130] sm:$0xf0] }
  0x32   :  { %506 = vmatpush.bf16.msrb.mxu3 %v6242_v32  ;;  %8090 = vst [vmem:[#allocation33_spill] sm:$0xff] %v6302_v48  ;;  %v4157_v32 = vld [vmem:[%s7962_s1 + $0x120] sm:$0xf]  ;;  %v4165_v24 = vld [vmem:[%s7962_s1 + $0x128] sm:$0xf] }
  0x33   :  { %8091 = vst [vmem:[#allocation34_spill] sm:$0xff] %v6314_v1  ;;  %v5534_v26 = vld [vmem:[%s7962_s1 + $0x134] sm:$0xf0]  ;;  %v5532_v30 = vld [vmem:[%s7962_s1 + $0x12c] sm:$0xf]  ;;  %v6332_v37 = vor.u32 %v5533_v15, %v4157_v32 }
  0x34   :  { %468 = vmatpush.bf16.msrb.mxu0 %v6260_v49  ;;  %v4167_v36 = vld [vmem:[%s7962_s1 + $0x138] sm:$0xf0]  ;;  %v5529_v49 = vld [vmem:[%s7962_s1 + $0x10c] sm:$0xf0]  ;;  %v5527_v15 = vld [vmem:[%s7962_s1 + $0x104] sm:$0xf] }
  0x35   :  { %481 = vmatpush.bf16.msrb.mxu1 %v6264_v53  ;;  %494 = vmatpush.bf16.msrb.mxu2 %v6266_v63  ;;  %8092 = vst [vmem:[#allocation35_spill] sm:$0xff] %v6332_v37  ;;  %v6338_v63 = vor.u32 %v5534_v26, %v4165_v24  ;;  %v4141_v53 = vld [vmem:[%s7962_s1 + $0x100] sm:$0xf]  ;;  %v6350_v32 = vor.u32 %v5532_v30, %v4167_v36  ;;  %v5530_v24 = vld [vmem:[%s7962_s1 + $0x114] sm:$0xf0] }
  0x36   :  { %507 = vmatpush.bf16.msrb.mxu3 %v6278_v10  ;;  %v6336_v10 = vor.u32 %v5531_v0, %v4159_v4  ;;  %v4143_v0 = vld [vmem:[%s7962_s1 + $0x110] sm:$0xf0]  ;;  %v4149_v4 = vld [vmem:[%s7962_s1 + $0x108] sm:$0xf]  ;;  %v5528_v26 = vld [vmem:[%s7962_s1 + $0x10c] sm:$0xf]  ;;  %v6368_v36 = vor.u32 %v5529_v49, %v4141_v53 }
  0x37   :  { %v4151_v30 = vld [vmem:[%s7962_s1 + $0x118] sm:$0xf0]  ;;  %v8097_v53 = vld [vmem:[#allocation26_spill] sm:$0xff] }
  0x38   :  { %469 = vmatpush.bf16.msrb.mxu0 %v6296_v39  ;;  %8093 = vst [vmem:[#allocation36_spill] sm:$0xff] %v6336_v10  ;;  %v8096_v49 = vld [vmem:[#allocation25_spill] sm:$0xff] }
  0x39   :  { %482 = vmatpush.bf16.msrb.mxu1 %v6300_v40  ;;  %495 = vmatpush.bf16.msrb.mxu2 %v6302_v48  ;;  %8094 = vst [vmem:[#allocation37_spill] sm:$0xff] %v6368_v36  ;;  %v6374_v48 = vor.u32 %v5530_v24, %v4149_v4  ;;  %v6377_v40 = vor.u32 %v5528_v26, %v4151_v30  ;;  %v8100_v4 = vld [vmem:[#allocation29_spill] sm:$0xff]  ;;  %v8101_v24 = vld [vmem:[#allocation30_spill] sm:$0xff]  ;;  %v8102_v26 = vld [vmem:[#allocation32_spill] sm:$0xff] }
  0x3a   :  { %508 = vmatpush.bf16.msrb.mxu3 %v6314_v1  ;;  %v6372_v1 = vor.u32 %v5527_v15, %v4143_v0  ;;  %v8098_v15 = vld [vmem:[#allocation27_spill] sm:$0xff]  ;;  %v8099_v0 = vld [vmem:[#allocation28_spill] sm:$0xff]  ;;  %v8103_v30 = vld [vmem:[#allocation33_spill] sm:$0xff] }
  0x3c   :  { %470 = vmatpush.bf16.msrb.mxu0 %v6332_v37  ;;  %8095 = vst [vmem:[#allocation38_spill] sm:$0xff] %v6372_v1 }
  0x3d   :  { %483 = vmatpush.bf16.msrb.mxu1 %v6336_v10  ;;  %496 = vmatpush.bf16.msrb.mxu2 %v6338_v63 }
  0x3e   :  { %509 = vmatpush.bf16.msrb.mxu3 %v6350_v32 }
  0x40   :  { %471 = vmatpush.bf16.msrb.mxu0 %v6368_v36 }
  0x41   :  { %484 = vmatpush.bf16.msrb.mxu1 %v6372_v1  ;;  %497 = vmatpush.bf16.msrb.mxu2 %v6374_v48 }
  0x42   :  { %510 = vmatpush.bf16.msrb.mxu3 %v6377_v40 }
  0x43   :  { %472 = vmatmul.bf16.vlgmr.msrb.gmra.mxu0 %v6144_v18 }
  0x44   :  { %562 = vmatpush.bf16.msra.mxu0 %v5807_v3  ;;  %498 = vmatmul.bf16.vlgmr.msrb.gmra.mxu2 %v6144_v18 }
  0x45   :  { %575 = vmatpush.bf16.msra.mxu1 %v5818_v7  ;;  %588 = vmatpush.bf16.msra.mxu2 %v5820_v8 }
  0x46   :  { %601 = vmatpush.bf16.msra.mxu3 %v5832_v12  ;;  %485 = vmatmul.bf16.vlgmr.msrb.gmra.mxu1 %v6144_v18 }
  0x47   :  { %511 = vmatmul.bf16.vlgmr.msrb.gmra.mxu3 %v6144_v18  ;;  %v4267_v18 = vld [vmem:[%s7963_s0 + $0x4] sm:$0xf] }
  0x48   :  { %563 = vmatpush.bf16.msra.mxu0 %v5845_v16 }
  0x49   :  { %576 = vmatpush.bf16.msra.mxu1 %v5847_v17  ;;  %589 = vmatpush.bf16.msra.mxu2 %v5859_v21 }
  0x4a   :  { %602 = vmatpush.bf16.msra.mxu3 %v5870_v25 }
  0x4c   :  { %564 = vmatpush.bf16.msra.mxu0 %v5882_v29 }
  0x4d   :  { %577 = vmatpush.bf16.msra.mxu1 %v5895_v33  ;;  %590 = vmatpush.bf16.msra.mxu2 %v5897_v34 }
  0x4e   :  { %603 = vmatpush.bf16.msra.mxu3 %v5909_v38 }
  0x50   :  { %565 = vmatpush.bf16.msra.mxu0 %v5927_v44 }
  0x51   :  { %578 = vmatpush.bf16.msra.mxu1 %v5931_v45  ;;  %591 = vmatpush.bf16.msra.mxu2 %v5933_v46 }
  0x52   :  { %604 = vmatpush.bf16.msra.mxu3 %v5945_v50 }
  0x54   :  { %566 = vmatpush.bf16.msra.mxu0 %v5963_v56 }
  0x55   :  { %579 = vmatpush.bf16.msra.mxu1 %v5967_v57  ;;  %592 = vmatpush.bf16.msra.mxu2 %v5969_v58 }
  0x56   :  { %605 = vmatpush.bf16.msra.mxu3 %v5981_v62 }
  0x58   :  { %567 = vmatpush.bf16.msra.mxu0 %v5999_v5 }
  0x59   :  { %580 = vmatpush.bf16.msra.mxu1 %v6003_v6  ;;  %593 = vmatpush.bf16.msra.mxu2 %v6005_v9 }
  0x5a   :  { %606 = vmatpush.bf16.msra.mxu3 %v6017_v14 }
  0x5c   :  { %568 = vmatpush.bf16.msra.mxu0 %v6035_v23 }
  0x5d   :  { %581 = vmatpush.bf16.msra.mxu1 %v6045_v27  ;;  %594 = vmatpush.bf16.msra.mxu2 %v6047_v28 }
  0x5e   :  { %607 = vmatpush.bf16.msra.mxu3 %v6059_v35 }
  0x60   :  { %569 = vmatpush.bf16.msra.mxu0 %v6080_v43 }
  0x61   :  { %582 = vmatpush.bf16.msra.mxu1 %v6093_v51  ;;  %595 = vmatpush.bf16.msra.mxu2 %v6095_v52 }
  0x62   :  { %608 = vmatpush.bf16.msra.mxu3 %v6104_v55 }
  0x63   :  { %570 = vmatmul.bf16.vlgmr.msra.gmra.mxu0 %v4267_v18 }
  0x64   :  { %614 = vmatpush.bf16.msrb.mxu0 %v6106_v59  ;;  %596 = vmatmul.bf16.vlgmr.msra.gmra.mxu2 %v4267_v18 }
  0x65   :  { %627 = vmatpush.bf16.msrb.mxu1 %v6108_v60  ;;  %640 = vmatpush.bf16.msrb.mxu2 %v6110_v61 }
  0x66   :  { %653 = vmatpush.bf16.msrb.mxu3 %v6122_v2  ;;  %583 = vmatmul.bf16.vlgmr.msra.gmra.mxu1 %v4267_v18 }
  0x67   :  { %609 = vmatmul.bf16.vlgmr.msra.gmra.mxu3 %v4267_v18 }
  0x68   :  { %615 = vmatpush.bf16.msrb.mxu0 %v6148_v19 }
  0x69   :  { %628 = vmatpush.bf16.msrb.mxu1 %v6152_v20  ;;  %641 = vmatpush.bf16.msrb.mxu2 %v6154_v22 }
  0x6a   :  { %654 = vmatpush.bf16.msrb.mxu3 %v6166_v31 }
  0x6c   :  { %616 = vmatpush.bf16.msrb.mxu0 %v6187_v41  ;;  %v5582_v41 = vld [vmem:[%s7964_s3 + $0xb8] sm:$0xff] }
  0x6d   :  { %629 = vmatpush.bf16.msrb.mxu1 %v6192_v42  ;;  %642 = vmatpush.bf16.msrb.mxu2 %v6194_v47  ;;  %v5559_v42 = vld [vmem:[%s7964_s3] sm:$0xff] }
  0x6e   :  { %655 = vmatpush.bf16.msrb.mxu3 %v6206_v54 }
  0x70   :  { %617 = vmatpush.bf16.msrb.mxu0 %v6224_v11  ;;  %v8104_v11 = vld [vmem:[#allocation34_spill] sm:$0xff] }
  0x71   :  { %630 = vmatpush.bf16.msrb.mxu1 %v6228_v13  ;;  %643 = vmatpush.bf16.msrb.mxu2 %v8096_v49 }
  0x72   :  { %656 = vmatpush.bf16.msrb.mxu3 %v8097_v53 }
  0x74   :  { %618 = vmatpush.bf16.msrb.mxu0 %v8098_v15  ;;  %v5568_v15 = vld [vmem:[%s7964_s3 + $0x48] sm:$0xff] }
  0x75   :  { %631 = vmatpush.bf16.msrb.mxu1 %v8099_v0  ;;  %644 = vmatpush.bf16.msrb.mxu2 %v8100_v4  ;;  %v5566_v0 = vld [vmem:[%s7964_s3 + $0x38] sm:$0xff] }
  0x76   :  { %657 = vmatpush.bf16.msrb.mxu3 %v8101_v24 }
  0x78   :  { %619 = vmatpush.bf16.msrb.mxu0 %v6296_v39 }
  0x79   :  { %632 = vmatpush.bf16.msrb.mxu1 %v8102_v26  ;;  %645 = vmatpush.bf16.msrb.mxu2 %v8103_v30  ;;  %v5574_v26 = vld [vmem:[%s7964_s3 + $0x78] sm:$0xff] }
  0x7a   :  { %658 = vmatpush.bf16.msrb.mxu3 %v8104_v11 }
  0x7c   :  { %620 = vmatpush.bf16.msrb.mxu0 %v6332_v37  ;;  %v5561_v37 = vld [vmem:[%s7964_s3 + $0x10] sm:$0xff] }
  0x7d   :  { %633 = vmatpush.bf16.msrb.mxu1 %v6336_v10  ;;  %646 = vmatpush.bf16.msrb.mxu2 %v6338_v63  ;;  %v5565_v10 = vld [vmem:[%s7964_s3 + $0x30] sm:$0xff] }
  0x7e   :  { %659 = vmatpush.bf16.msrb.mxu3 %v6350_v32 }
  0x80   :  { %621 = vmatpush.bf16.msrb.mxu0 %v6368_v36  ;;  %v5573_v36 = vld [vmem:[%s7964_s3 + $0x70] sm:$0xff] }
  0x81   :  { %634 = vmatpush.bf16.msrb.mxu1 %v6372_v1  ;;  %647 = vmatpush.bf16.msrb.mxu2 %v6374_v48  ;;  %v5564_v1 = vld [vmem:[%s7964_s3 + $0x28] sm:$0xff] }
  0x82   :  { %660 = vmatpush.bf16.msrb.mxu3 %v6377_v40 }
  0x83   :  { %622 = vmatmul.bf16.vlgmr.msrb.gmra.mxu0 %v4267_v18 }
  0x84   :  { %635 = vmatmul.bf16.vlgmr.msrb.gmra.mxu1 %v4267_v18  ;;  %648 = vmatmul.bf16.vlgmr.msrb.gmra.mxu2 %v4267_v18 }
  0x85   :  { %929 = vmatpush.bf16.msra.mxu2 %v5566_v0  ;;  %661 = vmatmul.bf16.vlgmr.msrb.gmra.mxu3 %v4267_v18  ;;  %v5572_v0 = vld [vmem:[%s7964_s3 + $0x68] sm:$0xff]  ;;  %v5563_v18 = vld [vmem:[%s7964_s3 + $0x20] sm:$0xff] }
  0x86   :  { %942 = vmatpush.bf16.msra.mxu3 %v5574_v26  ;;  %v5571_v26 = vld [vmem:[%s7964_s3 + $0x60] sm:$0xff]  ;;  %807 = vmatpush.bf16.msra.mxu0 %v5582_v41  ;;  %v5588_v41 = vld [vmem:[%s7964_s3 + $0xe8] sm:$0xff] }
  0x89   :  { %930 = vmatpush.bf16.msra.mxu2 %v5565_v10  ;;  %v5562_v10 = vld [vmem:[%s7964_s3 + $0x18] sm:$0xff] }
  0x8a   :  { %943 = vmatpush.bf16.msra.mxu3 %v5573_v36  ;;  %v5570_v36 = vld [vmem:[%s7964_s3 + $0x58] sm:$0xff] }
  0x8d   :  { %931 = vmatpush.bf16.msra.mxu2 %v5564_v1 }
  0x8e   :  { %944 = vmatpush.bf16.msra.mxu3 %v5572_v0 }
  0x91   :  { %932 = vmatpush.bf16.msra.mxu2 %v5563_v18  ;;  %v5569_v18 = vld [vmem:[%s7964_s3 + $0x50] sm:$0xff] }
  0x92   :  { %945 = vmatpush.bf16.msra.mxu3 %v5571_v26 }
  0x95   :  { %933 = vmatpush.bf16.msra.mxu2 %v5562_v10 }
  0x96   :  { %946 = vmatpush.bf16.msra.mxu3 %v5570_v36  ;;  %v5560_v36 = vld [vmem:[%s7964_s3 + $0x8] sm:$0xff] }
  0x99   :  { %934 = vmatpush.bf16.msra.mxu2 %v5561_v37  ;;  %v5567_v37 = vld [vmem:[%s7964_s3 + $0x40] sm:$0xff] }
  0x9a   :  { %947 = vmatpush.bf16.msra.mxu3 %v5569_v18 }
  0x9d   :  { %935 = vmatpush.bf16.msra.mxu2 %v5560_v36  ;;  %v5580_v36 = vld [vmem:[%s7964_s3 + $0xa8] sm:$0xff] }
  0x9e   :  { %948 = vmatpush.bf16.msra.mxu3 %v5568_v15  ;;  %v5581_v15 = vld [vmem:[%s7964_s3 + $0xb0] sm:$0xff] }
  0x9f   :  { %808 = vmatpush.bf16.msra.mxu0 %v5581_v15 }
  0xa0   :  { %v6484_v1 = vpop.f32.mrf.mxu0 }
  0xa1   :  { %936 = vmatpush.bf16.msra.mxu2 %v5559_v42  ;;  %v5589_v42 = vld [vmem:[%s7964_s3 + $0xf0] sm:$0xff] }
  0xa2   :  { %949 = vmatpush.bf16.msra.mxu3 %v5567_v37  ;;  %v5579_v37 = vld [vmem:[%s7964_s3 + $0xa0] sm:$0xff] }
  0xa3   :  { %v6486_v0 = vpop.f32.mrf.mxu1  ;;  %809 = vmatpush.bf16.msra.mxu0 %v5580_v36  ;;  %v85_v36 = vld [vmem:[%s7965_s2] sm:$0x3] }
  0xa5   :  { %983 = vmatpush.bf16.msrb.mxu2 %v5820_v8 }
  0xa6   :  { %996 = vmatpush.bf16.msrb.mxu3 %v5832_v12 }
  0xa7   :  { %v6494_v26 = vpop.f32.mrf.mxu2  ;;  %810 = vmatpush.bf16.msra.mxu0 %v5579_v37  ;;  %v5585_v37 = vld [vmem:[%s7964_s3 + $0xd0] sm:$0xff] }
  0xa8   :  { %v263_v10 = vpop.f32.mrf.mxu0 }
  0xa9   :  { %984 = vmatpush.bf16.msrb.mxu2 %v5859_v21 }
  0xaa   :  { %v6496_v39 = vpop.f32.mrf.mxu3  ;;  %997 = vmatpush.bf16.msrb.mxu3 %v5870_v25 }
  0xab   :  { %v276_v13 = vpop.f32.mrf.mxu1 }
  0xac   :  { %v5590_v13 = vld [vmem:[%s7964_s3 + $0xf8] sm:$0xff] }
  0xad   :  { %820 = vmatpush.bf16.msra.mxu1 %v5590_v13  ;;  %985 = vmatpush.bf16.msrb.mxu2 %v5897_v34  ;;  %v5586_v13 = vld [vmem:[%s7964_s3 + $0xd8] sm:$0xff] }
  0xae   :  { %998 = vmatpush.bf16.msrb.mxu3 %v5909_v38 }
  0xaf   :  { %v289_v18 = vpop.f32.mrf.mxu2 }
  0xb0   :  { %v5587_v18 = vld [vmem:[%s7964_s3 + $0xe0] sm:$0xff] }
  0xb1   :  { %821 = vmatpush.bf16.msra.mxu1 %v5589_v42  ;;  %986 = vmatpush.bf16.msrb.mxu2 %v5933_v46  ;;  %v6566_v46 = vperm.slane %v85_v36, 1 }
  0xb2   :  { %v302_v10 = vpop.f32.mrf.mxu3  ;;  %999 = vmatpush.bf16.msrb.mxu3 %v5945_v50 }
  0xb3   :  { %v5578_v10 = vld [vmem:[%s7964_s3 + $0x98] sm:$0xff] }
  0xb4   :  { %811 = vmatpush.bf16.msra.mxu0 %v5578_v10 }
  0xb5   :  { %822 = vmatpush.bf16.msra.mxu1 %v5588_v41  ;;  %987 = vmatpush.bf16.msrb.mxu2 %v5969_v58  ;;  %v5577_v41 = vld [vmem:[%s7964_s3 + $0x90] sm:$0xff]  ;;  %v6562_v58 = vperm.slane %v85_v36, 0 }
  0xb6   :  { %1000 = vmatpush.bf16.msrb.mxu3 %v5981_v62 }
  0xb8   :  { %812 = vmatpush.bf16.msra.mxu0 %v5577_v41 }
  0xb9   :  { %823 = vmatpush.bf16.msra.mxu1 %v5587_v18  ;;  %988 = vmatpush.bf16.msrb.mxu2 %v6005_v9  ;;  %v5576_v9 = vld [vmem:[%s7964_s3 + $0x88] sm:$0xff] }
  0xba   :  { %1001 = vmatpush.bf16.msrb.mxu3 %v6017_v14 }
  0xbc   :  { %813 = vmatpush.bf16.msra.mxu0 %v5576_v9 }
  0xbd   :  { %824 = vmatpush.bf16.msra.mxu1 %v5586_v13  ;;  %989 = vmatpush.bf16.msrb.mxu2 %v6047_v28 }
  0xbe   :  { %1002 = vmatpush.bf16.msrb.mxu3 %v6059_v35 }
  0xc0   :  { %v473_v15 = vpop.f32.mrf.mxu0 }
  0xc1   :  { %v516_v62 = vmax.f32 %v6484_v1, %v473_v15  ;;  %825 = vmatpush.bf16.msra.mxu1 %v5585_v37  ;;  %v5584_v1 = vld [vmem:[%s7964_s3 + $0xc8] sm:$0xff]  ;;  %990 = vmatpush.bf16.msrb.mxu2 %v6095_v52 }
  0xc2   :  { %1003 = vmatpush.bf16.msrb.mxu3 %v6104_v55 }
  0xc3   :  { %v486_v42 = vpop.f32.mrf.mxu1 }
  0xc4   :  { %v517_v50 = vmax.f32 %v6486_v0, %v486_v42  ;;  %v5575_v42 = vld [vmem:[%s7964_s3 + $0x80] sm:$0xff] }
  0xc5   :  { %826 = vmatpush.bf16.msra.mxu1 %v5584_v1  ;;  %814 = vmatpush.bf16.msra.mxu0 %v5575_v42 }
  0xc7   :  { %v499_v18 = vpop.f32.mrf.mxu2 }
  0xc8   :  { %v518_v10 = vmax.f32 %v6494_v26, %v499_v18  ;;  %v475_v14 = vpop.f32.mrf.mxu0 }
  0xc9   :  { %957 = vmatpush.bf16.msrb.mxu0 %v5807_v3 }
  0xca   :  { %v512_v13 = vpop.f32.mrf.mxu3  ;;  %v520_v15 = vmax.f32 %v516_v62, %v518_v10  ;;  %v5583_v62 = vld [vmem:[%s7964_s3 + $0xc0] sm:$0xff] }
  0xcb   :  { %v519_v38 = vmax.f32 %v6496_v39, %v512_v13  ;;  %v488_v18 = vpop.f32.mrf.mxu1  ;;  %827 = vmatpush.bf16.msra.mxu1 %v5583_v62 }
  0xcc   :  { %v522_v39 = vadd.f32 %v520_v15, %v6562_v58 }
  0xcd   :  { %v521_v26 = vmax.f32 %v517_v50, %v519_v38  ;;  %958 = vmatpush.bf16.msrb.mxu0 %v5845_v16 }
  0xce   :  { %v524_v38 = vmax.f32 %v522_v39, 0.0 }
  0xcf   :  { %v523_v0 = vadd.f32 %v521_v26, %v6566_v46  ;;  %v501_v14 = vpop.f32.mrf.mxu2  ;;  %970 = vmatpush.bf16.msrb.mxu1 %v5818_v7  ;;  %v6612_v26 = vld [vmem:[%s7963_s0 + $0x8] sm:$0xf] }
  0xd0   :  { %v526_v36 = vpack.c.bf16 %v524_v38, %v524_v38 }
  0xd1   :  { %v525_v50 = vmax.f32 %v523_v0, 0.0  ;;  %959 = vmatpush.bf16.msrb.mxu0 %v5882_v29 }
  0xd2   :  { %v514_v41 = vpop.f32.mrf.mxu3  ;;  %937 = vmatmul.bf16.vlgmr.msra.gmra.mxu2 %v526_v36 }
  0xd3   :  { %v527_v37 = vpack.c.bf16 %v525_v50, %v525_v50  ;;  %1035 = vmatpush.bf16.msra.mxu2 %v6110_v61  ;;  %971 = vmatpush.bf16.msrb.mxu1 %v5847_v17 }
  0xd5   :  { %950 = vmatmul.bf16.vlgmr.msra.gmra.mxu3 %v527_v37  ;;  %960 = vmatpush.bf16.msrb.mxu0 %v5927_v44 }
  0xd6   :  { %1048 = vmatpush.bf16.msra.mxu3 %v6122_v2 }
  0xd7   :  { %1036 = vmatpush.bf16.msra.mxu2 %v6154_v22  ;;  %972 = vmatpush.bf16.msrb.mxu1 %v5895_v33 }
  0xd9   :  { %961 = vmatpush.bf16.msrb.mxu0 %v5963_v56 }
  0xda   :  { %1049 = vmatpush.bf16.msra.mxu3 %v6166_v31 }
  0xdb   :  { %1037 = vmatpush.bf16.msra.mxu2 %v6194_v47  ;;  %973 = vmatpush.bf16.msrb.mxu1 %v5931_v45 }
  0xdd   :  { %962 = vmatpush.bf16.msrb.mxu0 %v5999_v5 }
  0xde   :  { %1050 = vmatpush.bf16.msra.mxu3 %v6206_v54 }
  0xdf   :  { %1038 = vmatpush.bf16.msra.mxu2 %v8096_v49  ;;  %974 = vmatpush.bf16.msrb.mxu1 %v5967_v57 }
  0xe0   :  { %v571_v9 = vpop.f32.mrf.mxu0 }
  0xe1   :  { %963 = vmatpush.bf16.msrb.mxu0 %v6035_v23 }
  0xe2   :  { %1051 = vmatpush.bf16.msra.mxu3 %v8097_v53  ;;  %991 = vmatmul.bf16.vlgmr.msrb.gmra.mxu2 %v6612_v26 }
  0xe3   :  { %v584_v10 = vpop.f32.mrf.mxu1  ;;  %1039 = vmatpush.bf16.msra.mxu2 %v8100_v4  ;;  %975 = vmatpush.bf16.msrb.mxu1 %v6003_v6 }
  0xe5   :  { %1004 = vmatmul.bf16.vlgmr.msrb.gmra.mxu3 %v6612_v26  ;;  %964 = vmatpush.bf16.msrb.mxu0 %v6080_v43 }
  0xe6   :  { %1052 = vmatpush.bf16.msra.mxu3 %v8101_v24 }
  0xe7   :  { %v597_v13 = vpop.f32.mrf.mxu2  ;;  %1040 = vmatpush.bf16.msra.mxu2 %v8103_v30  ;;  %976 = vmatpush.bf16.msrb.mxu1 %v6045_v27 }
  0xe8   :  { %v573_v15 = vpop.f32.mrf.mxu0 }
  0xea   :  { %v610_v1 = vpop.f32.mrf.mxu3  ;;  %1053 = vmatpush.bf16.msra.mxu3 %v8104_v11 }
  0xeb   :  { %v586_v18 = vpop.f32.mrf.mxu1  ;;  %1041 = vmatpush.bf16.msra.mxu2 %v6338_v63  ;;  %977 = vmatpush.bf16.msrb.mxu1 %v6093_v51 }
  0xee   :  { %1054 = vmatpush.bf16.msra.mxu3 %v6350_v32 }
  0xef   :  { %v599_v39 = vpop.f32.mrf.mxu2  ;;  %1042 = vmatpush.bf16.msra.mxu2 %v6374_v48 }
  0xf2   :  { %v612_v0 = vpop.f32.mrf.mxu3  ;;  %1055 = vmatpush.bf16.msra.mxu3 %v6377_v40  ;;  %1043 = vmatmul.bf16.vlgmr.msra.gmra.mxu2 %v6612_v26 }
  0xf3   :  { %1231 = vmatpush.bf16.msrb.mxu2 %v5807_v3 }
  0xf5   :  { %1056 = vmatmul.bf16.vlgmr.msra.gmra.mxu3 %v6612_v26 }
  0xf6   :  { %1244 = vmatpush.bf16.msrb.mxu3 %v5818_v7 }
  0xf7   :  { %1232 = vmatpush.bf16.msrb.mxu2 %v5845_v16 }
  0xfa   :  { %1245 = vmatpush.bf16.msrb.mxu3 %v5847_v17 }
  0xfb   :  { %1233 = vmatpush.bf16.msrb.mxu2 %v5882_v29 }
  0xfe   :  { %1246 = vmatpush.bf16.msrb.mxu3 %v5895_v33 }
  0xff   :  { %1234 = vmatpush.bf16.msrb.mxu2 %v5927_v44 }
 0x100   :  { %v623_v42 = vpop.f32.mrf.mxu0 }
 0x101   :  { %v636_v62 = vpop.f32.mrf.mxu1  ;;  %v666_v50 = vmax.f32 %v571_v9, %v623_v42 }
 0x102   :  { %1247 = vmatpush.bf16.msrb.mxu3 %v5931_v45  ;;  %v667_v37 = vmax.f32 %v584_v10, %v636_v62  ;;  %v8108_v62 = vld [vmem:[#allocation24_spill] sm:$0xff] }
 0x103   :  { %1235 = vmatpush.bf16.msrb.mxu2 %v5963_v56 }
 0x106   :  { %1248 = vmatpush.bf16.msrb.mxu3 %v5967_v57 }
 0x107   :  { %v649_v38 = vpop.f32.mrf.mxu2  ;;  %1236 = vmatpush.bf16.msrb.mxu2 %v5999_v5 }
 0x108   :  { %v668_v14 = vmax.f32 %v597_v13, %v649_v38  ;;  %v662_v36 = vpop.f32.mrf.mxu3  ;;  %v625_v41 = vpop.f32.mrf.mxu0  ;;  %v8109_v38 = vld [vmem:[#allocation27_spill] sm:$0xff] }
 0x109   :  { %v669_v15 = vmax.f32 %v610_v1, %v662_v36  ;;  %v638_v18 = vpop.f32.mrf.mxu1  ;;  %v8112_v36 = vld [vmem:[#allocation32_spill] sm:$0xff]  ;;  %v8113_v41 = vld [vmem:[#allocation35_spill] sm:$0xff] }
 0x10a   :  { %v670_v39 = vmax.f32 %v666_v50, %v668_v14  ;;  %1249 = vmatpush.bf16.msrb.mxu3 %v6003_v6  ;;  %v8110_v50 = vld [vmem:[#allocation28_spill] sm:$0xff]  ;;  %v8111_v14 = vld [vmem:[#allocation31_spill] sm:$0xff]  ;;  %v8116_v18 = vld [vmem:[#allocation38_spill] sm:$0xff] }
 0x10b   :  { %v671_v0 = vmax.f32 %v667_v37, %v669_v15  ;;  %1237 = vmatpush.bf16.msrb.mxu2 %v6035_v23  ;;  %v8114_v37 = vld [vmem:[#allocation36_spill] sm:$0xff]  ;;  %v8115_v15 = vld [vmem:[#allocation37_spill] sm:$0xff] }
 0x10c   :  { %v672_v45 = vadd.f32 %v670_v39, %v6562_v58  ;;  %v5598_v39 = vld [vmem:[%s7964_s3 + $0x138] sm:$0xff] }
 0x10d   :  { %v673_v56 = vadd.f32 %v671_v0, %v6566_v46  ;;  %v5606_v0 = vld [vmem:[%s7964_s3 + $0x178] sm:$0xff] }
 0x10e   :  { %v674_v44 = vmax.f32 %v672_v45, 0.0  ;;  %1250 = vmatpush.bf16.msrb.mxu3 %v6045_v27  ;;  %v8106_v45 = vld [vmem:[#allocation22_spill] sm:$0xff] }
 0x10f   :  { %v675_v9 = vmax.f32 %v673_v56, 0.0  ;;  %v651_v13 = vpop.f32.mrf.mxu2  ;;  %1238 = vmatpush.bf16.msrb.mxu2 %v6080_v43  ;;  %v8107_v56 = vld [vmem:[#allocation23_spill] sm:$0xff] }
 0x110   :  { %v676_v10 = vpack.c.bf16 %v674_v44, %v674_v44  ;;  %v664_v1 = vpop.f32.mrf.mxu3  ;;  %v8105_v44 = vld [vmem:[#allocation21_spill] sm:$0xff]  ;;  %v5605_v13 = vld [vmem:[%s7964_s3 + $0x170] sm:$0xff] }
 0x111   :  { %v677_v42 = vpack.c.bf16 %v675_v9, %v675_v9  ;;  %v5597_v9 = vld [vmem:[%s7964_s3 + $0x130] sm:$0xff]  ;;  %v5595_v1 = vld [vmem:[%s7964_s3 + $0x120] sm:$0xff] }
 0x112   :  { %815 = vmatmul.bf16.vlgmr.msra.gmra.mxu0 %v676_v10  ;;  %1251 = vmatpush.bf16.msrb.mxu3 %v6093_v51  ;;  %v5604_v10 = vld [vmem:[%s7964_s3 + $0x168] sm:$0xff] }
 0x113   :  { %828 = vmatmul.bf16.vlgmr.msra.gmra.mxu1 %v677_v42  ;;  %1009 = vmatpush.bf16.msra.mxu0 %v6106_v59  ;;  %v5603_v42 = vld [vmem:[%s7964_s3 + $0x160] sm:$0xff] }
 0x114   :  { %1022 = vmatpush.bf16.msra.mxu1 %v6108_v60  ;;  %1283 = vmatpush.bf16.msra.mxu2 %v6106_v59 }
 0x116   :  { %1296 = vmatpush.bf16.msra.mxu3 %v6108_v60 }
 0x117   :  { %1010 = vmatpush.bf16.msra.mxu0 %v6148_v19 }
 0x118   :  { %1023 = vmatpush.bf16.msra.mxu1 %v6152_v20  ;;  %1284 = vmatpush.bf16.msra.mxu2 %v6148_v19 }
 0x11a   :  { %1297 = vmatpush.bf16.msra.mxu3 %v6152_v20 }
 0x11b   :  { %1011 = vmatpush.bf16.msra.mxu0 %v8105_v44 }
 0x11c   :  { %1024 = vmatpush.bf16.msra.mxu1 %v8106_v45  ;;  %1285 = vmatpush.bf16.msra.mxu2 %v8105_v44 }
 0x11e   :  { %1298 = vmatpush.bf16.msra.mxu3 %v8106_v45 }
 0x11f   :  { %1012 = vmatpush.bf16.msra.mxu0 %v8107_v56 }
 0x120   :  { %1025 = vmatpush.bf16.msra.mxu1 %v8108_v62  ;;  %1286 = vmatpush.bf16.msra.mxu2 %v8107_v56 }
 0x122   :  { %1299 = vmatpush.bf16.msra.mxu3 %v8108_v62  ;;  %965 = vmatmul.bf16.vlgmr.msrb.gmra.mxu0 %v6612_v26 }
 0x123   :  { %978 = vmatmul.bf16.vlgmr.msrb.gmra.mxu1 %v6612_v26  ;;  %1013 = vmatpush.bf16.msra.mxu0 %v8109_v38 }
 0x124   :  { %1026 = vmatpush.bf16.msra.mxu1 %v8110_v50  ;;  %1287 = vmatpush.bf16.msra.mxu2 %v8109_v38 }
 0x126   :  { %1300 = vmatpush.bf16.msra.mxu3 %v8110_v50  ;;  %v8122_v50 = vld [vmem:[#allocation15_spill] sm:$0xff] }
 0x127   :  { %1014 = vmatpush.bf16.msra.mxu0 %v8111_v14 }
 0x128   :  { %1027 = vmatpush.bf16.msra.mxu1 %v8112_v36  ;;  %1288 = vmatpush.bf16.msra.mxu2 %v8111_v14 }
 0x12a   :  { %1301 = vmatpush.bf16.msra.mxu3 %v8112_v36 }
 0x12b   :  { %1015 = vmatpush.bf16.msra.mxu0 %v8113_v41 }
 0x12c   :  { %1028 = vmatpush.bf16.msra.mxu1 %v8114_v37  ;;  %1289 = vmatpush.bf16.msra.mxu2 %v8113_v41  ;;  %v8118_v41 = vld [vmem:[#allocation10_spill] sm:$0xff] }
 0x12e   :  { %1302 = vmatpush.bf16.msra.mxu3 %v8114_v37  ;;  %v5592_v37 = vld [vmem:[%s7964_s3 + $0x108] sm:$0xff] }
 0x12f   :  { %1016 = vmatpush.bf16.msra.mxu0 %v8115_v15 }
 0x130   :  { %1029 = vmatpush.bf16.msra.mxu1 %v8116_v18  ;;  %1290 = vmatpush.bf16.msra.mxu2 %v8115_v15 }
 0x132   :  { %1303 = vmatpush.bf16.msra.mxu3 %v8116_v18  ;;  %1017 = vmatmul.bf16.vlgmr.msra.gmra.mxu0 %v6612_v26 }
 0x133   :  { %1030 = vmatmul.bf16.vlgmr.msra.gmra.mxu1 %v6612_v26  ;;  %1202 = vmatpush.bf16.msrb.mxu0 %v5598_v39  ;;  %v5596_v26 = vld [vmem:[%s7964_s3 + $0x128] sm:$0xff] }
 0x134   :  { %1215 = vmatpush.bf16.msrb.mxu1 %v5606_v0 }
 0x137   :  { %1203 = vmatpush.bf16.msrb.mxu0 %v5597_v9 }
 0x138   :  { %1216 = vmatpush.bf16.msrb.mxu1 %v5605_v13 }
 0x13b   :  { %1204 = vmatpush.bf16.msrb.mxu0 %v5596_v26  ;;  %v5594_v26 = vld [vmem:[%s7964_s3 + $0x118] sm:$0xff] }
 0x13c   :  { %1217 = vmatpush.bf16.msrb.mxu1 %v5604_v10  ;;  %v5602_v10 = vld [vmem:[%s7964_s3 + $0x158] sm:$0xff] }
 0x13f   :  { %1205 = vmatpush.bf16.msrb.mxu0 %v5595_v1  ;;  %v5593_v1 = vld [vmem:[%s7964_s3 + $0x110] sm:$0xff] }
 0x140   :  { %1218 = vmatpush.bf16.msrb.mxu1 %v5603_v42  ;;  %v5601_v42 = vld [vmem:[%s7964_s3 + $0x150] sm:$0xff] }
 0x143   :  { %1206 = vmatpush.bf16.msrb.mxu0 %v5594_v26  ;;  %v5600_v26 = vld [vmem:[%s7964_s3 + $0x148] sm:$0xff] }
 0x144   :  { %1219 = vmatpush.bf16.msrb.mxu1 %v5602_v10  ;;  %v5591_v10 = vld [vmem:[%s7964_s3 + $0x100] sm:$0xff] }
 0x147   :  { %1207 = vmatpush.bf16.msrb.mxu0 %v5593_v1  ;;  %v5599_v1 = vld [vmem:[%s7964_s3 + $0x140] sm:$0xff] }
 0x148   :  { %1220 = vmatpush.bf16.msrb.mxu1 %v5601_v42 }
 0x14b   :  { %1208 = vmatpush.bf16.msrb.mxu0 %v5592_v37  ;;  %v8117_v37 = vld [vmem:[#allocation7_spill] sm:$0xff] }
 0x14c   :  { %1221 = vmatpush.bf16.msrb.mxu1 %v5600_v26 }
 0x14f   :  { %1209 = vmatpush.bf16.msrb.mxu0 %v5591_v10  ;;  %v8119_v10 = vld [vmem:[#allocation11_spill] sm:$0xff] }
 0x150   :  { %1222 = vmatpush.bf16.msrb.mxu1 %v5599_v1 }
 0x153   :  { %1257 = vmatpush.bf16.msra.mxu0 %v5820_v8  ;;  %v8120_v8 = vld [vmem:[#allocation13_spill] sm:$0xff] }
 0x154   :  { %1270 = vmatpush.bf16.msra.mxu1 %v5832_v12  ;;  %v8121_v12 = vld [vmem:[#allocation14_spill] sm:$0xff] }
 0x155   :  { %v938_v39 = vpop.f32.mrf.mxu2 }
 0x157   :  { %1258 = vmatpush.bf16.msra.mxu0 %v5859_v21 }
 0x158   :  { %v951_v0 = vpop.f32.mrf.mxu3  ;;  %1271 = vmatpush.bf16.msra.mxu1 %v5870_v25  ;;  %v8123_v25 = vld [vmem:[#allocation16_spill] sm:$0xff] }
 0x15b   :  { %1259 = vmatpush.bf16.msra.mxu0 %v5897_v34 }
 0x15c   :  { %1272 = vmatpush.bf16.msra.mxu1 %v8117_v37 }
 0x15d   :  { %v940_v9 = vpop.f32.mrf.mxu2 }
 0x15f   :  { %1260 = vmatpush.bf16.msra.mxu0 %v8118_v41 }
 0x160   :  { %v953_v13 = vpop.f32.mrf.mxu3  ;;  %1273 = vmatpush.bf16.msra.mxu1 %v8119_v10 }
 0x163   :  { %1261 = vmatpush.bf16.msra.mxu0 %v8120_v8 }
 0x164   :  { %1274 = vmatpush.bf16.msra.mxu1 %v8121_v12 }
 0x165   :  { %v6706_v18 = vpop.f32.mrf.mxu2 }
 0x167   :  { %1262 = vmatpush.bf16.msra.mxu0 %v8122_v50 }
 0x168   :  { %v6708_v15 = vpop.f32.mrf.mxu3  ;;  %1275 = vmatpush.bf16.msra.mxu1 %v8123_v25 }
 0x16b   :  { %1263 = vmatpush.bf16.msra.mxu0 %v6047_v28 }
 0x16c   :  { %1276 = vmatpush.bf16.msra.mxu1 %v6059_v35 }
 0x16d   :  { %v994_v9 = vpop.f32.mrf.mxu2 }
 0x16f   :  { %1264 = vmatpush.bf16.msra.mxu0 %v6095_v52 }
 0x170   :  { %v1007_v13 = vpop.f32.mrf.mxu3  ;;  %1277 = vmatpush.bf16.msra.mxu1 %v6104_v55 }
 0x175   :  { %v1044_v42 = vpop.f32.mrf.mxu2 }
 0x178   :  { %v1057_v9 = vpop.f32.mrf.mxu3 }
 0x179   :  { %v1064_v35 = vmax.f32 %v6708_v15, %v1057_v9  ;;  %v5619_v15 = vld [vmem:[%s7964_s3 + $0x1e0] sm:$0xff]  ;;  %v8127_v9 = vld [vmem:[#allocation12_spill] sm:$0xff] }
 0x17d   :  { %v1046_v13 = vpop.f32.mrf.mxu2 }
 0x17e   :  { %v6749_v13 = vld [vmem:[%s7963_s0 + $0xc] sm:$0xf] }
 0x17f   :  { %1239 = vmatmul.bf16.vlgmr.msrb.gmra.mxu2 %v6749_v13  ;;  %1252 = vmatmul.bf16.vlgmr.msrb.gmra.mxu3 %v6749_v13 }
 0x180   :  { %v1059_v26 = vpop.f32.mrf.mxu3 }
 0x18f   :  { %v816_v1 = vpop.f32.mrf.mxu0  ;;  %1291 = vmatmul.bf16.vlgmr.msra.gmra.mxu2 %v6749_v13  ;;  %1304 = vmatmul.bf16.vlgmr.msra.gmra.mxu3 %v6749_v13 }
 0x190   :  { %v829_v36 = vpop.f32.mrf.mxu1 }
 0x191   :  { %v830_v14 = vadd.f32 %v829_v36, %v816_v1 }
 0x193   :  { %v939_v21 = vadd.f32 %v938_v39, %v830_v14 }
 0x195   :  { %v6753_v26 = vadd.f32 %v951_v0, %v939_v21 }
 0x197   :  { %8124 = vst [vmem:[#allocation25_spill] sm:$0xff] %v6753_v26  ;;  %v818_v8 = vpop.f32.mrf.mxu0 }
 0x198   :  { %v831_v14 = vpop.f32.mrf.mxu1  ;;  %v1063_v8 = vmax.f32 %v6706_v18, %v1044_v42  ;;  %v8125_v18 = vld [vmem:[#allocation8_spill] sm:$0xff]  ;;  %v8126_v42 = vld [vmem:[#allocation9_spill] sm:$0xff] }
 0x19f   :  { %v966_v36 = vpop.f32.mrf.mxu0 }
 0x1a0   :  { %v979_v39 = vpop.f32.mrf.mxu1 }
 0x1a7   :  { %v968_v1 = vpop.f32.mrf.mxu0 }
 0x1a8   :  { %v981_v25 = vpop.f32.mrf.mxu1 }
 0x1af   :  { %v1018_v21 = vpop.f32.mrf.mxu0 }
 0x1b0   :  { %v1061_v0 = vmax.f32 %v966_v36, %v1018_v21  ;;  %v1031_v28 = vpop.f32.mrf.mxu1  ;;  %v8132_v36 = vld [vmem:[#allocation36_spill] sm:$0xff]  ;;  %v8134_v21 = vld [vmem:[#allocation38_spill] sm:$0xff] }
 0x1b1   :  { %v1062_v14 = vmax.f32 %v979_v39, %v1031_v28  ;;  %v5614_v28 = vld [vmem:[%s7964_s3 + $0x1b8] sm:$0xff] }
 0x1b2   :  { %v1065_v50 = vmax.f32 %v1061_v0, %v1063_v8  ;;  %1476 = vmatpush.bf16.msrb.mxu2 %v5614_v28  ;;  %v8133_v39 = vld [vmem:[#allocation37_spill] sm:$0xff]  ;;  %v5617_v28 = vld [vmem:[%s7964_s3 + $0x1d0] sm:$0xff] }
 0x1b3   :  { %v1066_v52 = vmax.f32 %v1062_v14, %v1064_v35  ;;  %v5622_v35 = vld [vmem:[%s7964_s3 + $0x1f8] sm:$0xff] }
 0x1b4   :  { %v1067_v55 = vadd.f32 %v1065_v50, %v6562_v58  ;;  %1489 = vmatpush.bf16.msrb.mxu3 %v5622_v35  ;;  %v5620_v50 = vld [vmem:[%s7964_s3 + $0x1e8] sm:$0xff]  ;;  %v5610_v14 = vld [vmem:[%s7964_s3 + $0x198] sm:$0xff] }
 0x1b5   :  { %v1068_v26 = vadd.f32 %v1066_v52, %v6566_v46  ;;  %v5621_v52 = vld [vmem:[%s7964_s3 + $0x1f0] sm:$0xff] }
 0x1b6   :  { %v1069_v12 = vmax.f32 %v1067_v55, 0.0  ;;  %v5612_v55 = vld [vmem:[%s7964_s3 + $0x1a8] sm:$0xff] }
 0x1b7   :  { %v1070_v10 = vmax.f32 %v1068_v26, 0.0  ;;  %v1020_v41 = vpop.f32.mrf.mxu0  ;;  %v8131_v26 = vld [vmem:[#allocation35_spill] sm:$0xff] }
 0x1b8   :  { %v1071_v37 = vpack.c.bf16 %v1069_v12, %v1069_v12  ;;  %v1033_v1 = vpop.f32.mrf.mxu1  ;;  %v5613_v12 = vld [vmem:[%s7964_s3 + $0x1b0] sm:$0xff]  ;;  %1490 = vmatpush.bf16.msrb.mxu3 %v5621_v52  ;;  %v5611_v41 = vld [vmem:[%s7964_s3 + $0x1a0] sm:$0xff]  ;;  %v5608_v52 = vld [vmem:[%s7964_s3 + $0x188] sm:$0xff] }
 0x1b9   :  { %v1072_v25 = vpack.c.bf16 %v1070_v10, %v1070_v10  ;;  %1477 = vmatpush.bf16.msrb.mxu2 %v5613_v12  ;;  %v8129_v10 = vld [vmem:[#allocation31_spill] sm:$0xff]  ;;  %v5618_v1 = vld [vmem:[%s7964_s3 + $0x1d8] sm:$0xff] }
 0x1ba   :  { %1210 = vmatmul.bf16.vlgmr.msrb.gmra.mxu0 %v1071_v37  ;;  %v8128_v37 = vld [vmem:[#allocation28_spill] sm:$0xff] }
 0x1bb   :  { %1223 = vmatmul.bf16.vlgmr.msrb.gmra.mxu1 %v1072_v25  ;;  %1309 = vmatpush.bf16.msrb.mxu0 %v6110_v61  ;;  %v5609_v25 = vld [vmem:[%s7964_s3 + $0x190] sm:$0xff] }
 0x1bc   :  { %1322 = vmatpush.bf16.msrb.mxu1 %v6122_v2  ;;  %1491 = vmatpush.bf16.msrb.mxu3 %v5620_v50  ;;  %v5607_v50 = vld [vmem:[%s7964_s3 + $0x180] sm:$0xff] }
 0x1bd   :  { %1478 = vmatpush.bf16.msrb.mxu2 %v5612_v55  ;;  %v5616_v55 = vld [vmem:[%s7964_s3 + $0x1c8] sm:$0xff] }
 0x1bf   :  { %1310 = vmatpush.bf16.msrb.mxu0 %v6154_v22 }
 0x1c0   :  { %1323 = vmatpush.bf16.msrb.mxu1 %v6166_v31  ;;  %1492 = vmatpush.bf16.msrb.mxu3 %v5619_v15  ;;  %v8135_v15 = vld [vmem:[#allocation2_spill] sm:$0xff] }
 0x1c1   :  { %1479 = vmatpush.bf16.msrb.mxu2 %v5611_v41  ;;  %v5615_v41 = vld [vmem:[%s7964_s3 + $0x1c0] sm:$0xff] }
 0x1c3   :  { %1311 = vmatpush.bf16.msrb.mxu0 %v6194_v47 }
 0x1c4   :  { %1324 = vmatpush.bf16.msrb.mxu1 %v6206_v54  ;;  %1493 = vmatpush.bf16.msrb.mxu3 %v5618_v1 }
 0x1c5   :  { %1480 = vmatpush.bf16.msrb.mxu2 %v5610_v14  ;;  %v8136_v14 = vld [vmem:[#allocation3_spill] sm:$0xff] }
 0x1c7   :  { %1312 = vmatpush.bf16.msrb.mxu0 %v8096_v49 }
 0x1c8   :  { %1325 = vmatpush.bf16.msrb.mxu1 %v8097_v53  ;;  %1494 = vmatpush.bf16.msrb.mxu3 %v5617_v28  ;;  %v8137_v28 = vld [vmem:[#allocation4_spill] sm:$0xff] }
 0x1c9   :  { %1481 = vmatpush.bf16.msrb.mxu2 %v5609_v25 }
 0x1ca   :  { %1265 = vmatmul.bf16.vlgmr.msra.gmra.mxu0 %v6749_v13 }
 0x1cb   :  { %1278 = vmatmul.bf16.vlgmr.msra.gmra.mxu1 %v6749_v13  ;;  %1313 = vmatpush.bf16.msrb.mxu0 %v8100_v4 }
 0x1cc   :  { %1326 = vmatpush.bf16.msrb.mxu1 %v8101_v24  ;;  %1495 = vmatpush.bf16.msrb.mxu3 %v5616_v55 }
 0x1cd   :  { %1482 = vmatpush.bf16.msrb.mxu2 %v5608_v52 }
 0x1cf   :  { %1314 = vmatpush.bf16.msrb.mxu0 %v8103_v30 }
 0x1d0   :  { %1327 = vmatpush.bf16.msrb.mxu1 %v8104_v11  ;;  %1496 = vmatpush.bf16.msrb.mxu3 %v5615_v41 }
 0x1d1   :  { %1483 = vmatpush.bf16.msrb.mxu2 %v5607_v50  ;;  %v8141_v50 = vld [vmem:[#allocation11_spill] sm:$0xff] }
 0x1d3   :  { %1315 = vmatpush.bf16.msrb.mxu0 %v6338_v63 }
 0x1d4   :  { %1328 = vmatpush.bf16.msrb.mxu1 %v6350_v32  ;;  %1544 = vmatpush.bf16.msra.mxu3 %v8136_v14  ;;  %v8143_v14 = vld [vmem:[#allocation14_spill] sm:$0xff] }
 0x1d5   :  { %1531 = vmatpush.bf16.msra.mxu2 %v8135_v15  ;;  %v8142_v15 = vld [vmem:[#allocation13_spill] sm:$0xff] }
 0x1d7   :  { %1316 = vmatpush.bf16.msrb.mxu0 %v6374_v48 }
 0x1d8   :  { %1329 = vmatpush.bf16.msrb.mxu1 %v6377_v40 }
 0x1d9   :  { %1532 = vmatpush.bf16.msra.mxu2 %v8137_v28  ;;  %v8144_v28 = vld [vmem:[#allocation25_spill] sm:$0xff] }
 0x1da   :  { %1317 = vmatmul.bf16.vlgmr.msrb.gmra.mxu0 %v6749_v13 }
 0x1db   :  { %1505 = vmatpush.bf16.msra.mxu0 %v5807_v3  ;;  %1330 = vmatmul.bf16.vlgmr.msrb.gmra.mxu1 %v6749_v13  ;;  %v8130_v13 = vld [vmem:[#allocation32_spill] sm:$0xff] }
 0x1dc   :  { %1518 = vmatpush.bf16.msra.mxu1 %v5818_v7 }
 0x1dd   :  { %1533 = vmatpush.bf16.msra.mxu2 %v5897_v34  ;;  %v8147_v34 = vld [vmem:[#allocation16_spill] sm:$0xff] }
 0x1df   :  { %1506 = vmatpush.bf16.msra.mxu0 %v5845_v16 }
 0x1e0   :  { %1519 = vmatpush.bf16.msra.mxu1 %v5847_v17 }
 0x1e3   :  { %1507 = vmatpush.bf16.msra.mxu0 %v5882_v29 }
 0x1e4   :  { %1520 = vmatpush.bf16.msra.mxu1 %v5895_v33 }
 0x1e7   :  { %1508 = vmatpush.bf16.msra.mxu0 %v8125_v18 }
 0x1e8   :  { %1521 = vmatpush.bf16.msra.mxu1 %v8126_v42 }
 0x1eb   :  { %1509 = vmatpush.bf16.msra.mxu0 %v8127_v9 }
 0x1ec   :  { %1522 = vmatpush.bf16.msra.mxu1 %v5967_v57 }
 0x1ef   :  { %1510 = vmatpush.bf16.msra.mxu0 %v5999_v5 }
 0x1f0   :  { %1523 = vmatpush.bf16.msra.mxu1 %v6003_v6 }
 0x1f3   :  { %1511 = vmatpush.bf16.msra.mxu0 %v6035_v23 }
 0x1f4   :  { %1524 = vmatpush.bf16.msra.mxu1 %v6045_v27 }
 0x1f7   :  { %1512 = vmatpush.bf16.msra.mxu0 %v6080_v43 }
 0x1f8   :  { %1525 = vmatpush.bf16.msra.mxu1 %v6093_v51 }
 0x1fb   :  { %1557 = vmatpush.bf16.msrb.mxu0 %v6106_v59 }
 0x1fc   :  { %1570 = vmatpush.bf16.msrb.mxu1 %v6108_v60 }
 0x1ff   :  { %1558 = vmatpush.bf16.msrb.mxu0 %v6148_v19 }
 0x200   :  { %1571 = vmatpush.bf16.msrb.mxu1 %v6152_v20 }
 0x202   :  { %v1240_v8 = vpop.f32.mrf.mxu2  ;;  %v1253_v0 = vpop.f32.mrf.mxu3 }
 0x203   :  { %1559 = vmatpush.bf16.msrb.mxu0 %v8105_v44 }
 0x204   :  { %1572 = vmatpush.bf16.msrb.mxu1 %v8106_v45 }
 0x207   :  { %1560 = vmatpush.bf16.msrb.mxu0 %v8107_v56 }
 0x208   :  { %1573 = vmatpush.bf16.msrb.mxu1 %v8108_v62 }
 0x20a   :  { %v1242_v35 = vpop.f32.mrf.mxu2  ;;  %v1255_v12 = vpop.f32.mrf.mxu3 }
 0x20b   :  { %1561 = vmatpush.bf16.msrb.mxu0 %v8109_v38  ;;  %v8138_v35 = vld [vmem:[#allocation5_spill] sm:$0xff]  ;;  %v8139_v12 = vld [vmem:[#allocation7_spill] sm:$0xff] }
 0x20c   :  { %1574 = vmatpush.bf16.msrb.mxu1 %v8128_v37  ;;  %1545 = vmatpush.bf16.msra.mxu3 %v8138_v35  ;;  %v8146_v35 = vld [vmem:[#allocation15_spill] sm:$0xff] }
 0x20f   :  { %1562 = vmatpush.bf16.msrb.mxu0 %v8129_v10 }
 0x210   :  { %1575 = vmatpush.bf16.msrb.mxu1 %v8130_v13  ;;  %1546 = vmatpush.bf16.msra.mxu3 %v8139_v12  ;;  %v8150_v12 = vld [vmem:[#allocation19_spill] sm:$0xff] }
 0x212   :  { %v1292_v1 = vpop.f32.mrf.mxu2  ;;  %v1305_v25 = vpop.f32.mrf.mxu3 }
 0x213   :  { %1563 = vmatpush.bf16.msrb.mxu0 %v8131_v26 }
 0x214   :  { %1576 = vmatpush.bf16.msrb.mxu1 %v8132_v36  ;;  %1547 = vmatpush.bf16.msra.mxu3 %v8141_v50 }
 0x217   :  { %1564 = vmatpush.bf16.msrb.mxu0 %v8133_v39 }
 0x218   :  { %1577 = vmatpush.bf16.msrb.mxu1 %v8134_v21  ;;  %v8140_v21 = vld [vmem:[#allocation10_spill] sm:$0xff]  ;;  %1548 = vmatpush.bf16.msra.mxu3 %v8143_v14 }
 0x219   :  { %1534 = vmatpush.bf16.msra.mxu2 %v8140_v21  ;;  %v8149_v21 = vld [vmem:[#allocation18_spill] sm:$0xff] }
 0x21a   :  { %v1294_v52 = vpop.f32.mrf.mxu2  ;;  %v1307_v55 = vpop.f32.mrf.mxu3 }
 0x21b   :  { %v8148_v55 = vld [vmem:[#allocation17_spill] sm:$0xff] }
 0x21c   :  { %1549 = vmatpush.bf16.msra.mxu3 %v8147_v34 }
 0x21d   :  { %1535 = vmatpush.bf16.msra.mxu2 %v8142_v15  ;;  %v8151_v15 = vld [vmem:[#allocation20_spill] sm:$0xff] }
 0x220   :  { %1550 = vmatpush.bf16.msra.mxu3 %v8149_v21  ;;  %v1336_v21 = vmax.f32 %v1253_v0, %v1305_v25  ;;  %v8153_v0 = vld [vmem:[#allocation27_spill] sm:$0xff] }
 0x221   :  { %1536 = vmatpush.bf16.msra.mxu2 %v8146_v35  ;;  %v8157_v25 = vld [vmem:[#allocation35_spill] sm:$0xff] }
 0x224   :  { %1551 = vmatpush.bf16.msra.mxu3 %v8151_v15 }
 0x225   :  { %1537 = vmatpush.bf16.msra.mxu2 %v8148_v55 }
 0x229   :  { %1538 = vmatpush.bf16.msra.mxu2 %v8150_v12 }
 0x237   :  { %v1211_v41 = vpop.f32.mrf.mxu0 }
 0x238   :  { %v1224_v39 = vpop.f32.mrf.mxu1 }
 0x239   :  { %v1225_v36 = vadd.f32 %v1224_v39, %v1211_v41 }
 0x23b   :  { %v6876_v26 = vadd.f32 %v1225_v36, %v8144_v28  ;;  %v4622_v36 = vld [vmem:[%s7963_s0 + $0x10] sm:$0xf] }
 0x23c   :  { %1513 = vmatmul.bf16.vlgmr.msra.gmra.mxu0 %v4622_v36  ;;  %1526 = vmatmul.bf16.vlgmr.msra.gmra.mxu1 %v4622_v36 }
 0x23d   :  { %8145 = vst [vmem:[#allocation26_spill] sm:$0xff] %v6876_v26 }
 0x23f   :  { %v1213_v52 = vpop.f32.mrf.mxu0 }
 0x240   :  { %v1226_v50 = vpop.f32.mrf.mxu1  ;;  %v1335_v52 = vmax.f32 %v1240_v8, %v1292_v1  ;;  %v8152_v8 = vld [vmem:[#allocation24_spill] sm:$0xff] }
 0x241   :  { %v8156_v1 = vld [vmem:[#allocation32_spill] sm:$0xff] }
 0x247   :  { %v1266_v14 = vpop.f32.mrf.mxu0 }
 0x248   :  { %v1279_v13 = vpop.f32.mrf.mxu1 }
 0x24c   :  { %1565 = vmatmul.bf16.vlgmr.msrb.gmra.mxu0 %v4622_v36  ;;  %1578 = vmatmul.bf16.vlgmr.msrb.gmra.mxu1 %v4622_v36 }
 0x24f   :  { %v1268_v39 = vpop.f32.mrf.mxu0 }
 0x250   :  { %v1281_v28 = vpop.f32.mrf.mxu1 }
 0x257   :  { %v1318_v41 = vpop.f32.mrf.mxu0 }
 0x258   :  { %v1337_v55 = vmax.f32 %v1266_v14, %v1318_v41  ;;  %v1331_v34 = vpop.f32.mrf.mxu1  ;;  %v8155_v14 = vld [vmem:[#allocation31_spill] sm:$0xff] }
 0x259   :  { %v1338_v50 = vmax.f32 %v1279_v13, %v1331_v34  ;;  %v5630_v34 = vld [vmem:[%s7964_s3 + $0x238] sm:$0xff] }
 0x25a   :  { %v1339_v12 = vmax.f32 %v1335_v52, %v1337_v55  ;;  %v5638_v13 = vld [vmem:[%s7964_s3 + $0x278] sm:$0xff]  ;;  %1750 = vmatpush.bf16.msra.mxu0 %v5630_v34  ;;  %v8160_v55 = vld [vmem:[#allocation38_spill] sm:$0xff] }
 0x25b   :  { %v1340_v15 = vmax.f32 %v1336_v21, %v1338_v50  ;;  %1763 = vmatpush.bf16.msra.mxu1 %v5638_v13  ;;  %v5635_v21 = vld [vmem:[%s7964_s3 + $0x260] sm:$0xff]  ;;  %v5626_v52 = vld [vmem:[%s7964_s3 + $0x218] sm:$0xff] }
 0x25c   :  { %v1341_v35 = vadd.f32 %v1339_v12, %v6562_v58  ;;  %v8159_v12 = vld [vmem:[#allocation37_spill] sm:$0xff] }
 0x25d   :  { %v1342_v26 = vadd.f32 %v1340_v15, %v6566_v46  ;;  %v8154_v15 = vld [vmem:[#allocation28_spill] sm:$0xff]  ;;  %v5634_v50 = vld [vmem:[%s7964_s3 + $0x258] sm:$0xff] }
 0x25e   :  { %v1343_v10 = vmax.f32 %v1341_v35, 0.0  ;;  %v8158_v35 = vld [vmem:[#allocation36_spill] sm:$0xff] }
 0x25f   :  { %v1344_v37 = vmax.f32 %v1342_v26, 0.0  ;;  %v1320_v38 = vpop.f32.mrf.mxu0  ;;  %v5627_v26 = vld [vmem:[%s7964_s3 + $0x220] sm:$0xff] }
 0x260   :  { %v1345_v62 = vpack.c.bf16 %v1343_v10, %v1343_v10  ;;  %v1333_v39 = vpop.f32.mrf.mxu1  ;;  %v5629_v38 = vld [vmem:[%s7964_s3 + $0x230] sm:$0xff]  ;;  %v5636_v10 = vld [vmem:[%s7964_s3 + $0x268] sm:$0xff] }
 0x261   :  { %v1346_v28 = vpack.c.bf16 %v1344_v37, %v1344_v37  ;;  %1751 = vmatpush.bf16.msra.mxu0 %v5629_v38  ;;  %v5628_v37 = vld [vmem:[%s7964_s3 + $0x228] sm:$0xff]  ;;  %v5625_v39 = vld [vmem:[%s7964_s3 + $0x210] sm:$0xff] }
 0x262   :  { %1484 = vmatmul.bf16.vlgmr.msrb.gmra.mxu2 %v1345_v62  ;;  %v5637_v62 = vld [vmem:[%s7964_s3 + $0x270] sm:$0xff]  ;;  %v5624_v38 = vld [vmem:[%s7964_s3 + $0x208] sm:$0xff] }
 0x263   :  { %1497 = vmatmul.bf16.vlgmr.msrb.gmra.mxu3 %v1346_v28  ;;  %1583 = vmatpush.bf16.msrb.mxu2 %v6110_v61  ;;  %v5633_v28 = vld [vmem:[%s7964_s3 + $0x250] sm:$0xff] }
 0x264   :  { %1596 = vmatpush.bf16.msrb.mxu3 %v6122_v2  ;;  %1764 = vmatpush.bf16.msra.mxu1 %v5637_v62  ;;  %v5632_v62 = vld [vmem:[%s7964_s3 + $0x248] sm:$0xff] }
 0x265   :  { %1752 = vmatpush.bf16.msra.mxu0 %v5628_v37  ;;  %v5623_v37 = vld [vmem:[%s7964_s3 + $0x200] sm:$0xff] }
 0x267   :  { %1584 = vmatpush.bf16.msrb.mxu2 %v6154_v22 }
 0x268   :  { %1597 = vmatpush.bf16.msrb.mxu3 %v6166_v31  ;;  %1765 = vmatpush.bf16.msra.mxu1 %v5636_v10  ;;  %v5631_v10 = vld [vmem:[%s7964_s3 + $0x240] sm:$0xff] }
 0x269   :  { %1753 = vmatpush.bf16.msra.mxu0 %v5627_v26  ;;  %v8161_v26 = vld [vmem:[#allocation2_spill] sm:$0xff] }
 0x26b   :  { %1585 = vmatpush.bf16.msrb.mxu2 %v6194_v47 }
 0x26c   :  { %1598 = vmatpush.bf16.msrb.mxu3 %v6206_v54  ;;  %1766 = vmatpush.bf16.msra.mxu1 %v5635_v21  ;;  %v8162_v21 = vld [vmem:[#allocation3_spill] sm:$0xff] }
 0x26d   :  { %1754 = vmatpush.bf16.msra.mxu0 %v5626_v52 }
 0x26f   :  { %1586 = vmatpush.bf16.msrb.mxu2 %v8096_v49 }
 0x270   :  { %1599 = vmatpush.bf16.msrb.mxu3 %v8097_v53  ;;  %1767 = vmatpush.bf16.msra.mxu1 %v5634_v50 }
 0x271   :  { %1755 = vmatpush.bf16.msra.mxu0 %v5625_v39  ;;  %v8163_v39 = vld [vmem:[#allocation4_spill] sm:$0xff] }
 0x272   :  { %1539 = vmatmul.bf16.vlgmr.msra.gmra.mxu2 %v4622_v36 }
 0x273   :  { %1552 = vmatmul.bf16.vlgmr.msra.gmra.mxu3 %v4622_v36  ;;  %1587 = vmatpush.bf16.msrb.mxu2 %v8100_v4 }
 0x274   :  { %1600 = vmatpush.bf16.msrb.mxu3 %v8101_v24  ;;  %1768 = vmatpush.bf16.msra.mxu1 %v5633_v28  ;;  %v8164_v28 = vld [vmem:[#allocation5_spill] sm:$0xff] }
 0x275   :  { %1756 = vmatpush.bf16.msra.mxu0 %v5624_v38 }
 0x277   :  { %1588 = vmatpush.bf16.msrb.mxu2 %v8103_v30 }
 0x278   :  { %1601 = vmatpush.bf16.msrb.mxu3 %v8104_v11  ;;  %1769 = vmatpush.bf16.msra.mxu1 %v5632_v62 }
 0x279   :  { %1757 = vmatpush.bf16.msra.mxu0 %v5623_v37  ;;  %v8168_v37 = vld [vmem:[#allocation11_spill] sm:$0xff] }
 0x27b   :  { %1589 = vmatpush.bf16.msrb.mxu2 %v6338_v63 }
 0x27c   :  { %1602 = vmatpush.bf16.msrb.mxu3 %v6350_v32  ;;  %1770 = vmatpush.bf16.msra.mxu1 %v5631_v10 }
 0x27d   :  { %1805 = vmatpush.bf16.msrb.mxu0 %v8161_v26  ;;  %v8169_v26 = vld [vmem:[#allocation13_spill] sm:$0xff] }
 0x27f   :  { %1590 = vmatpush.bf16.msrb.mxu2 %v6374_v48 }
 0x280   :  { %1603 = vmatpush.bf16.msrb.mxu3 %v6377_v40  ;;  %1818 = vmatpush.bf16.msrb.mxu1 %v8162_v21  ;;  %v8170_v21 = vld [vmem:[#allocation14_spill] sm:$0xff] }
 0x281   :  { %1806 = vmatpush.bf16.msrb.mxu0 %v8163_v39  ;;  %v8171_v39 = vld [vmem:[#allocation26_spill] sm:$0xff] }
 0x282   :  { %1591 = vmatmul.bf16.vlgmr.msrb.gmra.mxu2 %v4622_v36 }
 0x283   :  { %1779 = vmatpush.bf16.msra.mxu2 %v5807_v3  ;;  %1604 = vmatmul.bf16.vlgmr.msrb.gmra.mxu3 %v4622_v36 }
 0x284   :  { %1792 = vmatpush.bf16.msra.mxu3 %v5818_v7  ;;  %1819 = vmatpush.bf16.msrb.mxu1 %v8164_v28  ;;  %v8173_v28 = vld [vmem:[#allocation15_spill] sm:$0xff] }
 0x287   :  { %1780 = vmatpush.bf16.msra.mxu2 %v5845_v16 }
 0x288   :  { %1793 = vmatpush.bf16.msra.mxu3 %v5847_v17 }
 0x28b   :  { %1781 = vmatpush.bf16.msra.mxu2 %v5882_v29 }
 0x28c   :  { %1794 = vmatpush.bf16.msra.mxu3 %v5895_v33 }
 0x28f   :  { %1782 = vmatpush.bf16.msra.mxu2 %v8125_v18 }
 0x290   :  { %1795 = vmatpush.bf16.msra.mxu3 %v8126_v42 }
 0x293   :  { %1783 = vmatpush.bf16.msra.mxu2 %v8127_v9 }
 0x294   :  { %1796 = vmatpush.bf16.msra.mxu3 %v5967_v57 }
 0x297   :  { %1784 = vmatpush.bf16.msra.mxu2 %v5999_v5 }
 0x298   :  { %1797 = vmatpush.bf16.msra.mxu3 %v6003_v6 }
 0x29b   :  { %1785 = vmatpush.bf16.msra.mxu2 %v6035_v23 }
 0x29c   :  { %1798 = vmatpush.bf16.msra.mxu3 %v6045_v27 }
 0x29f   :  { %1786 = vmatpush.bf16.msra.mxu2 %v6080_v43 }
 0x2a0   :  { %1799 = vmatpush.bf16.msra.mxu3 %v6093_v51 }
 0x2a3   :  { %1831 = vmatpush.bf16.msrb.mxu2 %v6106_v59 }
 0x2a4   :  { %1844 = vmatpush.bf16.msrb.mxu3 %v6108_v60 }
 0x2a7   :  { %1832 = vmatpush.bf16.msrb.mxu2 %v6148_v19 }
 0x2a8   :  { %1845 = vmatpush.bf16.msrb.mxu3 %v6152_v20 }
 0x2ab   :  { %1833 = vmatpush.bf16.msrb.mxu2 %v8105_v44 }
 0x2ac   :  { %1846 = vmatpush.bf16.msrb.mxu3 %v8106_v45 }
 0x2af   :  { %1834 = vmatpush.bf16.msrb.mxu2 %v8107_v56 }
 0x2b0   :  { %1847 = vmatpush.bf16.msrb.mxu3 %v8152_v8 }
 0x2b3   :  { %1835 = vmatpush.bf16.msrb.mxu2 %v8153_v0 }
 0x2b4   :  { %1848 = vmatpush.bf16.msrb.mxu3 %v8154_v15 }
 0x2b7   :  { %1836 = vmatpush.bf16.msrb.mxu2 %v8155_v14 }
 0x2b8   :  { %1849 = vmatpush.bf16.msrb.mxu3 %v8156_v1 }
 0x2b9   :  { %v1514_v36 = vpop.f32.mrf.mxu0  ;;  %v1527_v41 = vpop.f32.mrf.mxu1 }
 0x2bb   :  { %1837 = vmatpush.bf16.msrb.mxu2 %v8157_v25 }
 0x2bc   :  { %1850 = vmatpush.bf16.msrb.mxu3 %v8158_v35 }
 0x2bf   :  { %1838 = vmatpush.bf16.msrb.mxu2 %v8159_v12 }
 0x2c0   :  { %1851 = vmatpush.bf16.msrb.mxu3 %v8160_v55  ;;  %v8167_v55 = vld [vmem:[#allocation10_spill] sm:$0xff] }
 0x2c1   :  { %v1516_v34 = vpop.f32.mrf.mxu0  ;;  %v1529_v13 = vpop.f32.mrf.mxu1 }
 0x2c2   :  { %v8165_v34 = vld [vmem:[#allocation6_spill] sm:$0xff]  ;;  %v8166_v13 = vld [vmem:[#allocation7_spill] sm:$0xff] }
 0x2c3   :  { %1807 = vmatpush.bf16.msrb.mxu0 %v8165_v34  ;;  %1820 = vmatpush.bf16.msrb.mxu1 %v8166_v13  ;;  %v8174_v34 = vld [vmem:[#allocation16_spill] sm:$0xff] }
 0x2c7   :  { %1808 = vmatpush.bf16.msrb.mxu0 %v8167_v55  ;;  %1821 = vmatpush.bf16.msrb.mxu1 %v8168_v37 }
 0x2c9   :  { %v1566_v52 = vpop.f32.mrf.mxu0  ;;  %v1579_v50 = vpop.f32.mrf.mxu1 }
 0x2ca   :  { %v1609_v55 = vmax.f32 %v1514_v36, %v1566_v52  ;;  %v8180_v36 = vld [vmem:[#allocation23_spill] sm:$0xff] }
 0x2cb   :  { %1809 = vmatpush.bf16.msrb.mxu0 %v8169_v26  ;;  %1822 = vmatpush.bf16.msrb.mxu1 %v8170_v21  ;;  %v8175_v21 = vld [vmem:[#allocation17_spill] sm:$0xff]  ;;  %v8184_v52 = vld [vmem:[#allocation31_spill] sm:$0xff] }
 0x2cf   :  { %1810 = vmatpush.bf16.msrb.mxu0 %v8173_v28  ;;  %1823 = vmatpush.bf16.msrb.mxu1 %v8174_v34 }
 0x2d1   :  { %v1568_v38 = vpop.f32.mrf.mxu0  ;;  %v1581_v62 = vpop.f32.mrf.mxu1 }
 0x2d2   :  { %v7003_v38 = vld [vmem:[%s7963_s0 + $0x14] sm:$0xf] }
 0x2d3   :  { %1787 = vmatmul.bf16.vlgmr.msra.gmra.mxu2 %v7003_v38  ;;  %1800 = vmatmul.bf16.vlgmr.msra.gmra.mxu3 %v7003_v38 }
 0x2d4   :  { %1811 = vmatpush.bf16.msrb.mxu0 %v8175_v21  ;;  %v1610_v21 = vmax.f32 %v1527_v41, %v1579_v50  ;;  %v8181_v41 = vld [vmem:[#allocation24_spill] sm:$0xff] }
 0x2d5   :  { %v8185_v50 = vld [vmem:[#allocation32_spill] sm:$0xff] }
 0x2e3   :  { %1839 = vmatmul.bf16.vlgmr.msrb.gmra.mxu2 %v7003_v38  ;;  %1852 = vmatmul.bf16.vlgmr.msrb.gmra.mxu3 %v7003_v38 }
 0x2e5   :  { %v1485_v10 = vpop.f32.mrf.mxu2 }
 0x2e6   :  { %v1498_v12 = vpop.f32.mrf.mxu3 }
 0x2e7   :  { %v1499_v35 = vadd.f32 %v1498_v12, %v1485_v10  ;;  %v8176_v12 = vld [vmem:[#allocation18_spill] sm:$0xff]  ;;  %v8178_v10 = vld [vmem:[#allocation20_spill] sm:$0xff] }
 0x2e8   :  { %1824 = vmatpush.bf16.msrb.mxu1 %v8176_v12 }
 0x2e9   :  { %v6996_v25 = vadd.f32 %v1499_v35, %v8171_v39  ;;  %v8177_v39 = vld [vmem:[#allocation19_spill] sm:$0xff] }
 0x2ea   :  { %1812 = vmatpush.bf16.msrb.mxu0 %v8177_v39 }
 0x2eb   :  { %8172 = vst [vmem:[#allocation29_spill] sm:$0xff] %v6996_v25 }
 0x2ec   :  { %1825 = vmatpush.bf16.msrb.mxu1 %v8178_v10 }
 0x2ed   :  { %v1487_v62 = vpop.f32.mrf.mxu2 }
 0x2ee   :  { %v1500_v35 = vpop.f32.mrf.mxu3 }
 0x2f5   :  { %v1540_v34 = vpop.f32.mrf.mxu2 }
 0x2f6   :  { %v1553_v28 = vpop.f32.mrf.mxu3 }
 0x2fd   :  { %v1542_v25 = vpop.f32.mrf.mxu2 }
 0x2fe   :  { %v1555_v26 = vpop.f32.mrf.mxu3  ;;  %v5646_v25 = vld [vmem:[%s7964_s3 + $0x2b8] sm:$0xff] }
 0x2ff   :  { %2024 = vmatpush.bf16.msra.mxu2 %v5646_v25  ;;  %v8182_v26 = vld [vmem:[#allocation27_spill] sm:$0xff] }
 0x305   :  { %v1592_v37 = vpop.f32.mrf.mxu2 }
 0x306   :  { %v1611_v62 = vmax.f32 %v1540_v34, %v1592_v37  ;;  %v1605_v13 = vpop.f32.mrf.mxu3  ;;  %v8187_v34 = vld [vmem:[#allocation36_spill] sm:$0xff]  ;;  %v8189_v37 = vld [vmem:[#allocation38_spill] sm:$0xff] }
 0x307   :  { %v1612_v1 = vmax.f32 %v1553_v28, %v1605_v13  ;;  %v8186_v28 = vld [vmem:[#allocation35_spill] sm:$0xff]  ;;  %v8188_v13 = vld [vmem:[#allocation37_spill] sm:$0xff] }
 0x308   :  { %v1613_v12 = vmax.f32 %v1609_v55, %v1611_v62  ;;  %v8179_v55 = vld [vmem:[#allocation22_spill] sm:$0xff]  ;;  %v5641_v62 = vld [vmem:[%s7964_s3 + $0x290] sm:$0xff] }
 0x309   :  { %v1614_v35 = vmax.f32 %v1610_v21, %v1612_v1  ;;  %v5654_v1 = vld [vmem:[%s7964_s3 + $0x2f8] sm:$0xff]  ;;  %v8183_v21 = vld [vmem:[#allocation28_spill] sm:$0xff] }
 0x30a   :  { %v1615_v39 = vadd.f32 %v1613_v12, %v6562_v58  ;;  %2037 = vmatpush.bf16.msra.mxu3 %v5654_v1 }
 0x30b   :  { %v1616_v10 = vadd.f32 %v1614_v35, %v6566_v46  ;;  %v5649_v35 = vld [vmem:[%s7964_s3 + $0x2d0] sm:$0xff] }
 0x30c   :  { %v1617_v14 = vmax.f32 %v1615_v39, 0.0  ;;  %v5642_v39 = vld [vmem:[%s7964_s3 + $0x298] sm:$0xff] }
 0x30d   :  { %v1618_v15 = vmax.f32 %v1616_v10, 0.0  ;;  %v1594_v0 = vpop.f32.mrf.mxu2  ;;  %v5650_v10 = vld [vmem:[%s7964_s3 + $0x2d8] sm:$0xff] }
 0x30e   :  { %v1619_v8 = vpack.c.bf16 %v1617_v14, %v1617_v14  ;;  %v1607_v56 = vpop.f32.mrf.mxu3  ;;  %v5652_v0 = vld [vmem:[%s7964_s3 + $0x2e8] sm:$0xff]  ;;  %v5651_v14 = vld [vmem:[%s7964_s3 + $0x2e0] sm:$0xff] }
 0x30f   :  { %v1620_v45 = vpack.c.bf16 %v1618_v15, %v1618_v15  ;;  %v5645_v56 = vld [vmem:[%s7964_s3 + $0x2b0] sm:$0xff]  ;;  %v5643_v15 = vld [vmem:[%s7964_s3 + $0x2a0] sm:$0xff] }
 0x310   :  { %1758 = vmatmul.bf16.vlgmr.msra.gmra.mxu0 %v1619_v8  ;;  %2025 = vmatpush.bf16.msra.mxu2 %v5645_v56  ;;  %v5644_v8 = vld [vmem:[%s7964_s3 + $0x2a8] sm:$0xff] }
 0x311   :  { %1771 = vmatmul.bf16.vlgmr.msra.gmra.mxu1 %v1620_v45  ;;  %1857 = vmatpush.bf16.msra.mxu0 %v6110_v61  ;;  %v5653_v45 = vld [vmem:[%s7964_s3 + $0x2f0] sm:$0xff]  ;;  %v5640_v56 = vld [vmem:[%s7964_s3 + $0x288] sm:$0xff] }
 0x312   :  { %1870 = vmatpush.bf16.msra.mxu1 %v6122_v2  ;;  %2038 = vmatpush.bf16.msra.mxu3 %v5653_v45  ;;  %v5648_v45 = vld [vmem:[%s7964_s3 + $0x2c8] sm:$0xff] }
 0x314   :  { %2026 = vmatpush.bf16.msra.mxu2 %v5644_v8  ;;  %v5639_v8 = vld [vmem:[%s7964_s3 + $0x280] sm:$0xff] }
 0x315   :  { %1858 = vmatpush.bf16.msra.mxu0 %v6154_v22 }
 0x316   :  { %1871 = vmatpush.bf16.msra.mxu1 %v6166_v31  ;;  %2039 = vmatpush.bf16.msra.mxu3 %v5652_v0  ;;  %v5647_v0 = vld [vmem:[%s7964_s3 + $0x2c0] sm:$0xff] }
 0x318   :  { %2027 = vmatpush.bf16.msra.mxu2 %v5643_v15  ;;  %v8190_v15 = vld [vmem:[#allocation2_spill] sm:$0xff] }
 0x319   :  { %1859 = vmatpush.bf16.msra.mxu0 %v6194_v47 }
 0x31a   :  { %1872 = vmatpush.bf16.msra.mxu1 %v6206_v54  ;;  %2040 = vmatpush.bf16.msra.mxu3 %v5651_v14  ;;  %v8191_v14 = vld [vmem:[#allocation3_spill] sm:$0xff] }
 0x31c   :  { %2028 = vmatpush.bf16.msra.mxu2 %v5642_v39 }
 0x31d   :  { %1860 = vmatpush.bf16.msra.mxu0 %v8096_v49 }
 0x31e   :  { %1873 = vmatpush.bf16.msra.mxu1 %v8097_v53  ;;  %2041 = vmatpush.bf16.msra.mxu3 %v5650_v10 }
 0x320   :  { %1813 = vmatmul.bf16.vlgmr.msrb.gmra.mxu0 %v7003_v38  ;;  %2029 = vmatpush.bf16.msra.mxu2 %v5641_v62  ;;  %v8192_v62 = vld [vmem:[#allocation4_spill] sm:$0xff] }
 0x321   :  { %1826 = vmatmul.bf16.vlgmr.msrb.gmra.mxu1 %v7003_v38  ;;  %1861 = vmatpush.bf16.msra.mxu0 %v8100_v4 }
 0x322   :  { %1874 = vmatpush.bf16.msra.mxu1 %v8101_v24  ;;  %2042 = vmatpush.bf16.msra.mxu3 %v5649_v35  ;;  %v8193_v35 = vld [vmem:[#allocation5_spill] sm:$0xff] }
 0x324   :  { %2030 = vmatpush.bf16.msra.mxu2 %v5640_v56 }
 0x325   :  { %1862 = vmatpush.bf16.msra.mxu0 %v8103_v30 }
 0x326   :  { %1875 = vmatpush.bf16.msra.mxu1 %v8104_v11  ;;  %2043 = vmatpush.bf16.msra.mxu3 %v5648_v45 }
 0x328   :  { %2031 = vmatpush.bf16.msra.mxu2 %v5639_v8  ;;  %v8197_v8 = vld [vmem:[#allocation11_spill] sm:$0xff] }
 0x329   :  { %1863 = vmatpush.bf16.msra.mxu0 %v6338_v63 }
 0x32a   :  { %1876 = vmatpush.bf16.msra.mxu1 %v6350_v32  ;;  %2044 = vmatpush.bf16.msra.mxu3 %v5647_v0 }
 0x32c   :  { %2079 = vmatpush.bf16.msrb.mxu2 %v8190_v15  ;;  %v8198_v15 = vld [vmem:[#allocation13_spill] sm:$0xff] }
 0x32d   :  { %1864 = vmatpush.bf16.msra.mxu0 %v6374_v48 }
 0x32e   :  { %1877 = vmatpush.bf16.msra.mxu1 %v6377_v40  ;;  %2092 = vmatpush.bf16.msrb.mxu3 %v8191_v14  ;;  %v8199_v14 = vld [vmem:[#allocation14_spill] sm:$0xff] }
 0x330   :  { %1865 = vmatmul.bf16.vlgmr.msra.gmra.mxu0 %v7003_v38  ;;  %2080 = vmatpush.bf16.msrb.mxu2 %v8192_v62  ;;  %v8200_v62 = vld [vmem:[#allocation29_spill] sm:$0xff] }
 0x331   :  { %2053 = vmatpush.bf16.msrb.mxu0 %v5807_v3  ;;  %1878 = vmatmul.bf16.vlgmr.msra.gmra.mxu1 %v7003_v38 }
 0x332   :  { %2066 = vmatpush.bf16.msrb.mxu1 %v5818_v7  ;;  %2093 = vmatpush.bf16.msrb.mxu3 %v8193_v35  ;;  %v8202_v35 = vld [vmem:[#allocation15_spill] sm:$0xff] }
 0x335   :  { %2054 = vmatpush.bf16.msrb.mxu0 %v5845_v16 }
 0x336   :  { %2067 = vmatpush.bf16.msrb.mxu1 %v5847_v17 }
 0x339   :  { %2055 = vmatpush.bf16.msrb.mxu0 %v5882_v29 }
 0x33a   :  { %2068 = vmatpush.bf16.msrb.mxu1 %v5895_v33 }
 0x33d   :  { %2056 = vmatpush.bf16.msrb.mxu0 %v8125_v18 }
 0x33e   :  { %2069 = vmatpush.bf16.msrb.mxu1 %v8126_v42 }
 0x341   :  { %2057 = vmatpush.bf16.msrb.mxu0 %v8127_v9 }
 0x342   :  { %2070 = vmatpush.bf16.msrb.mxu1 %v5967_v57 }
 0x345   :  { %2058 = vmatpush.bf16.msrb.mxu0 %v5999_v5 }
 0x346   :  { %2071 = vmatpush.bf16.msrb.mxu1 %v6003_v6 }
 0x349   :  { %2059 = vmatpush.bf16.msrb.mxu0 %v6035_v23 }
 0x34a   :  { %2072 = vmatpush.bf16.msrb.mxu1 %v6045_v27 }
 0x34d   :  { %2060 = vmatpush.bf16.msrb.mxu0 %v6080_v43 }
 0x34e   :  { %2073 = vmatpush.bf16.msrb.mxu1 %v6093_v51 }
 0x351   :  { %2105 = vmatpush.bf16.msra.mxu0 %v6106_v59 }
 0x352   :  { %2118 = vmatpush.bf16.msra.mxu1 %v6108_v60 }
 0x355   :  { %2106 = vmatpush.bf16.msra.mxu0 %v6148_v19 }
 0x356   :  { %2119 = vmatpush.bf16.msra.mxu1 %v6152_v20  ;;  %v1788_v38 = vpop.f32.mrf.mxu2  ;;  %v1801_v12 = vpop.f32.mrf.mxu3 }
 0x359   :  { %2107 = vmatpush.bf16.msra.mxu0 %v8105_v44 }
 0x35a   :  { %2120 = vmatpush.bf16.msra.mxu1 %v8179_v55 }
 0x35d   :  { %2108 = vmatpush.bf16.msra.mxu0 %v8180_v36 }
 0x35e   :  { %2121 = vmatpush.bf16.msra.mxu1 %v8181_v41  ;;  %v1790_v25 = vpop.f32.mrf.mxu2  ;;  %v1803_v1 = vpop.f32.mrf.mxu3 }
 0x35f   :  { %v8194_v25 = vld [vmem:[#allocation6_spill] sm:$0xff]  ;;  %v8195_v1 = vld [vmem:[#allocation7_spill] sm:$0xff] }
 0x360   :  { %2081 = vmatpush.bf16.msrb.mxu2 %v8194_v25  ;;  %2094 = vmatpush.bf16.msrb.mxu3 %v8195_v1  ;;  %v8203_v25 = vld [vmem:[#allocation16_spill] sm:$0xff]  ;;  %v8206_v1 = vld [vmem:[#allocation19_spill] sm:$0xff] }
 0x361   :  { %2109 = vmatpush.bf16.msra.mxu0 %v8182_v26 }
 0x362   :  { %2122 = vmatpush.bf16.msra.mxu1 %v8183_v21 }
 0x364   :  { %2095 = vmatpush.bf16.msrb.mxu3 %v8197_v8 }
 0x365   :  { %2110 = vmatpush.bf16.msra.mxu0 %v8184_v52 }
 0x366   :  { %2123 = vmatpush.bf16.msra.mxu1 %v8185_v50  ;;  %v1840_v39 = vpop.f32.mrf.mxu2  ;;  %v1853_v10 = vpop.f32.mrf.mxu3 }
 0x368   :  { %2096 = vmatpush.bf16.msrb.mxu3 %v8199_v14 }
 0x369   :  { %2111 = vmatpush.bf16.msra.mxu0 %v8186_v28 }
 0x36a   :  { %2124 = vmatpush.bf16.msra.mxu1 %v8187_v34 }
 0x36c   :  { %2097 = vmatpush.bf16.msrb.mxu3 %v8203_v25 }
 0x36d   :  { %2112 = vmatpush.bf16.msra.mxu0 %v8188_v13 }
 0x36e   :  { %2125 = vmatpush.bf16.msra.mxu1 %v8189_v37  ;;  %v1842_v56 = vpop.f32.mrf.mxu2  ;;  %v1855_v45 = vpop.f32.mrf.mxu3  ;;  %v8196_v37 = vld [vmem:[#allocation10_spill] sm:$0xff] }
 0x36f   :  { %2082 = vmatpush.bf16.msrb.mxu2 %v8196_v37  ;;  %v8204_v45 = vld [vmem:[#allocation17_spill] sm:$0xff]  ;;  %v8205_v37 = vld [vmem:[#allocation18_spill] sm:$0xff] }
 0x370   :  { %2098 = vmatpush.bf16.msrb.mxu3 %v8205_v37  ;;  %v1884_v37 = vmax.f32 %v1801_v12, %v1853_v10  ;;  %v8208_v12 = vld [vmem:[#allocation24_spill] sm:$0xff] }
 0x371   :  { %v8212_v10 = vld [vmem:[#allocation32_spill] sm:$0xff] }
 0x373   :  { %2083 = vmatpush.bf16.msrb.mxu2 %v8198_v15  ;;  %v8207_v15 = vld [vmem:[#allocation20_spill] sm:$0xff] }
 0x374   :  { %2099 = vmatpush.bf16.msrb.mxu3 %v8207_v15 }
 0x377   :  { %2084 = vmatpush.bf16.msrb.mxu2 %v8202_v35 }
 0x37b   :  { %2085 = vmatpush.bf16.msrb.mxu2 %v8204_v45 }
 0x37f   :  { %2086 = vmatpush.bf16.msrb.mxu2 %v8206_v1 }
 0x38d   :  { %v1759_v0 = vpop.f32.mrf.mxu0 }
 0x38e   :  { %v1772_v13 = vpop.f32.mrf.mxu1 }
 0x38f   :  { %v1773_v34 = vadd.f32 %v1772_v13, %v1759_v0 }
 0x391   :  { %v7126_v28 = vadd.f32 %v1773_v34, %v8200_v62  ;;  %v4816_v34 = vld [vmem:[%s7963_s0 + $0x18] sm:$0xf] }
 0x392   :  { %2061 = vmatmul.bf16.vlgmr.msrb.gmra.mxu0 %v4816_v34  ;;  %2074 = vmatmul.bf16.vlgmr.msrb.gmra.mxu1 %v4816_v34 }
 0x393   :  { %8201 = vst [vmem:[#allocation30_spill] sm:$0xff] %v7126_v28 }
 0x395   :  { %v1761_v56 = vpop.f32.mrf.mxu0 }
 0x396   :  { %v1774_v8 = vpop.f32.mrf.mxu1  ;;  %v1883_v56 = vmax.f32 %v1788_v38, %v1840_v39  ;;  %v5667_v38 = vld [vmem:[%s7964_s3 + $0x360] sm:$0xff]  ;;  %v8211_v39 = vld [vmem:[#allocation31_spill] sm:$0xff] }
 0x39d   :  { %v1814_v14 = vpop.f32.mrf.mxu0 }
 0x39e   :  { %v1827_v50 = vpop.f32.mrf.mxu1 }
 0x3a2   :  { %2113 = vmatmul.bf16.vlgmr.msra.gmra.mxu0 %v4816_v34  ;;  %2126 = vmatmul.bf16.vlgmr.msra.gmra.mxu1 %v4816_v34 }
 0x3a5   :  { %v1816_v13 = vpop.f32.mrf.mxu0 }
 0x3a6   :  { %v1829_v62 = vpop.f32.mrf.mxu1 }
 0x3ad   :  { %v1866_v0 = vpop.f32.mrf.mxu0 }
 0x3ae   :  { %v1885_v45 = vmax.f32 %v1814_v14, %v1866_v0  ;;  %v1879_v25 = vpop.f32.mrf.mxu1  ;;  %v8210_v14 = vld [vmem:[#allocation28_spill] sm:$0xff] }
 0x3af   :  { %v1886_v8 = vmax.f32 %v1827_v50, %v1879_v25  ;;  %v5662_v50 = vld [vmem:[%s7964_s3 + $0x338] sm:$0xff]  ;;  %v8214_v25 = vld [vmem:[#allocation36_spill] sm:$0xff] }
 0x3b0   :  { %v1887_v1 = vmax.f32 %v1883_v56, %v1885_v45  ;;  %2298 = vmatpush.bf16.msrb.mxu0 %v5662_v50  ;;  %v8216_v45 = vld [vmem:[#allocation38_spill] sm:$0xff]  ;;  %v5658_v56 = vld [vmem:[%s7964_s3 + $0x318] sm:$0xff] }
 0x3b1   :  { %v1888_v15 = vmax.f32 %v1884_v37, %v1886_v8  ;;  %v5670_v37 = vld [vmem:[%s7964_s3 + $0x378] sm:$0xff] }
 0x3b2   :  { %v1889_v35 = vadd.f32 %v1887_v1, %v6562_v58  ;;  %2311 = vmatpush.bf16.msrb.mxu1 %v5670_v37  ;;  %v8215_v1 = vld [vmem:[#allocation37_spill] sm:$0xff] }
 0x3b3   :  { %v1890_v28 = vadd.f32 %v1888_v15, %v6566_v46  ;;  %v8209_v15 = vld [vmem:[#allocation27_spill] sm:$0xff]  ;;  %v5666_v8 = vld [vmem:[%s7964_s3 + $0x358] sm:$0xff] }
 0x3b4   :  { %v1891_v52 = vmax.f32 %v1889_v35, 0.0  ;;  %v8213_v35 = vld [vmem:[#allocation35_spill] sm:$0xff] }
 0x3b5   :  { %v1892_v21 = vmax.f32 %v1890_v28, 0.0  ;;  %v1868_v26 = vpop.f32.mrf.mxu0  ;;  %v5659_v28 = vld [vmem:[%s7964_s3 + $0x320] sm:$0xff] }
 0x3b6   :  { %v1893_v41 = vpack.c.bf16 %v1891_v52, %v1891_v52  ;;  %v1881_v13 = vpop.f32.mrf.mxu1  ;;  %v5661_v26 = vld [vmem:[%s7964_s3 + $0x330] sm:$0xff]  ;;  %v5668_v52 = vld [vmem:[%s7964_s3 + $0x368] sm:$0xff] }
 0x3b7   :  { %v1894_v62 = vpack.c.bf16 %v1892_v21, %v1892_v21  ;;  %2299 = vmatpush.bf16.msrb.mxu0 %v5661_v26  ;;  %v5660_v21 = vld [vmem:[%s7964_s3 + $0x328] sm:$0xff]  ;;  %v5657_v13 = vld [vmem:[%s7964_s3 + $0x310] sm:$0xff] }
 0x3b8   :  { %2032 = vmatmul.bf16.vlgmr.msra.gmra.mxu2 %v1893_v41  ;;  %v5669_v41 = vld [vmem:[%s7964_s3 + $0x370] sm:$0xff]  ;;  %v5656_v26 = vld [vmem:[%s7964_s3 + $0x308] sm:$0xff] }
 0x3b9   :  { %2045 = vmatmul.bf16.vlgmr.msra.gmra.mxu3 %v1894_v62  ;;  %2131 = vmatpush.bf16.msra.mxu2 %v6110_v61  ;;  %v5665_v62 = vld [vmem:[%s7964_s3 + $0x350] sm:$0xff] }
 0x3ba   :  { %2144 = vmatpush.bf16.msra.mxu3 %v6122_v2  ;;  %2312 = vmatpush.bf16.msrb.mxu1 %v5669_v41  ;;  %v5664_v41 = vld [vmem:[%s7964_s3 + $0x348] sm:$0xff] }
 0x3bb   :  { %2300 = vmatpush.bf16.msrb.mxu0 %v5660_v21  ;;  %v5655_v21 = vld [vmem:[%s7964_s3 + $0x300] sm:$0xff] }
 0x3bd   :  { %2132 = vmatpush.bf16.msra.mxu2 %v6154_v22 }
 0x3be   :  { %2145 = vmatpush.bf16.msra.mxu3 %v6166_v31  ;;  %2313 = vmatpush.bf16.msrb.mxu1 %v5668_v52  ;;  %v5663_v52 = vld [vmem:[%s7964_s3 + $0x340] sm:$0xff] }
 0x3bf   :  { %2301 = vmatpush.bf16.msrb.mxu0 %v5659_v28  ;;  %v8217_v28 = vld [vmem:[#allocation2_spill] sm:$0xff] }
 0x3c1   :  { %2133 = vmatpush.bf16.msra.mxu2 %v6194_v47 }
 0x3c2   :  { %2146 = vmatpush.bf16.msra.mxu3 %v6206_v54  ;;  %2314 = vmatpush.bf16.msrb.mxu1 %v5667_v38  ;;  %v8218_v38 = vld [vmem:[#allocation3_spill] sm:$0xff] }
 0x3c3   :  { %2302 = vmatpush.bf16.msrb.mxu0 %v5658_v56 }
 0x3c5   :  { %2134 = vmatpush.bf16.msra.mxu2 %v8096_v49 }
 0x3c6   :  { %2147 = vmatpush.bf16.msra.mxu3 %v8097_v53  ;;  %2315 = vmatpush.bf16.msrb.mxu1 %v5666_v8 }
 0x3c7   :  { %2303 = vmatpush.bf16.msrb.mxu0 %v5657_v13  ;;  %v8219_v13 = vld [vmem:[#allocation4_spill] sm:$0xff] }
 0x3c8   :  { %2087 = vmatmul.bf16.vlgmr.msrb.gmra.mxu2 %v4816_v34 }
 0x3c9   :  { %2100 = vmatmul.bf16.vlgmr.msrb.gmra.mxu3 %v4816_v34  ;;  %2135 = vmatpush.bf16.msra.mxu2 %v8100_v4 }
 0x3ca   :  { %2148 = vmatpush.bf16.msra.mxu3 %v8101_v24  ;;  %2316 = vmatpush.bf16.msrb.mxu1 %v5665_v62  ;;  %v8220_v62 = vld [vmem:[#allocation5_spill] sm:$0xff] }
 0x3cb   :  { %2304 = vmatpush.bf16.msrb.mxu0 %v5656_v26 }
 0x3cd   :  { %2136 = vmatpush.bf16.msra.mxu2 %v8103_v30 }
 0x3ce   :  { %2149 = vmatpush.bf16.msra.mxu3 %v8104_v11  ;;  %2317 = vmatpush.bf16.msrb.mxu1 %v5664_v41 }
 0x3cf   :  { %2305 = vmatpush.bf16.msrb.mxu0 %v5655_v21  ;;  %v8224_v21 = vld [vmem:[#allocation11_spill] sm:$0xff] }
 0x3d1   :  { %2137 = vmatpush.bf16.msra.mxu2 %v6338_v63 }
 0x3d2   :  { %2150 = vmatpush.bf16.msra.mxu3 %v6350_v32  ;;  %2318 = vmatpush.bf16.msrb.mxu1 %v5663_v52 }
 0x3d3   :  { %2353 = vmatpush.bf16.msra.mxu0 %v8217_v28  ;;  %v8225_v28 = vld [vmem:[#allocation13_spill] sm:$0xff] }
 0x3d5   :  { %2138 = vmatpush.bf16.msra.mxu2 %v6374_v48 }
 0x3d6   :  { %2151 = vmatpush.bf16.msra.mxu3 %v6377_v40  ;;  %2366 = vmatpush.bf16.msra.mxu1 %v8218_v38  ;;  %v8226_v38 = vld [vmem:[#allocation14_spill] sm:$0xff] }
 0x3d7   :  { %2354 = vmatpush.bf16.msra.mxu0 %v8219_v13  ;;  %v8227_v13 = vld [vmem:[#allocation30_spill] sm:$0xff] }
 0x3d8   :  { %2139 = vmatmul.bf16.vlgmr.msra.gmra.mxu2 %v4816_v34 }
 0x3d9   :  { %2327 = vmatpush.bf16.msrb.mxu2 %v5807_v3  ;;  %2152 = vmatmul.bf16.vlgmr.msra.gmra.mxu3 %v4816_v34 }
 0x3da   :  { %2340 = vmatpush.bf16.msrb.mxu3 %v5818_v7  ;;  %2367 = vmatpush.bf16.msra.mxu1 %v8220_v62  ;;  %v8229_v62 = vld [vmem:[#allocation15_spill] sm:$0xff] }
 0x3dd   :  { %2328 = vmatpush.bf16.msrb.mxu2 %v5845_v16 }
 0x3de   :  { %2341 = vmatpush.bf16.msrb.mxu3 %v5847_v17 }
 0x3e1   :  { %2329 = vmatpush.bf16.msrb.mxu2 %v5882_v29 }
 0x3e2   :  { %2342 = vmatpush.bf16.msrb.mxu3 %v5895_v33 }
 0x3e5   :  { %2330 = vmatpush.bf16.msrb.mxu2 %v8125_v18 }
 0x3e6   :  { %2343 = vmatpush.bf16.msrb.mxu3 %v8126_v42 }
 0x3e9   :  { %2331 = vmatpush.bf16.msrb.mxu2 %v8127_v9 }
 0x3ea   :  { %2344 = vmatpush.bf16.msrb.mxu3 %v5967_v57 }
 0x3ed   :  { %2332 = vmatpush.bf16.msrb.mxu2 %v5999_v5 }
 0x3ee   :  { %2345 = vmatpush.bf16.msrb.mxu3 %v6003_v6 }
 0x3f1   :  { %2333 = vmatpush.bf16.msrb.mxu2 %v6035_v23 }
 0x3f2   :  { %2346 = vmatpush.bf16.msrb.mxu3 %v6045_v27 }
 0x3f5   :  { %2334 = vmatpush.bf16.msrb.mxu2 %v6080_v43 }
 0x3f6   :  { %2347 = vmatpush.bf16.msrb.mxu3 %v6093_v51 }
 0x3f9   :  { %2379 = vmatpush.bf16.msra.mxu2 %v6106_v59 }
 0x3fa   :  { %2392 = vmatpush.bf16.msra.mxu3 %v6108_v60 }
 0x3fd   :  { %2380 = vmatpush.bf16.msra.mxu2 %v6148_v19 }
 0x3fe   :  { %2393 = vmatpush.bf16.msra.mxu3 %v6152_v20 }
 0x401   :  { %2381 = vmatpush.bf16.msra.mxu2 %v8105_v44 }
 0x402   :  { %2394 = vmatpush.bf16.msra.mxu3 %v8179_v55 }
 0x405   :  { %2382 = vmatpush.bf16.msra.mxu2 %v8180_v36 }
 0x406   :  { %2395 = vmatpush.bf16.msra.mxu3 %v8208_v12 }
 0x409   :  { %2383 = vmatpush.bf16.msra.mxu2 %v8209_v15 }
 0x40a   :  { %2396 = vmatpush.bf16.msra.mxu3 %v8210_v14 }
 0x40d   :  { %2384 = vmatpush.bf16.msra.mxu2 %v8211_v39 }
 0x40e   :  { %2397 = vmatpush.bf16.msra.mxu3 %v8212_v10 }
 0x40f   :  { %v2062_v34 = vpop.f32.mrf.mxu0  ;;  %v2075_v0 = vpop.f32.mrf.mxu1 }
 0x411   :  { %2385 = vmatpush.bf16.msra.mxu2 %v8213_v35 }
 0x412   :  { %2398 = vmatpush.bf16.msra.mxu3 %v8214_v25 }
 0x415   :  { %2386 = vmatpush.bf16.msra.mxu2 %v8215_v1 }
 0x416   :  { %2399 = vmatpush.bf16.msra.mxu3 %v8216_v45  ;;  %v8223_v45 = vld [vmem:[#allocation10_spill] sm:$0xff] }
 0x417   :  { %v2064_v50 = vpop.f32.mrf.mxu0  ;;  %v2077_v37 = vpop.f32.mrf.mxu1 }
 0x418   :  { %v8221_v50 = vld [vmem:[#allocation6_spill] sm:$0xff]  ;;  %v8222_v37 = vld [vmem:[#allocation7_spill] sm:$0xff] }
 0x419   :  { %2355 = vmatpush.bf16.msra.mxu0 %v8221_v50  ;;  %2368 = vmatpush.bf16.msra.mxu1 %v8222_v37  ;;  %v8230_v50 = vld [vmem:[#allocation16_spill] sm:$0xff] }
 0x41d   :  { %2356 = vmatpush.bf16.msra.mxu0 %v8223_v45  ;;  %2369 = vmatpush.bf16.msra.mxu1 %v8224_v21 }
 0x41f   :  { %v2114_v56 = vpop.f32.mrf.mxu0  ;;  %v2127_v8 = vpop.f32.mrf.mxu1 }
 0x420   :  { %v2157_v45 = vmax.f32 %v2062_v34, %v2114_v56  ;;  %v8236_v34 = vld [vmem:[#allocation23_spill] sm:$0xff] }
 0x421   :  { %2357 = vmatpush.bf16.msra.mxu0 %v8225_v28  ;;  %2370 = vmatpush.bf16.msra.mxu1 %v8226_v38  ;;  %v8231_v38 = vld [vmem:[#allocation17_spill] sm:$0xff]  ;;  %v8240_v56 = vld [vmem:[#allocation31_spill] sm:$0xff] }
 0x425   :  { %2358 = vmatpush.bf16.msra.mxu0 %v8229_v62  ;;  %2371 = vmatpush.bf16.msra.mxu1 %v8230_v50 }
 0x427   :  { %v2116_v26 = vpop.f32.mrf.mxu0  ;;  %v2129_v41 = vpop.f32.mrf.mxu1 }
 0x428   :  { %v7253_v26 = vld [vmem:[%s7963_s0 + $0x1c] sm:$0xf] }
 0x429   :  { %2335 = vmatmul.bf16.vlgmr.msrb.gmra.mxu2 %v7253_v26  ;;  %2348 = vmatmul.bf16.vlgmr.msrb.gmra.mxu3 %v7253_v26 }
 0x42a   :  { %2359 = vmatpush.bf16.msra.mxu0 %v8231_v38  ;;  %v2158_v38 = vmax.f32 %v2075_v0, %v2127_v8  ;;  %v8237_v0 = vld [vmem:[#allocation24_spill] sm:$0xff] }
 0x42b   :  { %v8241_v8 = vld [vmem:[#allocation32_spill] sm:$0xff] }
 0x439   :  { %2387 = vmatmul.bf16.vlgmr.msra.gmra.mxu2 %v7253_v26  ;;  %2400 = vmatmul.bf16.vlgmr.msra.gmra.mxu3 %v7253_v26 }
 0x43b   :  { %v2033_v52 = vpop.f32.mrf.mxu2 }
 0x43c   :  { %v2046_v1 = vpop.f32.mrf.mxu3 }
 0x43d   :  { %v2047_v25 = vadd.f32 %v2046_v1, %v2033_v52  ;;  %v8232_v1 = vld [vmem:[#allocation18_spill] sm:$0xff]  ;;  %v8234_v52 = vld [vmem:[#allocation20_spill] sm:$0xff] }
 0x43e   :  { %2372 = vmatpush.bf16.msra.mxu1 %v8232_v1 }
 0x43f   :  { %v7246_v35 = vadd.f32 %v2047_v25, %v8227_v13  ;;  %v8233_v13 = vld [vmem:[#allocation19_spill] sm:$0xff] }
 0x440   :  { %2360 = vmatpush.bf16.msra.mxu0 %v8233_v13 }
 0x441   :  { %8228 = vst [vmem:[#allocation33_spill] sm:$0xff] %v7246_v35 }
 0x442   :  { %2373 = vmatpush.bf16.msra.mxu1 %v8234_v52 }
 0x443   :  { %v2035_v41 = vpop.f32.mrf.mxu2 }
 0x444   :  { %v2048_v25 = vpop.f32.mrf.mxu3 }
 0x44b   :  { %v2088_v50 = vpop.f32.mrf.mxu2 }
 0x44c   :  { %v2101_v62 = vpop.f32.mrf.mxu3 }
 0x453   :  { %v2090_v35 = vpop.f32.mrf.mxu2 }
 0x454   :  { %v2103_v28 = vpop.f32.mrf.mxu3  ;;  %v5678_v35 = vld [vmem:[%s7964_s3 + $0x3b8] sm:$0xff] }
 0x455   :  { %2572 = vmatpush.bf16.msrb.mxu2 %v5678_v35  ;;  %v8238_v28 = vld [vmem:[#allocation27_spill] sm:$0xff] }
 0x45b   :  { %v2140_v21 = vpop.f32.mrf.mxu2 }
 0x45c   :  { %v2159_v41 = vmax.f32 %v2088_v50, %v2140_v21  ;;  %v2153_v37 = vpop.f32.mrf.mxu3  ;;  %v8243_v50 = vld [vmem:[#allocation36_spill] sm:$0xff]  ;;  %v8245_v21 = vld [vmem:[#allocation38_spill] sm:$0xff] }
 0x45d   :  { %v2160_v10 = vmax.f32 %v2101_v62, %v2153_v37  ;;  %v8242_v62 = vld [vmem:[#allocation35_spill] sm:$0xff]  ;;  %v8244_v37 = vld [vmem:[#allocation37_spill] sm:$0xff] }
 0x45e   :  { %v2161_v1 = vmax.f32 %v2157_v45, %v2159_v41  ;;  %v8235_v45 = vld [vmem:[#allocation22_spill] sm:$0xff]  ;;  %v5673_v41 = vld [vmem:[%s7964_s3 + $0x390] sm:$0xff] }
 0x45f   :  { %v2162_v25 = vmax.f32 %v2158_v38, %v2160_v10  ;;  %v5686_v10 = vld [vmem:[%s7964_s3 + $0x3f8] sm:$0xff]  ;;  %v8239_v38 = vld [vmem:[#allocation28_spill] sm:$0xff] }
 0x460   :  { %v2163_v13 = vadd.f32 %v2161_v1, %v6562_v58  ;;  %2585 = vmatpush.bf16.msrb.mxu3 %v5686_v10 }
 0x461   :  { %v2164_v52 = vadd.f32 %v2162_v25, %v6566_v46  ;;  %v5681_v25 = vld [vmem:[%s7964_s3 + $0x3d0] sm:$0xff] }
 0x462   :  { %v2165_v39 = vmax.f32 %v2163_v13, 0.0  ;;  %v5674_v13 = vld [vmem:[%s7964_s3 + $0x398] sm:$0xff] }
 0x463   :  { %v2166_v14 = vmax.f32 %v2164_v52, 0.0  ;;  %v2142_v15 = vpop.f32.mrf.mxu2  ;;  %v5682_v52 = vld [vmem:[%s7964_s3 + $0x3d8] sm:$0xff] }
 0x464   :  { %v2167_v12 = vpack.c.bf16 %v2165_v39, %v2165_v39  ;;  %v2155_v36 = vpop.f32.mrf.mxu3  ;;  %v5684_v15 = vld [vmem:[%s7964_s3 + $0x3e8] sm:$0xff]  ;;  %v5683_v39 = vld [vmem:[%s7964_s3 + $0x3e0] sm:$0xff] }
 0x465   :  { %v2168_v55 = vpack.c.bf16 %v2166_v14, %v2166_v14  ;;  %v5677_v36 = vld [vmem:[%s7964_s3 + $0x3b0] sm:$0xff]  ;;  %v5675_v14 = vld [vmem:[%s7964_s3 + $0x3a0] sm:$0xff] }
 0x466   :  { %2306 = vmatmul.bf16.vlgmr.msrb.gmra.mxu0 %v2167_v12  ;;  %2573 = vmatpush.bf16.msrb.mxu2 %v5677_v36  ;;  %v5676_v12 = vld [vmem:[%s7964_s3 + $0x3a8] sm:$0xff] }
 0x467   :  { %2319 = vmatmul.bf16.vlgmr.msrb.gmra.mxu1 %v2168_v55  ;;  %2405 = vmatpush.bf16.msrb.mxu0 %v6110_v61  ;;  %v5685_v55 = vld [vmem:[%s7964_s3 + $0x3f0] sm:$0xff]  ;;  %v5672_v36 = vld [vmem:[%s7964_s3 + $0x388] sm:$0xff] }
 0x468   :  { %2418 = vmatpush.bf16.msrb.mxu1 %v6122_v2  ;;  %2586 = vmatpush.bf16.msrb.mxu3 %v5685_v55  ;;  %v5680_v55 = vld [vmem:[%s7964_s3 + $0x3c8] sm:$0xff] }
 0x46a   :  { %2574 = vmatpush.bf16.msrb.mxu2 %v5676_v12  ;;  %v5671_v12 = vld [vmem:[%s7964_s3 + $0x380] sm:$0xff] }
 0x46b   :  { %2406 = vmatpush.bf16.msrb.mxu0 %v6154_v22 }
 0x46c   :  { %2419 = vmatpush.bf16.msrb.mxu1 %v6166_v31  ;;  %2587 = vmatpush.bf16.msrb.mxu3 %v5684_v15  ;;  %v5679_v15 = vld [vmem:[%s7964_s3 + $0x3c0] sm:$0xff] }
 0x46e   :  { %2575 = vmatpush.bf16.msrb.mxu2 %v5675_v14  ;;  %v8246_v14 = vld [vmem:[#allocation2_spill] sm:$0xff] }
 0x46f   :  { %2407 = vmatpush.bf16.msrb.mxu0 %v6194_v47 }
 0x470   :  { %2420 = vmatpush.bf16.msrb.mxu1 %v6206_v54  ;;  %2588 = vmatpush.bf16.msrb.mxu3 %v5683_v39  ;;  %v8247_v39 = vld [vmem:[#allocation3_spill] sm:$0xff] }
 0x472   :  { %2576 = vmatpush.bf16.msrb.mxu2 %v5674_v13 }
 0x473   :  { %2408 = vmatpush.bf16.msrb.mxu0 %v8096_v49 }
 0x474   :  { %2421 = vmatpush.bf16.msrb.mxu1 %v8097_v53  ;;  %2589 = vmatpush.bf16.msrb.mxu3 %v5682_v52 }
 0x476   :  { %2361 = vmatmul.bf16.vlgmr.msra.gmra.mxu0 %v7253_v26  ;;  %2577 = vmatpush.bf16.msrb.mxu2 %v5673_v41  ;;  %v8248_v41 = vld [vmem:[#allocation4_spill] sm:$0xff] }
 0x477   :  { %2374 = vmatmul.bf16.vlgmr.msra.gmra.mxu1 %v7253_v26  ;;  %2409 = vmatpush.bf16.msrb.mxu0 %v8100_v4 }
 0x478   :  { %2422 = vmatpush.bf16.msrb.mxu1 %v8101_v24  ;;  %2590 = vmatpush.bf16.msrb.mxu3 %v5681_v25  ;;  %v8249_v25 = vld [vmem:[#allocation5_spill] sm:$0xff] }
 0x47a   :  { %2578 = vmatpush.bf16.msrb.mxu2 %v5672_v36 }
 0x47b   :  { %2410 = vmatpush.bf16.msrb.mxu0 %v8103_v30 }
 0x47c   :  { %2423 = vmatpush.bf16.msrb.mxu1 %v8104_v11  ;;  %2591 = vmatpush.bf16.msrb.mxu3 %v5680_v55 }
 0x47e   :  { %2579 = vmatpush.bf16.msrb.mxu2 %v5671_v12  ;;  %v8253_v12 = vld [vmem:[#allocation11_spill] sm:$0xff] }
 0x47f   :  { %2411 = vmatpush.bf16.msrb.mxu0 %v6338_v63 }
 0x480   :  { %2424 = vmatpush.bf16.msrb.mxu1 %v6350_v32  ;;  %2592 = vmatpush.bf16.msrb.mxu3 %v5679_v15 }
 0x482   :  { %2627 = vmatpush.bf16.msra.mxu2 %v8246_v14  ;;  %v8254_v14 = vld [vmem:[#allocation13_spill] sm:$0xff] }
 0x483   :  { %2412 = vmatpush.bf16.msrb.mxu0 %v6374_v48 }
 0x484   :  { %2425 = vmatpush.bf16.msrb.mxu1 %v6377_v40  ;;  %2640 = vmatpush.bf16.msra.mxu3 %v8247_v39  ;;  %v8255_v39 = vld [vmem:[#allocation14_spill] sm:$0xff] }
 0x486   :  { %2413 = vmatmul.bf16.vlgmr.msrb.gmra.mxu0 %v7253_v26  ;;  %2628 = vmatpush.bf16.msra.mxu2 %v8248_v41  ;;  %v8256_v41 = vld [vmem:[#allocation33_spill] sm:$0xff] }
 0x487   :  { %2601 = vmatpush.bf16.msra.mxu0 %v5807_v3  ;;  %2426 = vmatmul.bf16.vlgmr.msrb.gmra.mxu1 %v7253_v26 }
 0x488   :  { %2614 = vmatpush.bf16.msra.mxu1 %v5818_v7  ;;  %2641 = vmatpush.bf16.msra.mxu3 %v8249_v25  ;;  %v8258_v25 = vld [vmem:[#allocation15_spill] sm:$0xff] }
 0x48b   :  { %2602 = vmatpush.bf16.msra.mxu0 %v5845_v16 }
 0x48c   :  { %2615 = vmatpush.bf16.msra.mxu1 %v5847_v17 }
 0x48f   :  { %2603 = vmatpush.bf16.msra.mxu0 %v5882_v29 }
 0x490   :  { %2616 = vmatpush.bf16.msra.mxu1 %v5895_v33 }
 0x493   :  { %2604 = vmatpush.bf16.msra.mxu0 %v8125_v18 }
 0x494   :  { %2617 = vmatpush.bf16.msra.mxu1 %v8126_v42 }
 0x497   :  { %2605 = vmatpush.bf16.msra.mxu0 %v8127_v9 }
 0x498   :  { %2618 = vmatpush.bf16.msra.mxu1 %v5967_v57 }
 0x49b   :  { %2606 = vmatpush.bf16.msra.mxu0 %v5999_v5 }
 0x49c   :  { %2619 = vmatpush.bf16.msra.mxu1 %v6003_v6 }
 0x49f   :  { %2607 = vmatpush.bf16.msra.mxu0 %v6035_v23 }
 0x4a0   :  { %2620 = vmatpush.bf16.msra.mxu1 %v6045_v27 }
 0x4a3   :  { %2608 = vmatpush.bf16.msra.mxu0 %v6080_v43 }
 0x4a4   :  { %2621 = vmatpush.bf16.msra.mxu1 %v6093_v51 }
 0x4a7   :  { %2653 = vmatpush.bf16.msrb.mxu0 %v6106_v59 }
 0x4a8   :  { %2666 = vmatpush.bf16.msrb.mxu1 %v6108_v60 }
 0x4ab   :  { %2654 = vmatpush.bf16.msrb.mxu0 %v6148_v19 }
 0x4ac   :  { %2667 = vmatpush.bf16.msrb.mxu1 %v6152_v20  ;;  %v2336_v26 = vpop.f32.mrf.mxu2  ;;  %v2349_v1 = vpop.f32.mrf.mxu3 }
 0x4af   :  { %2655 = vmatpush.bf16.msrb.mxu0 %v8105_v44 }
 0x4b0   :  { %2668 = vmatpush.bf16.msrb.mxu1 %v8235_v45 }
 0x4b3   :  { %2656 = vmatpush.bf16.msrb.mxu0 %v8236_v34 }
 0x4b4   :  { %2669 = vmatpush.bf16.msrb.mxu1 %v8237_v0  ;;  %v2338_v35 = vpop.f32.mrf.mxu2  ;;  %v2351_v10 = vpop.f32.mrf.mxu3 }
 0x4b5   :  { %v8250_v35 = vld [vmem:[#allocation6_spill] sm:$0xff]  ;;  %v8251_v10 = vld [vmem:[#allocation7_spill] sm:$0xff] }
 0x4b6   :  { %2629 = vmatpush.bf16.msra.mxu2 %v8250_v35  ;;  %2642 = vmatpush.bf16.msra.mxu3 %v8251_v10  ;;  %v8259_v35 = vld [vmem:[#allocation16_spill] sm:$0xff]  ;;  %v8262_v10 = vld [vmem:[#allocation19_spill] sm:$0xff] }
 0x4b7   :  { %2657 = vmatpush.bf16.msrb.mxu0 %v8238_v28 }
 0x4b8   :  { %2670 = vmatpush.bf16.msrb.mxu1 %v8239_v38 }
 0x4ba   :  { %2643 = vmatpush.bf16.msra.mxu3 %v8253_v12 }
 0x4bb   :  { %2658 = vmatpush.bf16.msrb.mxu0 %v8240_v56 }
 0x4bc   :  { %2671 = vmatpush.bf16.msrb.mxu1 %v8241_v8  ;;  %v2388_v13 = vpop.f32.mrf.mxu2  ;;  %v2401_v52 = vpop.f32.mrf.mxu3 }
 0x4be   :  { %2644 = vmatpush.bf16.msra.mxu3 %v8255_v39 }
 0x4bf   :  { %2659 = vmatpush.bf16.msrb.mxu0 %v8242_v62 }
 0x4c0   :  { %2672 = vmatpush.bf16.msrb.mxu1 %v8243_v50 }
 0x4c2   :  { %2645 = vmatpush.bf16.msra.mxu3 %v8259_v35 }
 0x4c3   :  { %2660 = vmatpush.bf16.msrb.mxu0 %v8244_v37 }
 0x4c4   :  { %2673 = vmatpush.bf16.msrb.mxu1 %v8245_v21  ;;  %v2390_v36 = vpop.f32.mrf.mxu2  ;;  %v2403_v55 = vpop.f32.mrf.mxu3  ;;  %v8252_v21 = vld [vmem:[#allocation10_spill] sm:$0xff] }
 0x4c5   :  { %2630 = vmatpush.bf16.msra.mxu2 %v8252_v21  ;;  %v8260_v55 = vld [vmem:[#allocation17_spill] sm:$0xff]  ;;  %v8261_v21 = vld [vmem:[#allocation18_spill] sm:$0xff] }
 0x4c6   :  { %2646 = vmatpush.bf16.msra.mxu3 %v8261_v21  ;;  %v2432_v21 = vmax.f32 %v2349_v1, %v2401_v52  ;;  %v8264_v1 = vld [vmem:[#allocation24_spill] sm:$0xff] }
 0x4c7   :  { %v8268_v52 = vld [vmem:[#allocation32_spill] sm:$0xff] }
 0x4c9   :  { %2631 = vmatpush.bf16.msra.mxu2 %v8254_v14  ;;  %v8263_v14 = vld [vmem:[#allocation20_spill] sm:$0xff] }
 0x4ca   :  { %2647 = vmatpush.bf16.msra.mxu3 %v8263_v14 }
 0x4cd   :  { %2632 = vmatpush.bf16.msra.mxu2 %v8258_v25 }
 0x4d1   :  { %2633 = vmatpush.bf16.msra.mxu2 %v8260_v55 }
 0x4d5   :  { %2634 = vmatpush.bf16.msra.mxu2 %v8262_v10 }
 0x4e3   :  { %v2307_v15 = vpop.f32.mrf.mxu0 }
 0x4e4   :  { %v2320_v37 = vpop.f32.mrf.mxu1 }
 0x4e5   :  { %v2321_v50 = vadd.f32 %v2320_v37, %v2307_v15 }
 0x4e7   :  { %v7376_v62 = vadd.f32 %v2321_v50, %v8256_v41  ;;  %v5010_v50 = vld [vmem:[%s7963_s0 + $0x20] sm:$0xf] }
 0x4e8   :  { %2609 = vmatmul.bf16.vlgmr.msra.gmra.mxu0 %v5010_v50  ;;  %2622 = vmatmul.bf16.vlgmr.msra.gmra.mxu1 %v5010_v50 }
 0x4e9   :  { %8257 = vst [vmem:[#allocation34_spill] sm:$0xff] %v7376_v62 }
 0x4eb   :  { %v2309_v36 = vpop.f32.mrf.mxu0 }
 0x4ec   :  { %v2322_v12 = vpop.f32.mrf.mxu1  ;;  %v2431_v36 = vmax.f32 %v2336_v26, %v2388_v13  ;;  %v5699_v26 = vld [vmem:[%s7964_s3 + $0x460] sm:$0xff]  ;;  %v8267_v13 = vld [vmem:[#allocation31_spill] sm:$0xff] }
 0x4f3   :  { %v2362_v39 = vpop.f32.mrf.mxu0 }
 0x4f4   :  { %v2375_v8 = vpop.f32.mrf.mxu1 }
 0x4f8   :  { %2661 = vmatmul.bf16.vlgmr.msrb.gmra.mxu0 %v5010_v50  ;;  %2674 = vmatmul.bf16.vlgmr.msrb.gmra.mxu1 %v5010_v50 }
 0x4fb   :  { %v2364_v37 = vpop.f32.mrf.mxu0 }
 0x4fc   :  { %v2377_v41 = vpop.f32.mrf.mxu1 }
 0x503   :  { %v2414_v15 = vpop.f32.mrf.mxu0 }
 0x504   :  { %v2433_v55 = vmax.f32 %v2362_v39, %v2414_v15  ;;  %v2427_v35 = vpop.f32.mrf.mxu1  ;;  %v8266_v39 = vld [vmem:[#allocation28_spill] sm:$0xff] }
 0x505   :  { %v2434_v12 = vmax.f32 %v2375_v8, %v2427_v35  ;;  %v5694_v8 = vld [vmem:[%s7964_s3 + $0x438] sm:$0xff]  ;;  %v8270_v35 = vld [vmem:[#allocation36_spill] sm:$0xff] }
 0x506   :  { %v2435_v10 = vmax.f32 %v2431_v36, %v2433_v55  ;;  %2846 = vmatpush.bf16.msra.mxu0 %v5694_v8  ;;  %v8272_v55 = vld [vmem:[#allocation38_spill] sm:$0xff]  ;;  %v5690_v36 = vld [vmem:[%s7964_s3 + $0x418] sm:$0xff] }
 0x507   :  { %v2436_v14 = vmax.f32 %v2432_v21, %v2434_v12  ;;  %v5702_v21 = vld [vmem:[%s7964_s3 + $0x478] sm:$0xff] }
 0x508   :  { %v2437_v25 = vadd.f32 %v2435_v10, %v6562_v58  ;;  %2859 = vmatpush.bf16.msra.mxu1 %v5702_v21  ;;  %v8271_v10 = vld [vmem:[#allocation37_spill] sm:$0xff] }
 0x509   :  { %v2438_v62 = vadd.f32 %v2436_v14, %v6566_v46  ;;  %v8265_v14 = vld [vmem:[#allocation27_spill] sm:$0xff]  ;;  %v5698_v12 = vld [vmem:[%s7964_s3 + $0x458] sm:$0xff] }
 0x50a   :  { %v2439_v56 = vmax.f32 %v2437_v25, 0.0  ;;  %v8269_v25 = vld [vmem:[#allocation35_spill] sm:$0xff] }
 0x50b   :  { %v2440_v38 = vmax.f32 %v2438_v62, 0.0  ;;  %v2416_v28 = vpop.f32.mrf.mxu0  ;;  %v5691_v62 = vld [vmem:[%s7964_s3 + $0x420] sm:$0xff] }
 0x50c   :  { %v2441_v0 = vpack.c.bf16 %v2439_v56, %v2439_v56  ;;  %v2429_v37 = vpop.f32.mrf.mxu1  ;;  %v5693_v28 = vld [vmem:[%s7964_s3 + $0x430] sm:$0xff]  ;;  %v5700_v56 = vld [vmem:[%s7964_s3 + $0x468] sm:$0xff] }
 0x50d   :  { %v2442_v41 = vpack.c.bf16 %v2440_v38, %v2440_v38  ;;  %2847 = vmatpush.bf16.msra.mxu0 %v5693_v28  ;;  %v5692_v38 = vld [vmem:[%s7964_s3 + $0x428] sm:$0xff]  ;;  %v5689_v37 = vld [vmem:[%s7964_s3 + $0x410] sm:$0xff] }
 0x50e   :  { %2580 = vmatmul.bf16.vlgmr.msrb.gmra.mxu2 %v2441_v0  ;;  %v5701_v0 = vld [vmem:[%s7964_s3 + $0x470] sm:$0xff]  ;;  %v5688_v28 = vld [vmem:[%s7964_s3 + $0x408] sm:$0xff] }
 0x50f   :  { %2593 = vmatmul.bf16.vlgmr.msrb.gmra.mxu3 %v2442_v41  ;;  %2679 = vmatpush.bf16.msrb.mxu2 %v6110_v61  ;;  %v5697_v41 = vld [vmem:[%s7964_s3 + $0x450] sm:$0xff] }
 0x510   :  { %2692 = vmatpush.bf16.msrb.mxu3 %v6122_v2  ;;  %2860 = vmatpush.bf16.msra.mxu1 %v5701_v0  ;;  %v5696_v0 = vld [vmem:[%s7964_s3 + $0x448] sm:$0xff] }
 0x511   :  { %2848 = vmatpush.bf16.msra.mxu0 %v5692_v38  ;;  %v5687_v38 = vld [vmem:[%s7964_s3 + $0x400] sm:$0xff] }
 0x513   :  { %2680 = vmatpush.bf16.msrb.mxu2 %v6154_v22 }
 0x514   :  { %2693 = vmatpush.bf16.msrb.mxu3 %v6166_v31  ;;  %2861 = vmatpush.bf16.msra.mxu1 %v5700_v56  ;;  %v5695_v56 = vld [vmem:[%s7964_s3 + $0x440] sm:$0xff] }
 0x515   :  { %2849 = vmatpush.bf16.msra.mxu0 %v5691_v62  ;;  %v8273_v62 = vld [vmem:[#allocation2_spill] sm:$0xff] }
 0x517   :  { %2681 = vmatpush.bf16.msrb.mxu2 %v6194_v47 }
 0x518   :  { %2694 = vmatpush.bf16.msrb.mxu3 %v6206_v54  ;;  %2862 = vmatpush.bf16.msra.mxu1 %v5699_v26  ;;  %v8274_v26 = vld [vmem:[#allocation3_spill] sm:$0xff] }
 0x519   :  { %2850 = vmatpush.bf16.msra.mxu0 %v5690_v36 }
 0x51b   :  { %2682 = vmatpush.bf16.msrb.mxu2 %v8096_v49 }
 0x51c   :  { %2695 = vmatpush.bf16.msrb.mxu3 %v8097_v53  ;;  %2863 = vmatpush.bf16.msra.mxu1 %v5698_v12 }
 0x51d   :  { %2851 = vmatpush.bf16.msra.mxu0 %v5689_v37  ;;  %v8275_v37 = vld [vmem:[#allocation4_spill] sm:$0xff] }
 0x51e   :  { %2635 = vmatmul.bf16.vlgmr.msra.gmra.mxu2 %v5010_v50 }
 0x51f   :  { %2648 = vmatmul.bf16.vlgmr.msra.gmra.mxu3 %v5010_v50  ;;  %2683 = vmatpush.bf16.msrb.mxu2 %v8100_v4 }
 0x520   :  { %2696 = vmatpush.bf16.msrb.mxu3 %v8101_v24  ;;  %2864 = vmatpush.bf16.msra.mxu1 %v5697_v41  ;;  %v8276_v41 = vld [vmem:[#allocation5_spill] sm:$0xff] }
 0x521   :  { %2852 = vmatpush.bf16.msra.mxu0 %v5688_v28 }
 0x523   :  { %2684 = vmatpush.bf16.msrb.mxu2 %v8103_v30 }
 0x524   :  { %2697 = vmatpush.bf16.msrb.mxu3 %v8104_v11  ;;  %2865 = vmatpush.bf16.msra.mxu1 %v5696_v0 }
 0x525   :  { %2853 = vmatpush.bf16.msra.mxu0 %v5687_v38  ;;  %v8280_v38 = vld [vmem:[#allocation11_spill] sm:$0xff] }
 0x527   :  { %2685 = vmatpush.bf16.msrb.mxu2 %v6338_v63 }
 0x528   :  { %2698 = vmatpush.bf16.msrb.mxu3 %v6350_v32  ;;  %2866 = vmatpush.bf16.msra.mxu1 %v5695_v56 }
 0x529   :  { %2901 = vmatpush.bf16.msrb.mxu0 %v8273_v62  ;;  %v8281_v62 = vld [vmem:[#allocation13_spill] sm:$0xff] }
 0x52b   :  { %2686 = vmatpush.bf16.msrb.mxu2 %v6374_v48 }
 0x52c   :  { %2699 = vmatpush.bf16.msrb.mxu3 %v6377_v40  ;;  %2914 = vmatpush.bf16.msrb.mxu1 %v8274_v26  ;;  %v8282_v26 = vld [vmem:[#allocation14_spill] sm:$0xff] }
 0x52d   :  { %2902 = vmatpush.bf16.msrb.mxu0 %v8275_v37  ;;  %v8283_v37 = vld [vmem:[#allocation34_spill] sm:$0xff] }
 0x52e   :  { %2687 = vmatmul.bf16.vlgmr.msrb.gmra.mxu2 %v5010_v50 }
 0x52f   :  { %2875 = vmatpush.bf16.msra.mxu2 %v5807_v3  ;;  %2700 = vmatmul.bf16.vlgmr.msrb.gmra.mxu3 %v5010_v50 }
 0x530   :  { %2888 = vmatpush.bf16.msra.mxu3 %v5818_v7  ;;  %2915 = vmatpush.bf16.msrb.mxu1 %v8276_v41  ;;  %v8285_v41 = vld [vmem:[#allocation15_spill] sm:$0xff] }
 0x533   :  { %2876 = vmatpush.bf16.msra.mxu2 %v5845_v16 }
 0x534   :  { %2889 = vmatpush.bf16.msra.mxu3 %v5847_v17 }
 0x537   :  { %2877 = vmatpush.bf16.msra.mxu2 %v5882_v29 }
 0x538   :  { %2890 = vmatpush.bf16.msra.mxu3 %v5895_v33 }
 0x53b   :  { %2878 = vmatpush.bf16.msra.mxu2 %v8125_v18 }
 0x53c   :  { %2891 = vmatpush.bf16.msra.mxu3 %v8126_v42 }
 0x53f   :  { %2879 = vmatpush.bf16.msra.mxu2 %v8127_v9 }
 0x540   :  { %2892 = vmatpush.bf16.msra.mxu3 %v5967_v57 }
 0x543   :  { %2880 = vmatpush.bf16.msra.mxu2 %v5999_v5 }
 0x544   :  { %2893 = vmatpush.bf16.msra.mxu3 %v6003_v6 }
 0x547   :  { %2881 = vmatpush.bf16.msra.mxu2 %v6035_v23 }
 0x548   :  { %2894 = vmatpush.bf16.msra.mxu3 %v6045_v27 }
 0x54b   :  { %2882 = vmatpush.bf16.msra.mxu2 %v6080_v43 }
 0x54c   :  { %2895 = vmatpush.bf16.msra.mxu3 %v6093_v51 }
 0x54f   :  { %2927 = vmatpush.bf16.msrb.mxu2 %v6106_v59 }
 0x550   :  { %2940 = vmatpush.bf16.msrb.mxu3 %v6108_v60 }
 0x553   :  { %2928 = vmatpush.bf16.msrb.mxu2 %v6148_v19 }
 0x554   :  { %2941 = vmatpush.bf16.msrb.mxu3 %v6152_v20 }
 0x557   :  { %2929 = vmatpush.bf16.msrb.mxu2 %v8105_v44 }
 0x558   :  { %2942 = vmatpush.bf16.msrb.mxu3 %v8235_v45 }
 0x55b   :  { %2930 = vmatpush.bf16.msrb.mxu2 %v8236_v34 }
 0x55c   :  { %2943 = vmatpush.bf16.msrb.mxu3 %v8264_v1 }
 0x55f   :  { %2931 = vmatpush.bf16.msrb.mxu2 %v8265_v14 }
 0x560   :  { %2944 = vmatpush.bf16.msrb.mxu3 %v8266_v39 }
 0x563   :  { %2932 = vmatpush.bf16.msrb.mxu2 %v8267_v13 }
 0x564   :  { %2945 = vmatpush.bf16.msrb.mxu3 %v8268_v52 }
 0x565   :  { %v2610_v50 = vpop.f32.mrf.mxu0  ;;  %v2623_v15 = vpop.f32.mrf.mxu1 }
 0x567   :  { %2933 = vmatpush.bf16.msrb.mxu2 %v8269_v25 }
 0x568   :  { %2946 = vmatpush.bf16.msrb.mxu3 %v8270_v35 }
 0x56b   :  { %2934 = vmatpush.bf16.msrb.mxu2 %v8271_v10 }
 0x56c   :  { %2947 = vmatpush.bf16.msrb.mxu3 %v8272_v55  ;;  %v8279_v55 = vld [vmem:[#allocation10_spill] sm:$0xff] }
 0x56d   :  { %v2612_v8 = vpop.f32.mrf.mxu0  ;;  %v2625_v21 = vpop.f32.mrf.mxu1 }
 0x56e   :  { %v8277_v8 = vld [vmem:[#allocation6_spill] sm:$0xff]  ;;  %v8278_v21 = vld [vmem:[#allocation7_spill] sm:$0xff] }
 0x56f   :  { %2903 = vmatpush.bf16.msrb.mxu0 %v8277_v8  ;;  %2916 = vmatpush.bf16.msrb.mxu1 %v8278_v21  ;;  %v8286_v8 = vld [vmem:[#allocation16_spill] sm:$0xff] }
 0x573   :  { %2904 = vmatpush.bf16.msrb.mxu0 %v8279_v55  ;;  %2917 = vmatpush.bf16.msrb.mxu1 %v8280_v38 }
 0x575   :  { %v2662_v36 = vpop.f32.mrf.mxu0  ;;  %v2675_v12 = vpop.f32.mrf.mxu1 }
 0x576   :  { %v2705_v55 = vmax.f32 %v2610_v50, %v2662_v36  ;;  %v8292_v50 = vld [vmem:[#allocation23_spill] sm:$0xff] }
 0x577   :  { %2905 = vmatpush.bf16.msrb.mxu0 %v8281_v62  ;;  %2918 = vmatpush.bf16.msrb.mxu1 %v8282_v26  ;;  %v8287_v26 = vld [vmem:[#allocation17_spill] sm:$0xff]  ;;  %v8296_v36 = vld [vmem:[#allocation31_spill] sm:$0xff] }
 0x57b   :  { %2906 = vmatpush.bf16.msrb.mxu0 %v8285_v41  ;;  %2919 = vmatpush.bf16.msrb.mxu1 %v8286_v8 }
 0x57d   :  { %v2664_v28 = vpop.f32.mrf.mxu0  ;;  %v2677_v0 = vpop.f32.mrf.mxu1 }
 0x57e   :  { %v7503_v28 = vld [vmem:[%s7963_s0 + $0x24] sm:$0xf] }
 0x57f   :  { %2883 = vmatmul.bf16.vlgmr.msra.gmra.mxu2 %v7503_v28  ;;  %2896 = vmatmul.bf16.vlgmr.msra.gmra.mxu3 %v7503_v28 }
 0x580   :  { %2907 = vmatpush.bf16.msrb.mxu0 %v8287_v26  ;;  %v2706_v26 = vmax.f32 %v2623_v15, %v2675_v12  ;;  %v8293_v15 = vld [vmem:[#allocation24_spill] sm:$0xff] }
 0x581   :  { %v8297_v12 = vld [vmem:[#allocation32_spill] sm:$0xff] }
 0x58f   :  { %2935 = vmatmul.bf16.vlgmr.msrb.gmra.mxu2 %v7503_v28  ;;  %2948 = vmatmul.bf16.vlgmr.msrb.gmra.mxu3 %v7503_v28 }
 0x591   :  { %v2581_v56 = vpop.f32.mrf.mxu2 }
 0x592   :  { %v2594_v10 = vpop.f32.mrf.mxu3 }
 0x593   :  { %v2595_v35 = vadd.f32 %v2594_v10, %v2581_v56  ;;  %v8288_v10 = vld [vmem:[#allocation18_spill] sm:$0xff]  ;;  %v8290_v56 = vld [vmem:[#allocation20_spill] sm:$0xff] }
 0x594   :  { %2920 = vmatpush.bf16.msrb.mxu1 %v8288_v10 }
 0x595   :  { %v7496_v25 = vadd.f32 %v2595_v35, %v8283_v37  ;;  %v8289_v37 = vld [vmem:[#allocation19_spill] sm:$0xff] }
 0x596   :  { %2908 = vmatpush.bf16.msrb.mxu0 %v8289_v37 }
 0x597   :  { %8284 = vst [vmem:[#allocation21_spill] sm:$0xff] %v7496_v25 }
 0x598   :  { %2921 = vmatpush.bf16.msrb.mxu1 %v8290_v56 }
 0x599   :  { %v2583_v0 = vpop.f32.mrf.mxu2 }
 0x59a   :  { %v2596_v35 = vpop.f32.mrf.mxu3 }
 0x5a1   :  { %v2636_v8 = vpop.f32.mrf.mxu2 }
 0x5a2   :  { %v2649_v41 = vpop.f32.mrf.mxu3 }
 0x5a9   :  { %v2638_v25 = vpop.f32.mrf.mxu2 }
 0x5aa   :  { %v2651_v62 = vpop.f32.mrf.mxu3  ;;  %v5710_v25 = vld [vmem:[%s7964_s3 + $0x4b8] sm:$0xff] }
 0x5ab   :  { %3120 = vmatpush.bf16.msra.mxu2 %v5710_v25  ;;  %v8294_v62 = vld [vmem:[#allocation27_spill] sm:$0xff] }
 0x5b1   :  { %v2688_v38 = vpop.f32.mrf.mxu2 }
 0x5b2   :  { %v2707_v0 = vmax.f32 %v2636_v8, %v2688_v38  ;;  %v2701_v21 = vpop.f32.mrf.mxu3  ;;  %v8299_v8 = vld [vmem:[#allocation36_spill] sm:$0xff]  ;;  %v8301_v38 = vld [vmem:[#allocation38_spill] sm:$0xff] }
 0x5b3   :  { %v2708_v52 = vmax.f32 %v2649_v41, %v2701_v21  ;;  %v8298_v41 = vld [vmem:[#allocation35_spill] sm:$0xff]  ;;  %v8300_v21 = vld [vmem:[#allocation37_spill] sm:$0xff] }
 0x5b4   :  { %v2709_v10 = vmax.f32 %v2705_v55, %v2707_v0  ;;  %v8291_v55 = vld [vmem:[#allocation22_spill] sm:$0xff]  ;;  %v5705_v0 = vld [vmem:[%s7964_s3 + $0x490] sm:$0xff] }
 0x5b5   :  { %v2710_v35 = vmax.f32 %v2706_v26, %v2708_v52  ;;  %v5718_v52 = vld [vmem:[%s7964_s3 + $0x4f8] sm:$0xff]  ;;  %v8295_v26 = vld [vmem:[#allocation28_spill] sm:$0xff] }
 0x5b6   :  { %v2711_v37 = vadd.f32 %v2709_v10, %v6562_v58  ;;  %3133 = vmatpush.bf16.msra.mxu3 %v5718_v52 }
 0x5b7   :  { %v2712_v56 = vadd.f32 %v2710_v35, %v6566_v46  ;;  %v5713_v35 = vld [vmem:[%s7964_s3 + $0x4d0] sm:$0xff] }
 0x5b8   :  { %v2713_v13 = vmax.f32 %v2711_v37, 0.0  ;;  %v5706_v37 = vld [vmem:[%s7964_s3 + $0x498] sm:$0xff] }
 0x5b9   :  { %v2714_v39 = vmax.f32 %v2712_v56, 0.0  ;;  %v2690_v14 = vpop.f32.mrf.mxu2  ;;  %v5714_v56 = vld [vmem:[%s7964_s3 + $0x4d8] sm:$0xff] }
 0x5ba   :  { %v2715_v1 = vpack.c.bf16 %v2713_v13, %v2713_v13  ;;  %v2703_v34 = vpop.f32.mrf.mxu3  ;;  %v5716_v14 = vld [vmem:[%s7964_s3 + $0x4e8] sm:$0xff]  ;;  %v5715_v13 = vld [vmem:[%s7964_s3 + $0x4e0] sm:$0xff] }
 0x5bb   :  { %v2716_v45 = vpack.c.bf16 %v2714_v39, %v2714_v39  ;;  %v5709_v34 = vld [vmem:[%s7964_s3 + $0x4b0] sm:$0xff]  ;;  %v5707_v39 = vld [vmem:[%s7964_s3 + $0x4a0] sm:$0xff] }
 0x5bc   :  { %2854 = vmatmul.bf16.vlgmr.msra.gmra.mxu0 %v2715_v1  ;;  %3121 = vmatpush.bf16.msra.mxu2 %v5709_v34  ;;  %v5708_v1 = vld [vmem:[%s7964_s3 + $0x4a8] sm:$0xff] }
 0x5bd   :  { %2867 = vmatmul.bf16.vlgmr.msra.gmra.mxu1 %v2716_v45  ;;  %2953 = vmatpush.bf16.msra.mxu0 %v6110_v61  ;;  %v5717_v45 = vld [vmem:[%s7964_s3 + $0x4f0] sm:$0xff]  ;;  %v5704_v34 = vld [vmem:[%s7964_s3 + $0x488] sm:$0xff] }
 0x5be   :  { %2966 = vmatpush.bf16.msra.mxu1 %v6122_v2  ;;  %3134 = vmatpush.bf16.msra.mxu3 %v5717_v45  ;;  %v5712_v45 = vld [vmem:[%s7964_s3 + $0x4c8] sm:$0xff] }
 0x5c0   :  { %3122 = vmatpush.bf16.msra.mxu2 %v5708_v1  ;;  %v5703_v1 = vld [vmem:[%s7964_s3 + $0x480] sm:$0xff] }
 0x5c1   :  { %2954 = vmatpush.bf16.msra.mxu0 %v6154_v22 }
 0x5c2   :  { %2967 = vmatpush.bf16.msra.mxu1 %v6166_v31  ;;  %3135 = vmatpush.bf16.msra.mxu3 %v5716_v14  ;;  %v5711_v14 = vld [vmem:[%s7964_s3 + $0x4c0] sm:$0xff] }
 0x5c4   :  { %3123 = vmatpush.bf16.msra.mxu2 %v5707_v39  ;;  %v8302_v39 = vld [vmem:[#allocation2_spill] sm:$0xff] }
 0x5c5   :  { %2955 = vmatpush.bf16.msra.mxu0 %v6194_v47 }
 0x5c6   :  { %2968 = vmatpush.bf16.msra.mxu1 %v6206_v54  ;;  %3136 = vmatpush.bf16.msra.mxu3 %v5715_v13  ;;  %v8303_v13 = vld [vmem:[#allocation3_spill] sm:$0xff] }
 0x5c8   :  { %3124 = vmatpush.bf16.msra.mxu2 %v5706_v37 }
 0x5c9   :  { %2956 = vmatpush.bf16.msra.mxu0 %v8096_v49 }
 0x5ca   :  { %2969 = vmatpush.bf16.msra.mxu1 %v8097_v53  ;;  %3137 = vmatpush.bf16.msra.mxu3 %v5714_v56 }
 0x5cc   :  { %2909 = vmatmul.bf16.vlgmr.msrb.gmra.mxu0 %v7503_v28  ;;  %3125 = vmatpush.bf16.msra.mxu2 %v5705_v0  ;;  %v8304_v0 = vld [vmem:[#allocation4_spill] sm:$0xff] }
 0x5cd   :  { %2922 = vmatmul.bf16.vlgmr.msrb.gmra.mxu1 %v7503_v28  ;;  %2957 = vmatpush.bf16.msra.mxu0 %v8100_v4 }
 0x5ce   :  { %2970 = vmatpush.bf16.msra.mxu1 %v8101_v24  ;;  %3138 = vmatpush.bf16.msra.mxu3 %v5713_v35  ;;  %v8305_v35 = vld [vmem:[#allocation5_spill] sm:$0xff] }
 0x5d0   :  { %3126 = vmatpush.bf16.msra.mxu2 %v5704_v34 }
 0x5d1   :  { %2958 = vmatpush.bf16.msra.mxu0 %v8103_v30 }
 0x5d2   :  { %2971 = vmatpush.bf16.msra.mxu1 %v8104_v11  ;;  %3139 = vmatpush.bf16.msra.mxu3 %v5712_v45 }
 0x5d4   :  { %3127 = vmatpush.bf16.msra.mxu2 %v5703_v1  ;;  %v8309_v1 = vld [vmem:[#allocation11_spill] sm:$0xff] }
 0x5d5   :  { %2959 = vmatpush.bf16.msra.mxu0 %v6338_v63 }
 0x5d6   :  { %2972 = vmatpush.bf16.msra.mxu1 %v6350_v32  ;;  %3140 = vmatpush.bf16.msra.mxu3 %v5711_v14 }
 0x5d8   :  { %3175 = vmatpush.bf16.msrb.mxu2 %v8302_v39  ;;  %v8310_v39 = vld [vmem:[#allocation13_spill] sm:$0xff] }
 0x5d9   :  { %2960 = vmatpush.bf16.msra.mxu0 %v6374_v48 }
 0x5da   :  { %2973 = vmatpush.bf16.msra.mxu1 %v6377_v40  ;;  %3188 = vmatpush.bf16.msrb.mxu3 %v8303_v13  ;;  %v8311_v13 = vld [vmem:[#allocation14_spill] sm:$0xff] }
 0x5dc   :  { %2961 = vmatmul.bf16.vlgmr.msra.gmra.mxu0 %v7503_v28  ;;  %3176 = vmatpush.bf16.msrb.mxu2 %v8304_v0  ;;  %v8312_v0 = vld [vmem:[#allocation21_spill] sm:$0xff] }
 0x5dd   :  { %3149 = vmatpush.bf16.msrb.mxu0 %v5807_v3  ;;  %2974 = vmatmul.bf16.vlgmr.msra.gmra.mxu1 %v7503_v28 }
 0x5de   :  { %3162 = vmatpush.bf16.msrb.mxu1 %v5818_v7  ;;  %3189 = vmatpush.bf16.msrb.mxu3 %v8305_v35  ;;  %v8314_v35 = vld [vmem:[#allocation15_spill] sm:$0xff] }
 0x5e1   :  { %3150 = vmatpush.bf16.msrb.mxu0 %v5845_v16 }
 0x5e2   :  { %3163 = vmatpush.bf16.msrb.mxu1 %v5847_v17 }
 0x5e5   :  { %3151 = vmatpush.bf16.msrb.mxu0 %v5882_v29 }
 0x5e6   :  { %3164 = vmatpush.bf16.msrb.mxu1 %v5895_v33 }
 0x5e9   :  { %3152 = vmatpush.bf16.msrb.mxu0 %v8125_v18 }
 0x5ea   :  { %3165 = vmatpush.bf16.msrb.mxu1 %v8126_v42 }
 0x5ed   :  { %3153 = vmatpush.bf16.msrb.mxu0 %v8127_v9 }
 0x5ee   :  { %3166 = vmatpush.bf16.msrb.mxu1 %v5967_v57 }
 0x5f1   :  { %3154 = vmatpush.bf16.msrb.mxu0 %v5999_v5 }
 0x5f2   :  { %3167 = vmatpush.bf16.msrb.mxu1 %v6003_v6 }
 0x5f5   :  { %3155 = vmatpush.bf16.msrb.mxu0 %v6035_v23 }
 0x5f6   :  { %3168 = vmatpush.bf16.msrb.mxu1 %v6045_v27 }
 0x5f9   :  { %3156 = vmatpush.bf16.msrb.mxu0 %v6080_v43 }
 0x5fa   :  { %3169 = vmatpush.bf16.msrb.mxu1 %v6093_v51 }
 0x5fd   :  { %3201 = vmatpush.bf16.msra.mxu0 %v6106_v59 }
 0x5fe   :  { %3214 = vmatpush.bf16.msra.mxu1 %v6108_v60 }
 0x601   :  { %3202 = vmatpush.bf16.msra.mxu0 %v6148_v19 }
 0x602   :  { %3215 = vmatpush.bf16.msra.mxu1 %v6152_v20  ;;  %v2884_v28 = vpop.f32.mrf.mxu2  ;;  %v2897_v10 = vpop.f32.mrf.mxu3 }
 0x605   :  { %3203 = vmatpush.bf16.msra.mxu0 %v8105_v44 }
 0x606   :  { %3216 = vmatpush.bf16.msra.mxu1 %v8291_v55 }
 0x609   :  { %3204 = vmatpush.bf16.msra.mxu0 %v8292_v50 }
 0x60a   :  { %3217 = vmatpush.bf16.msra.mxu1 %v8293_v15  ;;  %v2886_v25 = vpop.f32.mrf.mxu2  ;;  %v2899_v52 = vpop.f32.mrf.mxu3 }
 0x60b   :  { %v8306_v25 = vld [vmem:[#allocation6_spill] sm:$0xff]  ;;  %v8307_v52 = vld [vmem:[#allocation7_spill] sm:$0xff] }
 0x60c   :  { %3177 = vmatpush.bf16.msrb.mxu2 %v8306_v25  ;;  %3190 = vmatpush.bf16.msrb.mxu3 %v8307_v52  ;;  %v8315_v25 = vld [vmem:[#allocation16_spill] sm:$0xff]  ;;  %v8318_v52 = vld [vmem:[#allocation19_spill] sm:$0xff] }
 0x60d   :  { %3205 = vmatpush.bf16.msra.mxu0 %v8294_v62 }
 0x60e   :  { %3218 = vmatpush.bf16.msra.mxu1 %v8295_v26 }
 0x610   :  { %3191 = vmatpush.bf16.msrb.mxu3 %v8309_v1 }
 0x611   :  { %3206 = vmatpush.bf16.msra.mxu0 %v8296_v36 }
 0x612   :  { %3219 = vmatpush.bf16.msra.mxu1 %v8297_v12  ;;  %v2936_v37 = vpop.f32.mrf.mxu2  ;;  %v2949_v56 = vpop.f32.mrf.mxu3 }
 0x614   :  { %3192 = vmatpush.bf16.msrb.mxu3 %v8311_v13 }
 0x615   :  { %3207 = vmatpush.bf16.msra.mxu0 %v8298_v41 }
 0x616   :  { %3220 = vmatpush.bf16.msra.mxu1 %v8299_v8 }
 0x618   :  { %3193 = vmatpush.bf16.msrb.mxu3 %v8315_v25 }
 0x619   :  { %3208 = vmatpush.bf16.msra.mxu0 %v8300_v21 }
 0x61a   :  { %3221 = vmatpush.bf16.msra.mxu1 %v8301_v38  ;;  %v2938_v34 = vpop.f32.mrf.mxu2  ;;  %v2951_v45 = vpop.f32.mrf.mxu3  ;;  %v8308_v38 = vld [vmem:[#allocation10_spill] sm:$0xff] }
 0x61b   :  { %3178 = vmatpush.bf16.msrb.mxu2 %v8308_v38  ;;  %v8316_v45 = vld [vmem:[#allocation17_spill] sm:$0xff]  ;;  %v8317_v38 = vld [vmem:[#allocation18_spill] sm:$0xff] }
 0x61c   :  { %3194 = vmatpush.bf16.msrb.mxu3 %v8317_v38  ;;  %v2980_v38 = vmax.f32 %v2897_v10, %v2949_v56  ;;  %v8320_v10 = vld [vmem:[#allocation24_spill] sm:$0xff] }
 0x61d   :  { %v8324_v56 = vld [vmem:[#allocation32_spill] sm:$0xff] }
 0x61f   :  { %3179 = vmatpush.bf16.msrb.mxu2 %v8310_v39  ;;  %v8319_v39 = vld [vmem:[#allocation20_spill] sm:$0xff] }
 0x620   :  { %3195 = vmatpush.bf16.msrb.mxu3 %v8319_v39 }
 0x623   :  { %3180 = vmatpush.bf16.msrb.mxu2 %v8314_v35 }
 0x627   :  { %3181 = vmatpush.bf16.msrb.mxu2 %v8316_v45 }
 0x62b   :  { %3182 = vmatpush.bf16.msrb.mxu2 %v8318_v52 }
 0x639   :  { %v2855_v14 = vpop.f32.mrf.mxu0 }
 0x63a   :  { %v2868_v21 = vpop.f32.mrf.mxu1 }
 0x63b   :  { %v2869_v8 = vadd.f32 %v2868_v21, %v2855_v14 }
 0x63d   :  { %v7626_v41 = vadd.f32 %v2869_v8, %v8312_v0  ;;  %v5204_v8 = vld [vmem:[%s7963_s0 + $0x28] sm:$0xf] }
 0x63e   :  { %3157 = vmatmul.bf16.vlgmr.msrb.gmra.mxu0 %v5204_v8  ;;  %3170 = vmatmul.bf16.vlgmr.msrb.gmra.mxu1 %v5204_v8 }
 0x63f   :  { %8313 = vst [vmem:[#allocation8_spill] sm:$0xff] %v7626_v41 }
 0x641   :  { %v2857_v34 = vpop.f32.mrf.mxu0 }
 0x642   :  { %v2870_v1 = vpop.f32.mrf.mxu1  ;;  %v2979_v34 = vmax.f32 %v2884_v28, %v2936_v37  ;;  %v5731_v28 = vld [vmem:[%s7964_s3 + $0x560] sm:$0xff]  ;;  %v8323_v37 = vld [vmem:[#allocation31_spill] sm:$0xff] }
 0x649   :  { %v2910_v13 = vpop.f32.mrf.mxu0 }
 0x64a   :  { %v2923_v12 = vpop.f32.mrf.mxu1 }
 0x64e   :  { %3209 = vmatmul.bf16.vlgmr.msra.gmra.mxu0 %v5204_v8  ;;  %3222 = vmatmul.bf16.vlgmr.msra.gmra.mxu1 %v5204_v8 }
 0x651   :  { %v2912_v21 = vpop.f32.mrf.mxu0 }
 0x652   :  { %v2925_v0 = vpop.f32.mrf.mxu1 }
 0x659   :  { %v2962_v14 = vpop.f32.mrf.mxu0 }
 0x65a   :  { %v2981_v45 = vmax.f32 %v2910_v13, %v2962_v14  ;;  %v2975_v25 = vpop.f32.mrf.mxu1  ;;  %v8322_v13 = vld [vmem:[#allocation28_spill] sm:$0xff] }
 0x65b   :  { %v2982_v1 = vmax.f32 %v2923_v12, %v2975_v25  ;;  %v5726_v12 = vld [vmem:[%s7964_s3 + $0x538] sm:$0xff]  ;;  %v8326_v25 = vld [vmem:[#allocation36_spill] sm:$0xff] }
 0x65c   :  { %v2983_v52 = vmax.f32 %v2979_v34, %v2981_v45  ;;  %3394 = vmatpush.bf16.msrb.mxu0 %v5726_v12  ;;  %v8328_v45 = vld [vmem:[#allocation38_spill] sm:$0xff]  ;;  %v5722_v34 = vld [vmem:[%s7964_s3 + $0x518] sm:$0xff] }
 0x65d   :  { %v2984_v39 = vmax.f32 %v2980_v38, %v2982_v1  ;;  %v5734_v38 = vld [vmem:[%s7964_s3 + $0x578] sm:$0xff] }
 0x65e   :  { %v2985_v35 = vadd.f32 %v2983_v52, %v6562_v58  ;;  %3407 = vmatpush.bf16.msrb.mxu1 %v5734_v38  ;;  %v8327_v52 = vld [vmem:[#allocation37_spill] sm:$0xff] }
 0x65f   :  { %v2986_v41 = vadd.f32 %v2984_v39, %v6566_v46  ;;  %v8321_v39 = vld [vmem:[#allocation27_spill] sm:$0xff]  ;;  %v5730_v1 = vld [vmem:[%s7964_s3 + $0x558] sm:$0xff] }
 0x660   :  { %v2987_v36 = vmax.f32 %v2985_v35, 0.0  ;;  %v8325_v35 = vld [vmem:[#allocation35_spill] sm:$0xff] }
 0x661   :  { %v2988_v26 = vmax.f32 %v2986_v41, 0.0  ;;  %v2964_v62 = vpop.f32.mrf.mxu0  ;;  %v5723_v41 = vld [vmem:[%s7964_s3 + $0x520] sm:$0xff] }
 0x662   :  { %v2989_v15 = vpack.c.bf16 %v2987_v36, %v2987_v36  ;;  %v2977_v21 = vpop.f32.mrf.mxu1  ;;  %v5725_v62 = vld [vmem:[%s7964_s3 + $0x530] sm:$0xff]  ;;  %v5732_v36 = vld [vmem:[%s7964_s3 + $0x568] sm:$0xff] }
 0x663   :  { %v2990_v0 = vpack.c.bf16 %v2988_v26, %v2988_v26  ;;  %3395 = vmatpush.bf16.msrb.mxu0 %v5725_v62  ;;  %v5724_v26 = vld [vmem:[%s7964_s3 + $0x528] sm:$0xff]  ;;  %v5721_v21 = vld [vmem:[%s7964_s3 + $0x510] sm:$0xff] }
 0x664   :  { %3128 = vmatmul.bf16.vlgmr.msra.gmra.mxu2 %v2989_v15  ;;  %v5733_v15 = vld [vmem:[%s7964_s3 + $0x570] sm:$0xff]  ;;  %v5720_v62 = vld [vmem:[%s7964_s3 + $0x508] sm:$0xff] }
 0x665   :  { %3141 = vmatmul.bf16.vlgmr.msra.gmra.mxu3 %v2990_v0  ;;  %3227 = vmatpush.bf16.msra.mxu2 %v6110_v61  ;;  %v5729_v0 = vld [vmem:[%s7964_s3 + $0x550] sm:$0xff] }
 0x666   :  { %3240 = vmatpush.bf16.msra.mxu3 %v6122_v2  ;;  %3408 = vmatpush.bf16.msrb.mxu1 %v5733_v15  ;;  %v5728_v15 = vld [vmem:[%s7964_s3 + $0x548] sm:$0xff] }
 0x667   :  { %3396 = vmatpush.bf16.msrb.mxu0 %v5724_v26  ;;  %v5719_v26 = vld [vmem:[%s7964_s3 + $0x500] sm:$0xff] }
 0x669   :  { %3228 = vmatpush.bf16.msra.mxu2 %v6154_v22 }
 0x66a   :  { %3241 = vmatpush.bf16.msra.mxu3 %v6166_v31  ;;  %3409 = vmatpush.bf16.msrb.mxu1 %v5732_v36  ;;  %v5727_v36 = vld [vmem:[%s7964_s3 + $0x540] sm:$0xff] }
 0x66b   :  { %3397 = vmatpush.bf16.msrb.mxu0 %v5723_v41  ;;  %v8329_v41 = vld [vmem:[#allocation2_spill] sm:$0xff] }
 0x66d   :  { %3229 = vmatpush.bf16.msra.mxu2 %v6194_v47 }
 0x66e   :  { %3242 = vmatpush.bf16.msra.mxu3 %v6206_v54  ;;  %3410 = vmatpush.bf16.msrb.mxu1 %v5731_v28  ;;  %v8330_v28 = vld [vmem:[#allocation3_spill] sm:$0xff] }
 0x66f   :  { %3398 = vmatpush.bf16.msrb.mxu0 %v5722_v34 }
 0x671   :  { %3230 = vmatpush.bf16.msra.mxu2 %v8096_v49 }
 0x672   :  { %3243 = vmatpush.bf16.msra.mxu3 %v8097_v53  ;;  %3411 = vmatpush.bf16.msrb.mxu1 %v5730_v1 }
 0x673   :  { %3399 = vmatpush.bf16.msrb.mxu0 %v5721_v21  ;;  %v8331_v21 = vld [vmem:[#allocation4_spill] sm:$0xff] }
 0x674   :  { %3183 = vmatmul.bf16.vlgmr.msrb.gmra.mxu2 %v5204_v8 }
 0x675   :  { %3196 = vmatmul.bf16.vlgmr.msrb.gmra.mxu3 %v5204_v8  ;;  %3231 = vmatpush.bf16.msra.mxu2 %v8100_v4 }
 0x676   :  { %3244 = vmatpush.bf16.msra.mxu3 %v8101_v24  ;;  %3412 = vmatpush.bf16.msrb.mxu1 %v5729_v0  ;;  %v8332_v0 = vld [vmem:[#allocation5_spill] sm:$0xff] }
 0x677   :  { %3400 = vmatpush.bf16.msrb.mxu0 %v5720_v62 }
 0x679   :  { %3232 = vmatpush.bf16.msra.mxu2 %v8103_v30 }
 0x67a   :  { %3245 = vmatpush.bf16.msra.mxu3 %v8104_v11  ;;  %3413 = vmatpush.bf16.msrb.mxu1 %v5728_v15 }
 0x67b   :  { %3401 = vmatpush.bf16.msrb.mxu0 %v5719_v26  ;;  %v8336_v26 = vld [vmem:[#allocation11_spill] sm:$0xff] }
 0x67d   :  { %3233 = vmatpush.bf16.msra.mxu2 %v6338_v63 }
 0x67e   :  { %3246 = vmatpush.bf16.msra.mxu3 %v6350_v32  ;;  %3414 = vmatpush.bf16.msrb.mxu1 %v5727_v36 }
 0x67f   :  { %3449 = vmatpush.bf16.msra.mxu0 %v8329_v41  ;;  %v8337_v41 = vld [vmem:[#allocation13_spill] sm:$0xff] }
 0x681   :  { %3234 = vmatpush.bf16.msra.mxu2 %v6374_v48 }
 0x682   :  { %3247 = vmatpush.bf16.msra.mxu3 %v6377_v40  ;;  %3462 = vmatpush.bf16.msra.mxu1 %v8330_v28  ;;  %v8338_v28 = vld [vmem:[#allocation14_spill] sm:$0xff] }
 0x683   :  { %3450 = vmatpush.bf16.msra.mxu0 %v8331_v21  ;;  %v8339_v21 = vld [vmem:[#allocation8_spill] sm:$0xff] }
 0x684   :  { %3235 = vmatmul.bf16.vlgmr.msra.gmra.mxu2 %v5204_v8 }
 0x685   :  { %3423 = vmatpush.bf16.msrb.mxu2 %v5807_v3  ;;  %3248 = vmatmul.bf16.vlgmr.msra.gmra.mxu3 %v5204_v8 }
 0x686   :  { %3436 = vmatpush.bf16.msrb.mxu3 %v5818_v7  ;;  %3463 = vmatpush.bf16.msra.mxu1 %v8332_v0  ;;  %v8341_v0 = vld [vmem:[#allocation15_spill] sm:$0xff] }
 0x689   :  { %3424 = vmatpush.bf16.msrb.mxu2 %v5845_v16 }
 0x68a   :  { %3437 = vmatpush.bf16.msrb.mxu3 %v5847_v17 }
 0x68d   :  { %3425 = vmatpush.bf16.msrb.mxu2 %v5882_v29 }
 0x68e   :  { %3438 = vmatpush.bf16.msrb.mxu3 %v5895_v33 }
 0x691   :  { %3426 = vmatpush.bf16.msrb.mxu2 %v8125_v18 }
 0x692   :  { %3439 = vmatpush.bf16.msrb.mxu3 %v8126_v42 }
 0x695   :  { %3427 = vmatpush.bf16.msrb.mxu2 %v8127_v9 }
 0x696   :  { %3440 = vmatpush.bf16.msrb.mxu3 %v5967_v57 }
 0x699   :  { %3428 = vmatpush.bf16.msrb.mxu2 %v5999_v5 }
 0x69a   :  { %3441 = vmatpush.bf16.msrb.mxu3 %v6003_v6 }
 0x69d   :  { %3429 = vmatpush.bf16.msrb.mxu2 %v6035_v23 }
 0x69e   :  { %3442 = vmatpush.bf16.msrb.mxu3 %v6045_v27 }
 0x6a1   :  { %3430 = vmatpush.bf16.msrb.mxu2 %v6080_v43 }
 0x6a2   :  { %3443 = vmatpush.bf16.msrb.mxu3 %v6093_v51 }
 0x6a5   :  { %3475 = vmatpush.bf16.msra.mxu2 %v6106_v59 }
 0x6a6   :  { %3488 = vmatpush.bf16.msra.mxu3 %v6108_v60 }
 0x6a9   :  { %3476 = vmatpush.bf16.msra.mxu2 %v6148_v19 }
 0x6aa   :  { %3489 = vmatpush.bf16.msra.mxu3 %v6152_v20 }
 0x6ad   :  { %3477 = vmatpush.bf16.msra.mxu2 %v8105_v44 }
 0x6ae   :  { %3490 = vmatpush.bf16.msra.mxu3 %v8291_v55 }
 0x6b1   :  { %3478 = vmatpush.bf16.msra.mxu2 %v8292_v50 }
 0x6b2   :  { %3491 = vmatpush.bf16.msra.mxu3 %v8320_v10 }
 0x6b5   :  { %3479 = vmatpush.bf16.msra.mxu2 %v8321_v39 }
 0x6b6   :  { %3492 = vmatpush.bf16.msra.mxu3 %v8322_v13 }
 0x6b9   :  { %3480 = vmatpush.bf16.msra.mxu2 %v8323_v37 }
 0x6ba   :  { %3493 = vmatpush.bf16.msra.mxu3 %v8324_v56 }
 0x6bb   :  { %v3158_v8 = vpop.f32.mrf.mxu0  ;;  %v3171_v14 = vpop.f32.mrf.mxu1 }
 0x6bd   :  { %3481 = vmatpush.bf16.msra.mxu2 %v8325_v35 }
 0x6be   :  { %3494 = vmatpush.bf16.msra.mxu3 %v8326_v25 }
 0x6c1   :  { %3482 = vmatpush.bf16.msra.mxu2 %v8327_v52 }
 0x6c2   :  { %3495 = vmatpush.bf16.msra.mxu3 %v8328_v45  ;;  %v8335_v45 = vld [vmem:[#allocation10_spill] sm:$0xff] }
 0x6c3   :  { %v3160_v12 = vpop.f32.mrf.mxu0  ;;  %v3173_v38 = vpop.f32.mrf.mxu1 }
 0x6c4   :  { %v8333_v12 = vld [vmem:[#allocation6_spill] sm:$0xff]  ;;  %v8334_v38 = vld [vmem:[#allocation7_spill] sm:$0xff] }
 0x6c5   :  { %3451 = vmatpush.bf16.msra.mxu0 %v8333_v12  ;;  %3464 = vmatpush.bf16.msra.mxu1 %v8334_v38  ;;  %v8342_v12 = vld [vmem:[#allocation16_spill] sm:$0xff] }
 0x6c9   :  { %3452 = vmatpush.bf16.msra.mxu0 %v8335_v45  ;;  %3465 = vmatpush.bf16.msra.mxu1 %v8336_v26 }
 0x6cb   :  { %v3210_v34 = vpop.f32.mrf.mxu0  ;;  %v3223_v1 = vpop.f32.mrf.mxu1 }
 0x6cc   :  { %v3253_v45 = vmax.f32 %v3158_v8, %v3210_v34  ;;  %v5743_v8 = vld [vmem:[%s7964_s3 + $0x5c0] sm:$0xff] }
 0x6cd   :  { %3453 = vmatpush.bf16.msra.mxu0 %v8337_v41  ;;  %3466 = vmatpush.bf16.msra.mxu1 %v8338_v28  ;;  %v8343_v28 = vld [vmem:[#allocation17_spill] sm:$0xff] }
 0x6d1   :  { %3454 = vmatpush.bf16.msra.mxu0 %v8341_v0  ;;  %3467 = vmatpush.bf16.msra.mxu1 %v8342_v12 }
 0x6d3   :  { %v3212_v62 = vpop.f32.mrf.mxu0  ;;  %v3225_v15 = vpop.f32.mrf.mxu1 }
 0x6d4   :  { %v7753_v62 = vld [vmem:[%s7963_s0 + $0x2c] sm:$0xf] }
 0x6d5   :  { %3431 = vmatmul.bf16.vlgmr.msrb.gmra.mxu2 %v7753_v62  ;;  %3444 = vmatmul.bf16.vlgmr.msrb.gmra.mxu3 %v7753_v62 }
 0x6d6   :  { %3455 = vmatpush.bf16.msra.mxu0 %v8343_v28  ;;  %v3254_v28 = vmax.f32 %v3171_v14, %v3223_v1  ;;  %v8358_v14 = vld [vmem:[#allocation2_spill] sm:$0xff]  ;;  %v8360_v1 = vld [vmem:[#allocation4_spill] sm:$0xff] }
 0x6e5   :  { %3483 = vmatmul.bf16.vlgmr.msra.gmra.mxu2 %v7753_v62  ;;  %3496 = vmatmul.bf16.vlgmr.msra.gmra.mxu3 %v7753_v62 }
 0x6e7   :  { %v3129_v36 = vpop.f32.mrf.mxu2 }
 0x6e8   :  { %v3142_v52 = vpop.f32.mrf.mxu3 }
 0x6e9   :  { %v3143_v25 = vadd.f32 %v3142_v52, %v3129_v36  ;;  %v8344_v52 = vld [vmem:[#allocation18_spill] sm:$0xff]  ;;  %v8346_v36 = vld [vmem:[#allocation20_spill] sm:$0xff] }
 0x6ea   :  { %3468 = vmatpush.bf16.msra.mxu1 %v8344_v52 }
 0x6eb   :  { %v7746_v35 = vadd.f32 %v3143_v25, %v8339_v21  ;;  %v8345_v21 = vld [vmem:[#allocation19_spill] sm:$0xff] }
 0x6ec   :  { %3456 = vmatpush.bf16.msra.mxu0 %v8345_v21 }
 0x6ed   :  { %8340 = vst [vmem:[#allocation9_spill] sm:$0xff] %v7746_v35 }
 0x6ee   :  { %3469 = vmatpush.bf16.msra.mxu1 %v8346_v36 }
 0x6ef   :  { %v3131_v15 = vpop.f32.mrf.mxu2 }
 0x6f0   :  { %v3144_v25 = vpop.f32.mrf.mxu3 }
 0x6f7   :  { %v3184_v12 = vpop.f32.mrf.mxu2 }
 0x6f8   :  { %v3197_v0 = vpop.f32.mrf.mxu3 }
 0x6ff   :  { %v3186_v35 = vpop.f32.mrf.mxu2 }
 0x700   :  { %v3199_v41 = vpop.f32.mrf.mxu3  ;;  %v5742_v35 = vld [vmem:[%s7964_s3 + $0x5b8] sm:$0xff] }
 0x701   :  { %3668 = vmatpush.bf16.msrb.mxu2 %v5742_v35  ;;  %v8359_v41 = vld [vmem:[#allocation3_spill] sm:$0xff] }
 0x707   :  { %v3236_v26 = vpop.f32.mrf.mxu2 }
 0x708   :  { %v3255_v15 = vmax.f32 %v3184_v12, %v3236_v26  ;;  %v3249_v38 = vpop.f32.mrf.mxu3  ;;  %v8362_v12 = vld [vmem:[#allocation6_spill] sm:$0xff] }
 0x709   :  { %v3256_v56 = vmax.f32 %v3197_v0, %v3249_v38  ;;  %v8361_v0 = vld [vmem:[#allocation5_spill] sm:$0xff]  ;;  %v8363_v38 = vld [vmem:[#allocation7_spill] sm:$0xff] }
 0x70a   :  { %v3257_v52 = vmax.f32 %v3253_v45, %v3255_v15  ;;  %v5735_v45 = vld [vmem:[%s7964_s3 + $0x580] sm:$0xff]  ;;  %v8366_v15 = vld [vmem:[#allocation13_spill] sm:$0xff] }
 0x70b   :  { %v3258_v25 = vmax.f32 %v3254_v28, %v3256_v56  ;;  %v5750_v56 = vld [vmem:[%s7964_s3 + $0x5f8] sm:$0xff] }
 0x70c   :  { %v3259_v21 = vadd.f32 %v3257_v52, %v6562_v58  ;;  %3681 = vmatpush.bf16.msrb.mxu3 %v5750_v56  ;;  %v8364_v52 = vld [vmem:[#allocation10_spill] sm:$0xff] }
 0x70d   :  { %v3260_v36 = vadd.f32 %v3258_v25, %v6566_v46  ;;  %v8367_v25 = vld [vmem:[#allocation14_spill] sm:$0xff] }
 0x70e   :  { %v3261_v37 = vmax.f32 %v3259_v21, 0.0  ;;  %v8365_v21 = vld [vmem:[#allocation11_spill] sm:$0xff] }
 0x70f   :  { %v3262_v13 = vmax.f32 %v3260_v36, 0.0  ;;  %v3238_v39 = vpop.f32.mrf.mxu2 }
 0x710   :  { %v3263_v10 = vpack.c.bf16 %v3261_v37, %v3261_v37  ;;  %v3251_v50 = vpop.f32.mrf.mxu3  ;;  %v5748_v39 = vld [vmem:[%s7964_s3 + $0x5e8] sm:$0xff]  ;;  %v5747_v37 = vld [vmem:[%s7964_s3 + $0x5e0] sm:$0xff] }
 0x711   :  { %v3264_v55 = vpack.c.bf16 %v3262_v13, %v3262_v13  ;;  %v5741_v50 = vld [vmem:[%s7964_s3 + $0x5b0] sm:$0xff]  ;;  %v5739_v13 = vld [vmem:[%s7964_s3 + $0x5a0] sm:$0xff] }
 0x712   :  { %3402 = vmatmul.bf16.vlgmr.msrb.gmra.mxu0 %v3263_v10  ;;  %3669 = vmatpush.bf16.msrb.mxu2 %v5741_v50  ;;  %v5740_v10 = vld [vmem:[%s7964_s3 + $0x5a8] sm:$0xff]  ;;  %v8368_v50 = vld [vmem:[#allocation9_spill] sm:$0xff] }
 0x713   :  { %3415 = vmatmul.bf16.vlgmr.msrb.gmra.mxu1 %v3264_v55  ;;  %3501 = vmatpush.bf16.msrb.mxu0 %v6110_v61  ;;  %v5749_v55 = vld [vmem:[%s7964_s3 + $0x5f0] sm:$0xff] }
 0x714   :  { %3514 = vmatpush.bf16.msrb.mxu1 %v6122_v2  ;;  %3682 = vmatpush.bf16.msrb.mxu3 %v5749_v55 }
 0x716   :  { %3670 = vmatpush.bf16.msrb.mxu2 %v5740_v10  ;;  %v8369_v10 = vld [vmem:[#allocation15_spill] sm:$0xff] }
 0x717   :  { %3502 = vmatpush.bf16.msrb.mxu0 %v6154_v22 }
 0x718   :  { %3515 = vmatpush.bf16.msrb.mxu1 %v6166_v31  ;;  %3683 = vmatpush.bf16.msrb.mxu3 %v5748_v39  ;;  %v8370_v39 = vld [vmem:[#allocation16_spill] sm:$0xff] }
 0x71a   :  { %3671 = vmatpush.bf16.msrb.mxu2 %v5739_v13 }
 0x71b   :  { %3503 = vmatpush.bf16.msrb.mxu0 %v6194_v47 }
 0x71c   :  { %3516 = vmatpush.bf16.msrb.mxu1 %v6206_v54  ;;  %3684 = vmatpush.bf16.msrb.mxu3 %v5747_v37  ;;  %v8371_v37 = vld [vmem:[#allocation17_spill] sm:$0xff] }
 0x71f   :  { %3504 = vmatpush.bf16.msrb.mxu0 %v8096_v49 }
 0x720   :  { %3517 = vmatpush.bf16.msrb.mxu1 %v8097_v53 }
 0x722   :  { %3457 = vmatmul.bf16.vlgmr.msra.gmra.mxu0 %v7753_v62 }
 0x723   :  { %3470 = vmatmul.bf16.vlgmr.msra.gmra.mxu1 %v7753_v62  ;;  %3505 = vmatpush.bf16.msrb.mxu0 %v8100_v4 }
 0x724   :  { %3518 = vmatpush.bf16.msrb.mxu1 %v8101_v24 }
 0x727   :  { %3506 = vmatpush.bf16.msrb.mxu0 %v8103_v30 }
 0x728   :  { %3519 = vmatpush.bf16.msrb.mxu1 %v8104_v11 }
 0x72b   :  { %3507 = vmatpush.bf16.msrb.mxu0 %v6338_v63 }
 0x72c   :  { %3520 = vmatpush.bf16.msrb.mxu1 %v6350_v32 }
 0x72f   :  { %3508 = vmatpush.bf16.msrb.mxu0 %v6374_v48 }
 0x730   :  { %3521 = vmatpush.bf16.msrb.mxu1 %v6377_v40 }
 0x732   :  { %3509 = vmatmul.bf16.vlgmr.msrb.gmra.mxu0 %v7753_v62 }
 0x733   :  { %3697 = vmatpush.bf16.msra.mxu0 %v5807_v3  ;;  %3522 = vmatmul.bf16.vlgmr.msrb.gmra.mxu1 %v7753_v62  ;;  %v8347_v3 = vld [vmem:[#allocation22_spill] sm:$0xff] }
 0x734   :  { %3710 = vmatpush.bf16.msra.mxu1 %v5818_v7  ;;  %v8348_v7 = vld [vmem:[#allocation23_spill] sm:$0xff] }
 0x737   :  { %3698 = vmatpush.bf16.msra.mxu0 %v5845_v16  ;;  %v8349_v16 = vld [vmem:[#allocation24_spill] sm:$0xff] }
 0x738   :  { %3711 = vmatpush.bf16.msra.mxu1 %v5847_v17  ;;  %v8350_v17 = vld [vmem:[#allocation27_spill] sm:$0xff] }
 0x73b   :  { %3699 = vmatpush.bf16.msra.mxu0 %v5882_v29  ;;  %v8351_v29 = vld [vmem:[#allocation28_spill] sm:$0xff] }
 0x73c   :  { %3712 = vmatpush.bf16.msra.mxu1 %v5895_v33  ;;  %v8352_v33 = vld [vmem:[#allocation31_spill] sm:$0xff] }
 0x73f   :  { %3700 = vmatpush.bf16.msra.mxu0 %v8125_v18 }
 0x740   :  { %3713 = vmatpush.bf16.msra.mxu1 %v8126_v42  ;;  %v5736_v42 = vld [vmem:[%s7964_s3 + $0x588] sm:$0xff] }
 0x743   :  { %3701 = vmatpush.bf16.msra.mxu0 %v8127_v9  ;;  %v5744_v9 = vld [vmem:[%s7964_s3 + $0x5c8] sm:$0xff] }
 0x744   :  { %3714 = vmatpush.bf16.msra.mxu1 %v5967_v57  ;;  %v8353_v57 = vld [vmem:[#allocation32_spill] sm:$0xff] }
 0x747   :  { %3702 = vmatpush.bf16.msra.mxu0 %v5999_v5  ;;  %v8354_v5 = vld [vmem:[#allocation35_spill] sm:$0xff] }
 0x748   :  { %3715 = vmatpush.bf16.msra.mxu1 %v6003_v6  ;;  %v8355_v6 = vld [vmem:[#allocation36_spill] sm:$0xff] }
 0x74b   :  { %3703 = vmatpush.bf16.msra.mxu0 %v6035_v23  ;;  %v8356_v23 = vld [vmem:[#allocation37_spill] sm:$0xff] }
 0x74c   :  { %3716 = vmatpush.bf16.msra.mxu1 %v6045_v27  ;;  %v8357_v27 = vld [vmem:[#allocation38_spill] sm:$0xff] }
 0x74f   :  { %3704 = vmatpush.bf16.msra.mxu0 %v6080_v43 }
 0x750   :  { %3717 = vmatpush.bf16.msra.mxu1 %v6093_v51 }
 0x753   :  { %3749 = vmatpush.bf16.msrb.mxu0 %v6106_v59  ;;  %v5738_v59 = vld [vmem:[%s7964_s3 + $0x598] sm:$0xff] }
 0x754   :  { %3762 = vmatpush.bf16.msrb.mxu1 %v6108_v60  ;;  %v5746_v60 = vld [vmem:[%s7964_s3 + $0x5d8] sm:$0xff]  ;;  %3672 = vmatpush.bf16.msrb.mxu2 %v5738_v59 }
 0x755   :  { %3685 = vmatpush.bf16.msrb.mxu3 %v5746_v60 }
 0x757   :  { %3750 = vmatpush.bf16.msrb.mxu0 %v6148_v19  ;;  %v5737_v19 = vld [vmem:[%s7964_s3 + $0x590] sm:$0xff] }
 0x758   :  { %3763 = vmatpush.bf16.msrb.mxu1 %v6152_v20  ;;  %v3432_v43 = vpop.f32.mrf.mxu2  ;;  %v3445_v51 = vpop.f32.mrf.mxu3  ;;  %v5745_v20 = vld [vmem:[%s7964_s3 + $0x5d0] sm:$0xff]  ;;  %3673 = vmatpush.bf16.msrb.mxu2 %v5737_v19 }
 0x759   :  { %3686 = vmatpush.bf16.msrb.mxu3 %v5745_v20 }
 0x75b   :  { %3751 = vmatpush.bf16.msrb.mxu0 %v8105_v44 }
 0x75c   :  { %3764 = vmatpush.bf16.msrb.mxu1 %v8347_v3  ;;  %3674 = vmatpush.bf16.msrb.mxu2 %v5736_v42  ;;  %v8372_v3 = vld [vmem:[#allocation18_spill] sm:$0xff] }
 0x75d   :  { %3687 = vmatpush.bf16.msrb.mxu3 %v5744_v9 }
 0x75f   :  { %3752 = vmatpush.bf16.msrb.mxu0 %v8348_v7 }
 0x760   :  { %3765 = vmatpush.bf16.msrb.mxu1 %v8349_v16  ;;  %v3434_v44 = vpop.f32.mrf.mxu2  ;;  %v3447_v18 = vpop.f32.mrf.mxu3  ;;  %3675 = vmatpush.bf16.msrb.mxu2 %v5735_v45  ;;  %v8373_v16 = vld [vmem:[#allocation19_spill] sm:$0xff] }
 0x761   :  { %3688 = vmatpush.bf16.msrb.mxu3 %v5743_v8 }
 0x763   :  { %3753 = vmatpush.bf16.msrb.mxu0 %v8350_v17  ;;  %v8374_v17 = vld [vmem:[#allocation20_spill] sm:$0xff] }
 0x764   :  { %3766 = vmatpush.bf16.msrb.mxu1 %v8351_v29  ;;  %3723 = vmatpush.bf16.msra.mxu2 %v8358_v14 }
 0x765   :  { %3736 = vmatpush.bf16.msra.mxu3 %v8359_v41 }
 0x767   :  { %3754 = vmatpush.bf16.msrb.mxu0 %v8352_v33 }
 0x768   :  { %3767 = vmatpush.bf16.msrb.mxu1 %v8353_v57  ;;  %v3484_v28 = vpop.f32.mrf.mxu2  ;;  %v3497_v34 = vpop.f32.mrf.mxu3  ;;  %3724 = vmatpush.bf16.msra.mxu2 %v8360_v1  ;;  %v5398_v57 = vld [vmem:[%s7963_s0 + $0x30] sm:$0xf] }
 0x769   :  { %3737 = vmatpush.bf16.msra.mxu3 %v8361_v0  ;;  %3705 = vmatmul.bf16.vlgmr.msra.gmra.mxu0 %v5398_v57  ;;  %v3528_v19 = vmax.f32 %v3445_v51, %v3497_v34  ;;  %v5761_v34 = vld [vmem:[%s7964_s3 + $0x650] sm:$0xff] }
 0x76a   :  { %3718 = vmatmul.bf16.vlgmr.msra.gmra.mxu1 %v5398_v57 }
 0x76b   :  { %3755 = vmatpush.bf16.msrb.mxu0 %v8354_v5 }
 0x76c   :  { %3768 = vmatpush.bf16.msrb.mxu1 %v8355_v6  ;;  %3725 = vmatpush.bf16.msra.mxu2 %v8362_v12 }
 0x76d   :  { %3738 = vmatpush.bf16.msra.mxu3 %v8363_v38 }
 0x76f   :  { %3756 = vmatpush.bf16.msrb.mxu0 %v8356_v23 }
 0x770   :  { %3769 = vmatpush.bf16.msrb.mxu1 %v8357_v27  ;;  %v3486_v26 = vpop.f32.mrf.mxu2  ;;  %v3499_v62 = vpop.f32.mrf.mxu3  ;;  %3726 = vmatpush.bf16.msra.mxu2 %v8364_v52  ;;  %v3527_v27 = vmax.f32 %v3432_v43, %v3484_v28  ;;  %v5753_v28 = vld [vmem:[%s7964_s3 + $0x610] sm:$0xff]  ;;  %v5760_v52 = vld [vmem:[%s7964_s3 + $0x648] sm:$0xff] }
 0x771   :  { %3739 = vmatpush.bf16.msra.mxu3 %v8365_v21  ;;  %v5752_v62 = vld [vmem:[%s7964_s3 + $0x608] sm:$0xff] }
 0x774   :  { %3727 = vmatpush.bf16.msra.mxu2 %v8366_v15  ;;  %v5759_v15 = vld [vmem:[%s7964_s3 + $0x640] sm:$0xff] }
 0x775   :  { %3740 = vmatpush.bf16.msra.mxu3 %v8367_v25 }
 0x778   :  { %3728 = vmatpush.bf16.msra.mxu2 %v8369_v10 }
 0x779   :  { %3741 = vmatpush.bf16.msra.mxu3 %v8370_v39  ;;  %3757 = vmatmul.bf16.vlgmr.msrb.gmra.mxu0 %v5398_v57 }
 0x77a   :  { %3770 = vmatmul.bf16.vlgmr.msrb.gmra.mxu1 %v5398_v57 }
 0x77c   :  { %3729 = vmatpush.bf16.msra.mxu2 %v8371_v37 }
 0x77d   :  { %3742 = vmatpush.bf16.msra.mxu3 %v8372_v3 }
 0x780   :  { %3730 = vmatpush.bf16.msra.mxu2 %v8373_v16 }
 0x781   :  { %3743 = vmatpush.bf16.msra.mxu3 %v8374_v17 }
 0x78f   :  { %v3403_v36 = vpop.f32.mrf.mxu0 }
 0x790   :  { %v3416_v35 = vpop.f32.mrf.mxu1 }
 0x791   :  { %v3417_v56 = vadd.f32 %v3416_v35, %v3403_v36  ;;  %v5751_v36 = vld [vmem:[%s7964_s3 + $0x600] sm:$0xff] }
 0x793   :  { %v7876_v55 = vadd.f32 %v3417_v56, %v8368_v50 }
 0x797   :  { %v3405_v13 = vpop.f32.mrf.mxu0 }
 0x798   :  { %v3418_v7 = vpop.f32.mrf.mxu1 }
 0x79f   :  { %v3458_v29 = vpop.f32.mrf.mxu0 }
 0x7a0   :  { %v3471_v33 = vpop.f32.mrf.mxu1 }
 0x7a7   :  { %v3460_v5 = vpop.f32.mrf.mxu0 }
 0x7a8   :  { %v3473_v6 = vpop.f32.mrf.mxu1 }
 0x7af   :  { %v3510_v23 = vpop.f32.mrf.mxu0 }
 0x7b0   :  { %v3529_v59 = vmax.f32 %v3458_v29, %v3510_v23  ;;  %v3523_v60 = vpop.f32.mrf.mxu1 }
 0x7b1   :  { %v3530_v20 = vmax.f32 %v3471_v33, %v3523_v60 }
 0x7b2   :  { %v3531_v44 = vmax.f32 %v3527_v27, %v3529_v59 }
 0x7b3   :  { %v3532_v18 = vmax.f32 %v3528_v19, %v3530_v20 }
 0x7b4   :  { %v3533_v42 = vadd.f32 %v3531_v44, %v6562_v58 }
 0x7b5   :  { %v3534_v9 = vadd.f32 %v3532_v18, %v6566_v46  ;;  %v5767_v18 = vld [vmem:[%s7966_s4] ss:$0 sm:$0xff] }
 0x7b6   :  { %v3535_v45 = vmax.f32 %v3533_v42, 0.0 }
 0x7b7   :  { %v3536_v8 = vmax.f32 %v3534_v9, 0.0  ;;  %v3512_v14 = vpop.f32.mrf.mxu0 }
 0x7b8   :  { %v3537_v41 = vpack.c.bf16 %v3535_v45, %v3535_v45  ;;  %v3525_v1 = vpop.f32.mrf.mxu1 }
 0x7b9   :  { %v3538_v0 = vpack.c.bf16 %v3536_v8, %v3536_v8 }
 0x7ba   :  { %3676 = vmatmul.bf16.vlgmr.msrb.gmra.mxu2 %v3537_v41 }
 0x7bb   :  { %3689 = vmatmul.bf16.vlgmr.msrb.gmra.mxu3 %v3538_v0  ;;  %3775 = vmatpush.bf16.msrb.mxu2 %v6110_v61 }
 0x7bc   :  { %3788 = vmatpush.bf16.msrb.mxu3 %v6122_v2 }
 0x7bf   :  { %3776 = vmatpush.bf16.msrb.mxu2 %v6154_v22 }
 0x7c0   :  { %3789 = vmatpush.bf16.msrb.mxu3 %v6166_v31 }
 0x7c3   :  { %3777 = vmatpush.bf16.msrb.mxu2 %v6194_v47  ;;  %v5758_v47 = vld [vmem:[%s7964_s3 + $0x638] sm:$0xff] }
 0x7c4   :  { %3790 = vmatpush.bf16.msrb.mxu3 %v6206_v54  ;;  %v5766_v54 = vld [vmem:[%s7964_s3 + $0x678] sm:$0xff]  ;;  %3942 = vmatpush.bf16.msra.mxu0 %v5758_v47 }
 0x7c5   :  { %3955 = vmatpush.bf16.msra.mxu1 %v5766_v54 }
 0x7c7   :  { %3778 = vmatpush.bf16.msrb.mxu2 %v8096_v49  ;;  %v5764_v49 = vld [vmem:[%s7964_s3 + $0x668] sm:$0xff] }
 0x7c8   :  { %3791 = vmatpush.bf16.msrb.mxu3 %v8097_v53  ;;  %v5755_v53 = vld [vmem:[%s7964_s3 + $0x620] sm:$0xff] }
 0x7ca   :  { %3731 = vmatmul.bf16.vlgmr.msra.gmra.mxu2 %v5398_v57 }
 0x7cb   :  { %3744 = vmatmul.bf16.vlgmr.msra.gmra.mxu3 %v5398_v57  ;;  %3779 = vmatpush.bf16.msrb.mxu2 %v8100_v4  ;;  %v5763_v4 = vld [vmem:[%s7964_s3 + $0x660] sm:$0xff] }
 0x7cc   :  { %3792 = vmatpush.bf16.msrb.mxu3 %v8101_v24  ;;  %v5754_v24 = vld [vmem:[%s7964_s3 + $0x618] sm:$0xff] }
 0x7cf   :  { %3780 = vmatpush.bf16.msrb.mxu2 %v8103_v30  ;;  %v5762_v30 = vld [vmem:[%s7964_s3 + $0x658] sm:$0xff] }
 0x7d0   :  { %3793 = vmatpush.bf16.msrb.mxu3 %v8104_v11  ;;  %v5757_v11 = vld [vmem:[%s7964_s3 + $0x630] sm:$0xff] }
 0x7d1   :  { %3943 = vmatpush.bf16.msra.mxu0 %v5757_v11 }
 0x7d3   :  { %3781 = vmatpush.bf16.msrb.mxu2 %v6338_v63  ;;  %v5765_v63 = vld [vmem:[%s7964_s3 + $0x670] sm:$0xff] }
 0x7d4   :  { %3794 = vmatpush.bf16.msrb.mxu3 %v6350_v32  ;;  %3956 = vmatpush.bf16.msra.mxu1 %v5765_v63  ;;  %v5756_v32 = vld [vmem:[%s7964_s3 + $0x628] sm:$0xff] }
 0x7d5   :  { %3944 = vmatpush.bf16.msra.mxu0 %v5756_v32 }
 0x7d7   :  { %3782 = vmatpush.bf16.msrb.mxu2 %v6374_v48 }
 0x7d8   :  { %3795 = vmatpush.bf16.msrb.mxu3 %v6377_v40  ;;  %3957 = vmatpush.bf16.msra.mxu1 %v5764_v49 }
 0x7d9   :  { %3945 = vmatpush.bf16.msra.mxu0 %v5755_v53 }
 0x7da   :  { %3783 = vmatmul.bf16.vlgmr.msrb.gmra.mxu2 %v5398_v57 }
 0x7db   :  { %3796 = vmatmul.bf16.vlgmr.msrb.gmra.mxu3 %v5398_v57 }
 0x7dc   :  { %3958 = vmatpush.bf16.msra.mxu1 %v5763_v4 }
 0x7dd   :  { %3946 = vmatpush.bf16.msra.mxu0 %v5754_v24 }
 0x7e0   :  { %3959 = vmatpush.bf16.msra.mxu1 %v5762_v30 }
 0x7e1   :  { %3947 = vmatpush.bf16.msra.mxu0 %v5753_v28 }
 0x7e4   :  { %3960 = vmatpush.bf16.msra.mxu1 %v5761_v34 }
 0x7e5   :  { %3948 = vmatpush.bf16.msra.mxu0 %v5752_v62 }
 0x7e6   :  { %v3706_v61 = vpop.f32.mrf.mxu0 }
 0x7e7   :  { %v3719_v2 = vpop.f32.mrf.mxu1 }
 0x7e8   :  { %3961 = vmatpush.bf16.msra.mxu1 %v5760_v52 }
 0x7e9   :  { %3949 = vmatpush.bf16.msra.mxu0 %v5751_v36 }
 0x7ec   :  { %3962 = vmatpush.bf16.msra.mxu1 %v5759_v15 }
 0x7ee   :  { %v3708_v22 = vpop.f32.mrf.mxu0 }
 0x7ef   :  { %v3721_v31 = vpop.f32.mrf.mxu1 }
 0x7f6   :  { %v3758_v40 = vpop.f32.mrf.mxu0 }
 0x7f7   :  { %v3771_v48 = vpop.f32.mrf.mxu1 }
 0x7f8   :  { %v3802_v7 = vmax.f32 %v3719_v2, %v3771_v48 }
 0x7fe   :  { %v3760_v43 = vpop.f32.mrf.mxu0 }
 0x7ff   :  { %v3773_v51 = vpop.f32.mrf.mxu1 }
 0x83d   :  { %v3677_v12 = vpop.f32.mrf.mxu2 }
 0x83e   :  { %v3690_v38 = vpop.f32.mrf.mxu3 }
 0x83f   :  { %v3691_v26 = vadd.f32 %v3690_v38, %v3677_v12 }
 0x841   :  { %v3694_v21 = vadd.f32 %v3691_v26, %v7876_v55  ;;  %v3801_v55 = vmax.f32 %v3706_v61, %v3758_v40 }
 0x845   :  { %v3679_v25 = vpop.f32.mrf.mxu2 }
 0x846   :  { %v3692_v35 = vpop.f32.mrf.mxu3 }
 0x84d   :  { %v3732_v56 = vpop.f32.mrf.mxu2 }
 0x84e   :  { %v3745_v50 = vpop.f32.mrf.mxu3 }
 0x855   :  { %v3734_v10 = vpop.f32.mrf.mxu2 }
 0x856   :  { %v3747_v39 = vpop.f32.mrf.mxu3 }
 0x85d   :  { %v3784_v13 = vpop.f32.mrf.mxu2 }
 0x85e   :  { %v3803_v37 = vmax.f32 %v3732_v56, %v3784_v13  ;;  %v3797_v3 = vpop.f32.mrf.mxu3 }
 0x85f   :  { %v3804_v16 = vmax.f32 %v3745_v50, %v3797_v3 }
 0x860   :  { %v3805_v17 = vmax.f32 %v3801_v55, %v3803_v37 }
 0x861   :  { %v3806_v29 = vmax.f32 %v3802_v7, %v3804_v16 }
 0x862   :  { %v3807_v33 = vadd.f32 %v3805_v17, %v6562_v58 }
 0x863   :  { %v3808_v57 = vadd.f32 %v3806_v29, %v6566_v46 }
 0x864   :  { %v3809_v5 = vmax.f32 %v3807_v33, 0.0 }
 0x865   :  { %v3810_v6 = vmax.f32 %v3808_v57, 0.0  ;;  %v3786_v23 = vpop.f32.mrf.mxu2 }
 0x866   :  { %v3811_v27 = vpack.c.bf16 %v3809_v5, %v3809_v5  ;;  %v3799_v59 = vpop.f32.mrf.mxu3 }
 0x867   :  { %v3812_v60 = vpack.c.bf16 %v3810_v6, %v3810_v6 }
 0x868   :  { %3950 = vmatmul.bf16.vlgmr.msra.gmra.mxu0 %v3811_v27 }
 0x869   :  { %3963 = vmatmul.bf16.vlgmr.msra.gmra.mxu1 %v3812_v60 }
 0x8e5   :  { %v3951_v19 = vpop.f32.mrf.mxu0 }
 0x8e6   :  { %v3964_v20 = vpop.f32.mrf.mxu1 }
 0x8e7   :  { %v3965_v44 = vadd.f32 %v3964_v20, %v3951_v19 }
 0x8e9   :  { %v3968_v42 = vadd.f32 %v3965_v44, %v3694_v21 }
 0x8eb   :  { %v3973_v9 = vadd.f32 %v5767_v18, %v3968_v42 }
 0x8ed   :  { %3974 = vst [vmem:[%s7967_s5] sm:$0xff] %v3973_v9  ;;  %v3953_v46 = vpop.f32.mrf.mxu0 }
 0x8ee   :  { %v3966_v58 = vpop.f32.mrf.mxu1 }

</bundles_post_ra>
